<compile_context>
chip_gen: v7x
topology: tpu7x:2x2x1
jax: 0.10.0
libtpu: 0.0.40
codegen_flags: <defaults>
</compile_context>

<pallas_src>
import functools

import jax
import jax.numpy as jnp
from jax.experimental import pallas as pl
from jax.experimental.pallas import tpu as pltpu

LN_EPS = 1e-5        # torch.nn.LayerNorm default eps
CHAN_LN_EPS = 1e-6   # ChanLayerNorm eps for float32 inputs
MXU_DTYPE = jnp.bfloat16   # matmul operand dtype; accumulation stays f32


# ----------------------------------------------------------------------------
# In-kernel helpers
# ----------------------------------------------------------------------------
def _layer_norm(x, w, b, eps=LN_EPS):
    mean = jnp.mean(x, axis=-1, keepdims=True)
    var = jnp.mean((x - mean) ** 2, axis=-1, keepdims=True)
    return (x - mean) * jax.lax.rsqrt(var + eps) * w + b


def _mxu_dot(a, w):
    """MXU matmul: activation cast to bf16, weight already bf16, f32 accumulate."""
    return jnp.dot(a.astype(MXU_DTYPE), w, preferred_element_type=jnp.float32)


def _fs(arr):
    """Full-array (untiled) BlockSpec for a grid-invariant operand."""
    # TODO(synk): on v7x add pipeline_mode=pl.Buffered(1) for these
    # grid-invariant weight operands (block index never changes across the
    # batch grid) to halve weight VMEM residency.
    nd = arr.ndim
    return pl.BlockSpec(arr.shape, lambda b, nd=nd: (0,) * nd)


# ----------------------------------------------------------------------------
# Fused per-layer kernel:
#   x = x + 0.5*ff1(LN(x)); x = x + attn(LN(x)); x = x + conv(x);
#   x = x + 0.5*ff2(LN(x)); x = postLN(x)
# ----------------------------------------------------------------------------
def _conformer_layer_kernel(*refs, heads, dim_head, conv_kernel, seq_len,
                            inner_conv):
    (x_ref,
     # ff1
     f1_lnw, f1_lnb, f1_w1, f1_b1, f1_w2, f1_b2,
     # attention
     a_lnw, a_lnb, a_wq, a_wk, a_wv, a_wo, a_bo, cos_ref, sin_ref,
     # conv module
     c_lnw, c_lnb, c_wout, c_bout, c_wgate, c_bgate, c_dww, c_dwb, c_gamma,
     c_w2, c_b2,
     # ff2
     f2_lnw, f2_lnb, f2_w1, f2_b1, f2_w2, f2_b2,
     # post norm
     p_lnw, p_lnb,
     # output
     o_ref) = refs

    x = x_ref[0]                                            # (N, D) f32

    # ---------------- FeedForward helper (Scale(0.5, PreNorm(FF))) --------
    def ff(xin, lnw, lnb, w1, b1, w2, b2):
        h = _layer_norm(xin, lnw[...], lnb[...])
        h = _mxu_dot(h, w1[...]) + b1[...]
        h = h * jax.nn.sigmoid(h)                           # Swish (f32)
        return _mxu_dot(h, w2[...]) + b2[...]

    # ---------------- FF1 --------------------------------------------------
    x = x + 0.5 * ff(x, f1_lnw, f1_lnb, f1_w1, f1_b1, f1_w2, f1_b2)

    # ---------------- Attention: PreNorm -> rotary -> softmax -> out proj --
    h = _layer_norm(x, a_lnw[...], a_lnb[...])
    # Lane-dense fused projections: one (N, D) @ (D, H*Dh) matmul each.
    q_flat = _mxu_dot(h, a_wq[...])                         # (N, H*Dh) f32
    k_flat = _mxu_dot(h, a_wk[...])
    v_flat = _mxu_dot(h, a_wv[...])

    def split_heads(t):                                     # (N, H*Dh) -> (H, N, Dh)
        return jnp.stack(
            [t[:, hd * dim_head:(hd + 1) * dim_head] for hd in range(heads)],
            axis=0)

    cos = cos_ref[...][None]                                # (1, N, Dh)
    sin = sin_ref[...][None]
    half = dim_head // 2

    def rope(t):                                            # (H, N, Dh) f32
        t1 = t[..., :half]
        t2 = t[..., half:]
        rot = jnp.concatenate([-t2, t1], axis=-1)           # rotate_half
        return t * cos + rot * sin

    q = rope(split_heads(q_flat))
    k = rope(split_heads(k_flat))
    v = split_heads(v_flat)

    # TODO(synk): for production sequence lengths, tile over query blocks with
    # online softmax (flash-style m/l accumulators); the full (H, N, N) scores
    # below assume small N so they fit in VMEM.
    scale = dim_head ** (-0.5)
    scores = jnp.einsum('hnd,hmd->hnm', q.astype(MXU_DTYPE), k.astype(MXU_DTYPE),
                        preferred_element_type=jnp.float32) * scale
    scores = scores - jnp.max(scores, axis=-1, keepdims=True)
    e = jnp.exp(scores)
    probs = e * pl.reciprocal(jnp.sum(e, axis=-1, keepdims=True), approx=True)
    ctx = jnp.einsum('hnm,hmd->hnd', probs.astype(MXU_DTYPE), v.astype(MXU_DTYPE),
                     preferred_element_type=jnp.float32)    # (H, N, Dh)

    # Lane-dense fused output projection: (N, H*Dh) @ (H*Dh, D), single matmul.
    ctx_flat = jnp.concatenate([ctx[hd] for hd in range(heads)], axis=-1)
    x = x + _mxu_dot(ctx_flat, a_wo[...]) + a_bo[...]

    # ---------------- Conformer conv module --------------------------------
    h = _layer_norm(x, c_lnw[...], c_lnb[...])
    out_half = _mxu_dot(h, c_wout[...]) + c_bout[...]       # (N, C)
    gate = _mxu_dot(h, c_wgate[...]) + c_bgate[...]
    g = out_half * jax.nn.sigmoid(gate)                     # GLU (f32)

    # Depthwise conv over time (same padding): each tap is an XLU sublane roll
    # of g plus an iota edge mask (zero padding); linear in N, no shift table.
    pad_l = conv_kernel // 2
    w_taps = c_dww[...]                                     # (K, 1, C), loaded once
    row = jax.lax.broadcasted_iota(jnp.int32, (seq_len, inner_conv), 0)
    acc = jnp.broadcast_to(c_dwb[...], (seq_len, inner_conv))   # bias, hoisted
    for k in range(conv_kernel):
        d = k - pad_l                                       # time offset of tap k
        if d == 0:
            sh = g
        else:
            sh = pltpu.roll(g, (-d) % seq_len, axis=0)      # sh[t] = g[(t + d) % N]
            if d > 0:
                sh = jnp.where(row < seq_len - d, sh, 0.0)  # zero wrapped tail
            else:
                sh = jnp.where(row >= -d, sh, 0.0)          # zero wrapped head
        acc = acc + sh * w_taps[k]
    acc = acc * jax.nn.sigmoid(acc)                         # Swish

    # ChanLayerNorm: stats over channels per timestep, gamma per channel,
    # var.clamp(min=eps).rsqrt() exactly as in the reference.
    mean = jnp.mean(acc, axis=-1, keepdims=True)
    var = jnp.mean((acc - mean) ** 2, axis=-1, keepdims=True)
    acc = (acc - mean) * jax.lax.rsqrt(jnp.maximum(var, CHAN_LN_EPS)) * c_gamma[...]

    x = x + _mxu_dot(acc, c_w2[...]) + c_b2[...]

    # ---------------- FF2 + post LayerNorm ---------------------------------
    x = x + 0.5 * ff(x, f2_lnw, f2_lnb, f2_w1, f2_b1, f2_w2, f2_b2)
    o_ref[0] = _layer_norm(x, p_lnw[...], p_lnb[...])


def conformer_layer(x, blk, cos, sin, heads, dim_head, conv_kernel):
    B, N, D = x.shape
    f1, a, c, f2, p = blk["ff1"], blk["attn"], blk["conv"], blk["ff2"], blk["post"]
    inner_conv = c["gamma"].shape[-1]
    hidden_ff = f1["w1"].shape[-1]

    args = (
        x,
        f1["ln_w"], f1["ln_b"], f1["w1"], f1["b1"], f1["w2"], f1["b2"],
        a["ln_w"], a["ln_b"], a["wq"], a["wk"], a["wv"], a["wo"], a["bo"],
        cos, sin,
        c["ln_w"], c["ln_b"], c["w_out"], c["b_out"], c["w_gate"], c["b_gate"],
        c["dw_w"], c["dw_b"], c["gamma"], c["pw2_w"], c["pw2_b"],
        f2["ln_w"], f2["ln_b"], f2["w1"], f2["b1"], f2["w2"], f2["b2"],
        p["w"], p["b"],
    )

    kernel = functools.partial(
        _conformer_layer_kernel, heads=heads, dim_head=dim_head,
        conv_kernel=conv_kernel, seq_len=N, inner_conv=inner_conv)

    # Explicit scoped-VMEM budget: double-buffered operands + in-kernel
    # intermediates with headroom, clamped so it is valid on v5e/v6e/v7x.
    arg_bytes = sum(int(a_.size) * a_.dtype.itemsize for a_ in args)
    interm_bytes = 4 * N * (6 * D + 2 * hidden_ff + 3 * inner_conv
                            + 6 * heads * dim_head) + 8 * heads * N * N
    vmem_limit = int(min(64 * 1024 * 1024,
                         max(32 * 1024 * 1024, 2 * arg_bytes + 2 * interm_bytes)))

    return pl.pallas_call(
        kernel,
        out_shape=jax.ShapeDtypeStruct((B, N, D), x.dtype),
        grid_spec=pltpu.PrefetchScalarGridSpec(
            num_scalar_prefetch=0,
            grid=(B,),
            in_specs=[pl.BlockSpec((1, N, D), lambda b: (b, 0, 0))]
            + [_fs(arr) for arr in args[1:]],
            out_specs=pl.BlockSpec((1, N, D), lambda b: (b, 0, 0)),
        ),
        compiler_params=pltpu.CompilerParams(
            # TODO(synk): on v7x switch the batch axis to pltpu.CORE_PARALLEL
            # (or pl.core_map over create_tensorcore_mesh) so the two
            # TensorCores actually split the batch.
            dimension_semantics=("parallel",),
            vmem_limit_bytes=vmem_limit),
    )(*args)


# ----------------------------------------------------------------------------
# Parameter construction (deterministic, synthetic) and rotary tables
# ----------------------------------------------------------------------------
def _w(key, shape, scale=0.05, dtype=MXU_DTYPE):
    # GEMM weights are stored (and DMAed) as bf16; accumulation is f32 in-kernel.
    return (scale * jax.random.normal(key, shape, dtype=jnp.float32)).astype(dtype)


def init_params(key, dim, depth, dim_head, heads, ff_mult, conv_expansion,
                conv_kernel):
    inner_conv = dim * conv_expansion
    hidden_ff = dim * ff_mult
    inner_attn = heads * dim_head
    blocks = []
    for _ in range(depth):
        keys = jax.random.split(key, 14)
        key = keys[-1]

        def ff_params(k1, k2):
            return dict(
                ln_w=jnp.ones((1, dim), jnp.float32),
                ln_b=jnp.zeros((1, dim), jnp.float32),
                w1=_w(k1, (dim, hidden_ff)),
                b1=jnp.zeros((1, hidden_ff), jnp.float32),
                w2=_w(k2, (hidden_ff, dim)),
                b2=jnp.zeros((1, dim), jnp.float32),
            )

        blocks.append(dict(
            ff1=ff_params(keys[0], keys[1]),
            attn=dict(
                ln_w=jnp.ones((1, dim), jnp.float32),
                ln_b=jnp.zeros((1, dim), jnp.float32),
                # fused lane-dense projections: (D, H*Dh) / (H*Dh, D), bf16 in HBM
                wq=_w(keys[2], (dim, inner_attn)),
                wk=_w(keys[3], (dim, inner_attn)),
                wv=_w(keys[4], (dim, inner_attn)),
                wo=_w(keys[5], (inner_attn, dim)),
                bo=jnp.zeros((1, dim), jnp.float32),
            ),
            conv=dict(
                ln_w=jnp.ones((1, dim), jnp.float32),
                ln_b=jnp.zeros((1, dim), jnp.float32),
                # GLU 1x1 conv split into out / gate halves
                w_out=_w(keys[6], (dim, inner_conv)),
                b_out=jnp.zeros((1, inner_conv), jnp.float32),
                w_gate=_w(keys[7], (dim, inner_conv)),
                b_gate=jnp.zeros((1, inner_conv), jnp.float32),
                dw_w=_w(keys[8], (conv_kernel, 1, inner_conv), dtype=jnp.float32),
                dw_b=jnp.zeros((1, inner_conv), jnp.float32),
                gamma=jnp.ones((1, inner_conv), jnp.float32),
                pw2_w=_w(keys[9], (inner_conv, dim)),
                pw2_b=jnp.zeros((1, dim), jnp.float32),
            ),
            ff2=ff_params(keys[10], keys[11]),
            post=dict(
                w=jnp.ones((1, dim), jnp.float32),
                b=jnp.zeros((1, dim), jnp.float32),
            ),
        ))
    return blocks


def rotary_cos_sin(seq_len, dim_head, theta=10000.0):
    inv_freq = 1.0 / (theta ** (jnp.arange(0, dim_head, 2, dtype=jnp.float32) / dim_head))
    t = jnp.arange(seq_len, dtype=jnp.float32)
    freqs = t[:, None] * inv_freq[None, :]
    freqs = jnp.concatenate([freqs, freqs], axis=-1)        # (N, dim_head)
    return jnp.cos(freqs), jnp.sin(freqs)


def conformer_forward(x, blocks, cos, sin, heads, dim_head, conv_kernel):
    # TODO(synk): dropout layers are identity (all dropout probs are 0.0) and no
    # attention/padding mask or T5 relative-position bias is applied (the
    # reference Conformer is run with mask=None, t5_rel_pos_bias=False).
    # TODO(synk): at small batch the layer is weight-DMA bound; prefetch the
    # next layer's weights via a cross-pallas_call DMA future (P10) or batch
    # more sequences per launch to hide the weight stream.
    for blk in blocks:
        x = conformer_layer(x, blk, cos, sin, heads, dim_head, conv_kernel)
    return x


# ----------------------------------------------------------------------------
if __name__ == "__main__":
    DIM = 32
    DEPTH = 2
    DIM_HEAD = 16
    HEADS = 4
    FF_MULT = 4
    CONV_EXPANSION = 2
    CONV_KERNEL = 7
    B, N = 2, 16

    key = jax.random.PRNGKey(0)
    kx, kp = jax.random.split(key)
    x = jax.random.normal(kx, (B, N, DIM), dtype=jnp.float32)

    blocks = init_params(kp, DIM, DEPTH, DIM_HEAD, HEADS, FF_MULT,
                         CONV_EXPANSION, CONV_KERNEL)
    cos, sin = rotary_cos_sin(N, DIM_HEAD)

    fwd = jax.jit(functools.partial(conformer_forward, heads=HEADS,
                                    dim_head=DIM_HEAD, conv_kernel=CONV_KERNEL))
    out = fwd(x, blocks, cos, sin)
    out = jax.block_until_ready(out)
    assert out.shape == (B, N, DIM)
    assert bool(jnp.all(jnp.isfinite(out)))
    print("KERNEL_OK")
</pallas_src>

<mosaic_0001>
module attributes {stable_mosaic.version = 11 : i64} {
  func.func @_conformer_layer_kernel(%arg0: i32, %arg1: memref<1x16x32xf32, #tpu.memory_space<vmem>>, %arg2: memref<1x32xf32, #tpu.memory_space<vmem>>, %arg3: memref<1x32xf32, #tpu.memory_space<vmem>>, %arg4: memref<32x128xbf16, #tpu.memory_space<vmem>>, %arg5: memref<1x128xf32, #tpu.memory_space<vmem>>, %arg6: memref<128x32xbf16, #tpu.memory_space<vmem>>, %arg7: memref<1x32xf32, #tpu.memory_space<vmem>>, %arg8: memref<1x32xf32, #tpu.memory_space<vmem>>, %arg9: memref<1x32xf32, #tpu.memory_space<vmem>>, %arg10: memref<32x64xbf16, #tpu.memory_space<vmem>>, %arg11: memref<32x64xbf16, #tpu.memory_space<vmem>>, %arg12: memref<32x64xbf16, #tpu.memory_space<vmem>>, %arg13: memref<64x32xbf16, #tpu.memory_space<vmem>>, %arg14: memref<1x32xf32, #tpu.memory_space<vmem>>, %arg15: memref<16x16xf32, #tpu.memory_space<vmem>>, %arg16: memref<16x16xf32, #tpu.memory_space<vmem>>, %arg17: memref<1x32xf32, #tpu.memory_space<vmem>>, %arg18: memref<1x32xf32, #tpu.memory_space<vmem>>, %arg19: memref<32x64xbf16, #tpu.memory_space<vmem>>, %arg20: memref<1x64xf32, #tpu.memory_space<vmem>>, %arg21: memref<32x64xbf16, #tpu.memory_space<vmem>>, %arg22: memref<1x64xf32, #tpu.memory_space<vmem>>, %arg23: memref<7x1x64xf32, #tpu.memory_space<vmem>>, %arg24: memref<1x64xf32, #tpu.memory_space<vmem>>, %arg25: memref<1x64xf32, #tpu.memory_space<vmem>>, %arg26: memref<64x32xbf16, #tpu.memory_space<vmem>>, %arg27: memref<1x32xf32, #tpu.memory_space<vmem>>, %arg28: memref<1x32xf32, #tpu.memory_space<vmem>>, %arg29: memref<1x32xf32, #tpu.memory_space<vmem>>, %arg30: memref<32x128xbf16, #tpu.memory_space<vmem>>, %arg31: memref<1x128xf32, #tpu.memory_space<vmem>>, %arg32: memref<128x32xbf16, #tpu.memory_space<vmem>>, %arg33: memref<1x32xf32, #tpu.memory_space<vmem>>, %arg34: memref<1x32xf32, #tpu.memory_space<vmem>>, %arg35: memref<1x32xf32, #tpu.memory_space<vmem>>, %arg36: memref<1x16x32xf32, #tpu.memory_space<vmem>>) attributes {dimension_semantics = [#tpu.dimension_semantics<parallel>], iteration_bounds = array<i64: 2>, scalar_prefetch = 0 : i64, scratch_operands = 0 : i64, tpu.core_type = #tpu.core_type<tc>, window_params = [{transform_indices = @transform_0, window_bounds = array<i64: 1, 16, 32>}, {pipeline_mode = #tpu.pipeline_mode<synchronous>, transform_indices = @transform_1, window_bounds = array<i64: 1, 32>}, {pipeline_mode = #tpu.pipeline_mode<synchronous>, transform_indices = @transform_2, window_bounds = array<i64: 1, 32>}, {pipeline_mode = #tpu.pipeline_mode<synchronous>, transform_indices = @transform_3, window_bounds = array<i64: 32, 128>}, {pipeline_mode = #tpu.pipeline_mode<synchronous>, transform_indices = @transform_4, window_bounds = array<i64: 1, 128>}, {pipeline_mode = #tpu.pipeline_mode<synchronous>, transform_indices = @transform_5, window_bounds = array<i64: 128, 32>}, {pipeline_mode = #tpu.pipeline_mode<synchronous>, transform_indices = @transform_6, window_bounds = array<i64: 1, 32>}, {pipeline_mode = #tpu.pipeline_mode<synchronous>, transform_indices = @transform_7, window_bounds = array<i64: 1, 32>}, {pipeline_mode = #tpu.pipeline_mode<synchronous>, transform_indices = @transform_8, window_bounds = array<i64: 1, 32>}, {pipeline_mode = #tpu.pipeline_mode<synchronous>, transform_indices = @transform_9, window_bounds = array<i64: 32, 64>}, {pipeline_mode = #tpu.pipeline_mode<synchronous>, transform_indices = @transform_10, window_bounds = array<i64: 32, 64>}, {pipeline_mode = #tpu.pipeline_mode<synchronous>, transform_indices = @transform_11, window_bounds = array<i64: 32, 64>}, {pipeline_mode = #tpu.pipeline_mode<synchronous>, transform_indices = @transform_12, window_bounds = array<i64: 64, 32>}, {pipeline_mode = #tpu.pipeline_mode<synchronous>, transform_indices = @transform_13, window_bounds = array<i64: 1, 32>}, {pipeline_mode = #tpu.pipeline_mode<synchronous>, transform_indices = @transform_14, window_bounds = array<i64: 16, 16>}, {pipeline_mode = #tpu.pipeline_mode<synchronous>, transform_indices = @transform_15, window_bounds = array<i64: 16, 16>}, {pipeline_mode = #tpu.pipeline_mode<synchronous>, transform_indices = @transform_16, window_bounds = array<i64: 1, 32>}, {pipeline_mode = #tpu.pipeline_mode<synchronous>, transform_indices = @transform_17, window_bounds = array<i64: 1, 32>}, {pipeline_mode = #tpu.pipeline_mode<synchronous>, transform_indices = @transform_18, window_bounds = array<i64: 32, 64>}, {pipeline_mode = #tpu.pipeline_mode<synchronous>, transform_indices = @transform_19, window_bounds = array<i64: 1, 64>}, {pipeline_mode = #tpu.pipeline_mode<synchronous>, transform_indices = @transform_20, window_bounds = array<i64: 32, 64>}, {pipeline_mode = #tpu.pipeline_mode<synchronous>, transform_indices = @transform_21, window_bounds = array<i64: 1, 64>}, {pipeline_mode = #tpu.pipeline_mode<synchronous>, transform_indices = @transform_22, window_bounds = array<i64: 7, 1, 64>}, {pipeline_mode = #tpu.pipeline_mode<synchronous>, transform_indices = @transform_23, window_bounds = array<i64: 1, 64>}, {pipeline_mode = #tpu.pipeline_mode<synchronous>, transform_indices = @transform_24, window_bounds = array<i64: 1, 64>}, {pipeline_mode = #tpu.pipeline_mode<synchronous>, transform_indices = @transform_25, window_bounds = array<i64: 64, 32>}, {pipeline_mode = #tpu.pipeline_mode<synchronous>, transform_indices = @transform_26, window_bounds = array<i64: 1, 32>}, {pipeline_mode = #tpu.pipeline_mode<synchronous>, transform_indices = @transform_27, window_bounds = array<i64: 1, 32>}, {pipeline_mode = #tpu.pipeline_mode<synchronous>, transform_indices = @transform_28, window_bounds = array<i64: 1, 32>}, {pipeline_mode = #tpu.pipeline_mode<synchronous>, transform_indices = @transform_29, window_bounds = array<i64: 32, 128>}, {pipeline_mode = #tpu.pipeline_mode<synchronous>, transform_indices = @transform_30, window_bounds = array<i64: 1, 128>}, {pipeline_mode = #tpu.pipeline_mode<synchronous>, transform_indices = @transform_31, window_bounds = array<i64: 128, 32>}, {pipeline_mode = #tpu.pipeline_mode<synchronous>, transform_indices = @transform_32, window_bounds = array<i64: 1, 32>}, {pipeline_mode = #tpu.pipeline_mode<synchronous>, transform_indices = @transform_33, window_bounds = array<i64: 1, 32>}, {pipeline_mode = #tpu.pipeline_mode<synchronous>, transform_indices = @transform_34, window_bounds = array<i64: 1, 32>}, {transform_indices = @transform_35, window_bounds = array<i64: 1, 16, 32>}]} {
    %c0 = arith.constant 0 : index
    %c0_0 = arith.constant 0 : index
    %c0_1 = arith.constant 0 : index
    %0 = vector.load %arg1[%c0, %c0_0, %c0_1] : memref<1x16x32xf32, #tpu.memory_space<vmem>>, vector<1x16x32xf32>
    %1 = vector.shape_cast %0 : vector<1x16x32xf32> to vector<16x32xf32>
    %c0_2 = arith.constant 0 : index
    %c0_3 = arith.constant 0 : index
    %2 = vector.load %arg2[%c0_2, %c0_3] : memref<1x32xf32, #tpu.memory_space<vmem>>, vector<1x32xf32>
    %c0_4 = arith.constant 0 : index
    %c0_5 = arith.constant 0 : index
    %3 = vector.load %arg3[%c0_4, %c0_5] : memref<1x32xf32, #tpu.memory_space<vmem>>, vector<1x32xf32>
    %cst = arith.constant dense<0.000000e+00> : vector<16xf32>
    %4 = vector.multi_reduction <add>, %1, %cst [1] : vector<16x32xf32> to vector<16xf32>
    %5 = vector.shape_cast %4 : vector<16xf32> to vector<16x1xf32>
    %cst_6 = arith.constant 3.200000e+01 : f32
    %6 = vector.broadcast %cst_6 : f32 to vector<16x1xf32>
    %7 = arith.divf %5, %6 : vector<16x1xf32>
    %8 = vector.broadcast %7 : vector<16x1xf32> to vector<16x32xf32>
    %9 = arith.subf %1, %8 : vector<16x32xf32>
    %10 = arith.mulf %9, %9 : vector<16x32xf32>
    %cst_7 = arith.constant dense<0.000000e+00> : vector<16xf32>
    %11 = vector.multi_reduction <add>, %10, %cst_7 [1] : vector<16x32xf32> to vector<16xf32>
    %12 = vector.shape_cast %11 : vector<16xf32> to vector<16x1xf32>
    %cst_8 = arith.constant 3.200000e+01 : f32
    %13 = vector.broadcast %cst_8 : f32 to vector<16x1xf32>
    %14 = arith.divf %12, %13 : vector<16x1xf32>
    %15 = vector.broadcast %7 : vector<16x1xf32> to vector<16x32xf32>
    %16 = arith.subf %1, %15 : vector<16x32xf32>
    %cst_9 = arith.constant 9.99999974E-6 : f32
    %17 = vector.broadcast %cst_9 : f32 to vector<16x1xf32>
    %18 = arith.addf %14, %17 : vector<16x1xf32>
    %19 = math.rsqrt %18 : vector<16x1xf32>
    %20 = vector.broadcast %19 : vector<16x1xf32> to vector<16x32xf32>
    %21 = arith.mulf %16, %20 : vector<16x32xf32>
    %22 = vector.broadcast %2 : vector<1x32xf32> to vector<16x32xf32>
    %23 = arith.mulf %21, %22 : vector<16x32xf32>
    %24 = vector.broadcast %3 : vector<1x32xf32> to vector<16x32xf32>
    %25 = arith.addf %23, %24 : vector<16x32xf32>
    %c0_10 = arith.constant 0 : index
    %c0_11 = arith.constant 0 : index
    %26 = vector.load %arg4[%c0_10, %c0_11] : memref<32x128xbf16, #tpu.memory_space<vmem>>, vector<32x128xbf16>
    %27 = arith.truncf %25 : vector<16x32xf32> to vector<16x32xbf16>
    %cst_12 = arith.constant dense<0.000000e+00> : vector<16x128xf32>
    %28 = tpu.matmul %27, %26, %cst_12 {dimension_numbers = #tpu.dot_dimension_numbers<[1], [0], [0], [1], [0, 0, 1, 1], [], []>} : vector<16x32xbf16>, vector<32x128xbf16>, vector<16x128xf32> -> vector<16x128xf32>
    %c0_13 = arith.constant 0 : index
    %c0_14 = arith.constant 0 : index
    %29 = vector.load %arg5[%c0_13, %c0_14] : memref<1x128xf32, #tpu.memory_space<vmem>>, vector<1x128xf32>
    %30 = vector.broadcast %29 : vector<1x128xf32> to vector<16x128xf32>
    %31 = arith.addf %28, %30 : vector<16x128xf32>
    %32 = arith.negf %31 : vector<16x128xf32>
    %33 = math.exp %32 : vector<16x128xf32>
    %cst_15 = arith.constant 1.000000e+00 : f32
    %34 = vector.broadcast %cst_15 : f32 to vector<16x128xf32>
    %35 = arith.addf %34, %33 : vector<16x128xf32>
    %36 = arith.divf %34, %35 : vector<16x128xf32>
    %37 = arith.mulf %31, %36 : vector<16x128xf32>
    %c0_16 = arith.constant 0 : index
    %c0_17 = arith.constant 0 : index
    %38 = vector.load %arg6[%c0_16, %c0_17] : memref<128x32xbf16, #tpu.memory_space<vmem>>, vector<128x32xbf16>
    %39 = arith.truncf %37 : vector<16x128xf32> to vector<16x128xbf16>
    %cst_18 = arith.constant dense<0.000000e+00> : vector<16x32xf32>
    %40 = tpu.matmul %39, %38, %cst_18 {dimension_numbers = #tpu.dot_dimension_numbers<[1], [0], [0], [1], [0, 0, 1, 1], [], []>} : vector<16x128xbf16>, vector<128x32xbf16>, vector<16x32xf32> -> vector<16x32xf32>
    %c0_19 = arith.constant 0 : index
    %c0_20 = arith.constant 0 : index
    %41 = vector.load %arg7[%c0_19, %c0_20] : memref<1x32xf32, #tpu.memory_space<vmem>>, vector<1x32xf32>
    %42 = vector.broadcast %41 : vector<1x32xf32> to vector<16x32xf32>
    %43 = arith.addf %40, %42 : vector<16x32xf32>
    %cst_21 = arith.constant 5.000000e-01 : f32
    %44 = vector.broadcast %cst_21 : f32 to vector<16x32xf32>
    %45 = arith.mulf %44, %43 : vector<16x32xf32>
    %46 = arith.addf %1, %45 : vector<16x32xf32>
    %c0_22 = arith.constant 0 : index
    %c0_23 = arith.constant 0 : index
    %47 = vector.load %arg8[%c0_22, %c0_23] : memref<1x32xf32, #tpu.memory_space<vmem>>, vector<1x32xf32>
    %c0_24 = arith.constant 0 : index
    %c0_25 = arith.constant 0 : index
    %48 = vector.load %arg9[%c0_24, %c0_25] : memref<1x32xf32, #tpu.memory_space<vmem>>, vector<1x32xf32>
    %cst_26 = arith.constant dense<0.000000e+00> : vector<16xf32>
    %49 = vector.multi_reduction <add>, %46, %cst_26 [1] : vector<16x32xf32> to vector<16xf32>
    %50 = vector.shape_cast %49 : vector<16xf32> to vector<16x1xf32>
    %cst_27 = arith.constant 3.200000e+01 : f32
    %51 = vector.broadcast %cst_27 : f32 to vector<16x1xf32>
    %52 = arith.divf %50, %51 : vector<16x1xf32>
    %53 = vector.broadcast %52 : vector<16x1xf32> to vector<16x32xf32>
    %54 = arith.subf %46, %53 : vector<16x32xf32>
    %55 = arith.mulf %54, %54 : vector<16x32xf32>
    %cst_28 = arith.constant dense<0.000000e+00> : vector<16xf32>
    %56 = vector.multi_reduction <add>, %55, %cst_28 [1] : vector<16x32xf32> to vector<16xf32>
    %57 = vector.shape_cast %56 : vector<16xf32> to vector<16x1xf32>
    %cst_29 = arith.constant 3.200000e+01 : f32
    %58 = vector.broadcast %cst_29 : f32 to vector<16x1xf32>
    %59 = arith.divf %57, %58 : vector<16x1xf32>
    %60 = vector.broadcast %52 : vector<16x1xf32> to vector<16x32xf32>
    %61 = arith.subf %46, %60 : vector<16x32xf32>
    %cst_30 = arith.constant 9.99999974E-6 : f32
    %62 = vector.broadcast %cst_30 : f32 to vector<16x1xf32>
    %63 = arith.addf %59, %62 : vector<16x1xf32>
    %64 = math.rsqrt %63 : vector<16x1xf32>
    %65 = vector.broadcast %64 : vector<16x1xf32> to vector<16x32xf32>
    %66 = arith.mulf %61, %65 : vector<16x32xf32>
    %67 = vector.broadcast %47 : vector<1x32xf32> to vector<16x32xf32>
    %68 = arith.mulf %66, %67 : vector<16x32xf32>
    %69 = vector.broadcast %48 : vector<1x32xf32> to vector<16x32xf32>
    %70 = arith.addf %68, %69 : vector<16x32xf32>
    %c0_31 = arith.constant 0 : index
    %c0_32 = arith.constant 0 : index
    %71 = vector.load %arg10[%c0_31, %c0_32] : memref<32x64xbf16, #tpu.memory_space<vmem>>, vector<32x64xbf16>
    %72 = arith.truncf %70 : vector<16x32xf32> to vector<16x32xbf16>
    %cst_33 = arith.constant dense<0.000000e+00> : vector<16x64xf32>
    %73 = tpu.matmul %72, %71, %cst_33 {dimension_numbers = #tpu.dot_dimension_numbers<[1], [0], [0], [1], [0, 0, 1, 1], [], []>} : vector<16x32xbf16>, vector<32x64xbf16>, vector<16x64xf32> -> vector<16x64xf32>
    %c0_34 = arith.constant 0 : index
    %c0_35 = arith.constant 0 : index
    %74 = vector.load %arg11[%c0_34, %c0_35] : memref<32x64xbf16, #tpu.memory_space<vmem>>, vector<32x64xbf16>
    %75 = arith.truncf %70 : vector<16x32xf32> to vector<16x32xbf16>
    %cst_36 = arith.constant dense<0.000000e+00> : vector<16x64xf32>
    %76 = tpu.matmul %75, %74, %cst_36 {dimension_numbers = #tpu.dot_dimension_numbers<[1], [0], [0], [1], [0, 0, 1, 1], [], []>} : vector<16x32xbf16>, vector<32x64xbf16>, vector<16x64xf32> -> vector<16x64xf32>
    %c0_37 = arith.constant 0 : index
    %c0_38 = arith.constant 0 : index
    %77 = vector.load %arg12[%c0_37, %c0_38] : memref<32x64xbf16, #tpu.memory_space<vmem>>, vector<32x64xbf16>
    %78 = arith.truncf %70 : vector<16x32xf32> to vector<16x32xbf16>
    %cst_39 = arith.constant dense<0.000000e+00> : vector<16x64xf32>
    %79 = tpu.matmul %78, %77, %cst_39 {dimension_numbers = #tpu.dot_dimension_numbers<[1], [0], [0], [1], [0, 0, 1, 1], [], []>} : vector<16x32xbf16>, vector<32x64xbf16>, vector<16x64xf32> -> vector<16x64xf32>
    %c0_40 = arith.constant 0 : index
    %c0_41 = arith.constant 0 : index
    %80 = vector.load %arg15[%c0_40, %c0_41] : memref<16x16xf32, #tpu.memory_space<vmem>>, vector<16x16xf32>
    %81 = vector.shape_cast %80 : vector<16x16xf32> to vector<1x16x16xf32>
    %c0_42 = arith.constant 0 : index
    %c0_43 = arith.constant 0 : index
    %82 = vector.load %arg16[%c0_42, %c0_43] : memref<16x16xf32, #tpu.memory_space<vmem>>, vector<16x16xf32>
    %83 = vector.shape_cast %82 : vector<16x16xf32> to vector<1x16x16xf32>
    %84 = vector.extract_strided_slice %73 {offsets = [0, 0], sizes = [16, 16], strides = [1, 1]} : vector<16x64xf32> to vector<16x16xf32>
    %85 = vector.extract_strided_slice %73 {offsets = [0, 16], sizes = [16, 16], strides = [1, 1]} : vector<16x64xf32> to vector<16x16xf32>
    %86 = vector.extract_strided_slice %73 {offsets = [0, 32], sizes = [16, 16], strides = [1, 1]} : vector<16x64xf32> to vector<16x16xf32>
    %87 = vector.extract_strided_slice %73 {offsets = [0, 48], sizes = [16, 16], strides = [1, 1]} : vector<16x64xf32> to vector<16x16xf32>
    %88 = vector.shape_cast %84 : vector<16x16xf32> to vector<1x16x16xf32>
    %89 = vector.shape_cast %85 : vector<16x16xf32> to vector<1x16x16xf32>
    %90 = vector.shape_cast %86 : vector<16x16xf32> to vector<1x16x16xf32>
    %91 = vector.shape_cast %87 : vector<16x16xf32> to vector<1x16x16xf32>
    %92 = tpu.concatenate %88, %89, %90, %91 in 0 : vector<1x16x16xf32>, vector<1x16x16xf32>, vector<1x16x16xf32>, vector<1x16x16xf32> -> vector<4x16x16xf32>
    %93 = vector.extract_strided_slice %92 {offsets = [0, 0, 0], sizes = [4, 16, 8], strides = [1, 1, 1]} : vector<4x16x16xf32> to vector<4x16x8xf32>
    %94 = vector.extract_strided_slice %92 {offsets = [0, 0, 8], sizes = [4, 16, 8], strides = [1, 1, 1]} : vector<4x16x16xf32> to vector<4x16x8xf32>
    %cst_44 = arith.constant 0.000000e+00 : f32
    %95 = vector.broadcast %cst_44 : f32 to vector<4x16x8xf32>
    %96 = arith.subf %95, %94 : vector<4x16x8xf32>
    %97 = tpu.concatenate %96, %93 in 2 : vector<4x16x8xf32>, vector<4x16x8xf32> -> vector<4x16x16xf32>
    %98 = vector.broadcast %81 : vector<1x16x16xf32> to vector<4x16x16xf32>
    %99 = arith.mulf %92, %98 : vector<4x16x16xf32>
    %100 = vector.broadcast %83 : vector<1x16x16xf32> to vector<4x16x16xf32>
    %101 = arith.mulf %97, %100 : vector<4x16x16xf32>
    %102 = arith.addf %99, %101 : vector<4x16x16xf32>
    %103 = vector.extract_strided_slice %76 {offsets = [0, 0], sizes = [16, 16], strides = [1, 1]} : vector<16x64xf32> to vector<16x16xf32>
    %104 = vector.extract_strided_slice %76 {offsets = [0, 16], sizes = [16, 16], strides = [1, 1]} : vector<16x64xf32> to vector<16x16xf32>
    %105 = vector.extract_strided_slice %76 {offsets = [0, 32], sizes = [16, 16], strides = [1, 1]} : vector<16x64xf32> to vector<16x16xf32>
    %106 = vector.extract_strided_slice %76 {offsets = [0, 48], sizes = [16, 16], strides = [1, 1]} : vector<16x64xf32> to vector<16x16xf32>
    %107 = vector.shape_cast %103 : vector<16x16xf32> to vector<1x16x16xf32>
    %108 = vector.shape_cast %104 : vector<16x16xf32> to vector<1x16x16xf32>
    %109 = vector.shape_cast %105 : vector<16x16xf32> to vector<1x16x16xf32>
    %110 = vector.shape_cast %106 : vector<16x16xf32> to vector<1x16x16xf32>
    %111 = tpu.concatenate %107, %108, %109, %110 in 0 : vector<1x16x16xf32>, vector<1x16x16xf32>, vector<1x16x16xf32>, vector<1x16x16xf32> -> vector<4x16x16xf32>
    %112 = vector.extract_strided_slice %111 {offsets = [0, 0, 0], sizes = [4, 16, 8], strides = [1, 1, 1]} : vector<4x16x16xf32> to vector<4x16x8xf32>
    %113 = vector.extract_strided_slice %111 {offsets = [0, 0, 8], sizes = [4, 16, 8], strides = [1, 1, 1]} : vector<4x16x16xf32> to vector<4x16x8xf32>
    %cst_45 = arith.constant 0.000000e+00 : f32
    %114 = vector.broadcast %cst_45 : f32 to vector<4x16x8xf32>
    %115 = arith.subf %114, %113 : vector<4x16x8xf32>
    %116 = tpu.concatenate %115, %112 in 2 : vector<4x16x8xf32>, vector<4x16x8xf32> -> vector<4x16x16xf32>
    %117 = vector.broadcast %81 : vector<1x16x16xf32> to vector<4x16x16xf32>
    %118 = arith.mulf %111, %117 : vector<4x16x16xf32>
    %119 = vector.broadcast %83 : vector<1x16x16xf32> to vector<4x16x16xf32>
    %120 = arith.mulf %116, %119 : vector<4x16x16xf32>
    %121 = arith.addf %118, %120 : vector<4x16x16xf32>
    %122 = vector.extract_strided_slice %79 {offsets = [0, 0], sizes = [16, 16], strides = [1, 1]} : vector<16x64xf32> to vector<16x16xf32>
    %123 = vector.extract_strided_slice %79 {offsets = [0, 16], sizes = [16, 16], strides = [1, 1]} : vector<16x64xf32> to vector<16x16xf32>
    %124 = vector.extract_strided_slice %79 {offsets = [0, 32], sizes = [16, 16], strides = [1, 1]} : vector<16x64xf32> to vector<16x16xf32>
    %125 = vector.extract_strided_slice %79 {offsets = [0, 48], sizes = [16, 16], strides = [1, 1]} : vector<16x64xf32> to vector<16x16xf32>
    %126 = vector.shape_cast %122 : vector<16x16xf32> to vector<1x16x16xf32>
    %127 = vector.shape_cast %123 : vector<16x16xf32> to vector<1x16x16xf32>
    %128 = vector.shape_cast %124 : vector<16x16xf32> to vector<1x16x16xf32>
    %129 = vector.shape_cast %125 : vector<16x16xf32> to vector<1x16x16xf32>
    %130 = tpu.concatenate %126, %127, %128, %129 in 0 : vector<1x16x16xf32>, vector<1x16x16xf32>, vector<1x16x16xf32>, vector<1x16x16xf32> -> vector<4x16x16xf32>
    %131 = arith.truncf %102 : vector<4x16x16xf32> to vector<4x16x16xbf16>
    %132 = arith.truncf %121 : vector<4x16x16xf32> to vector<4x16x16xbf16>
    "tpu.trace_start"() <{level = 10 : i32, message = "hnd,hmd->hnm"}> : () -> ()
    %cst_46 = arith.constant dense<0.000000e+00> : vector<4x16x16xf32>
    %133 = tpu.matmul %131, %132, %cst_46 {dimension_numbers = #tpu.dot_dimension_numbers<[2], [2], [1], [1], [0, 0, 0, 1, 1, 1], [0], [0]>} : vector<4x16x16xbf16>, vector<4x16x16xbf16>, vector<4x16x16xf32> -> vector<4x16x16xf32>
    "tpu.trace_stop"() : () -> ()
    %cst_47 = arith.constant 2.500000e-01 : f32
    %134 = vector.broadcast %cst_47 : f32 to vector<4x16x16xf32>
    %135 = arith.mulf %133, %134 : vector<4x16x16xf32>
    %cst_48 = arith.constant dense<0xFF800000> : vector<4x16xf32>
    %136 = vector.multi_reduction <maximumf>, %135, %cst_48 [2] : vector<4x16x16xf32> to vector<4x16xf32>
    %137 = vector.shape_cast %136 : vector<4x16xf32> to vector<4x16x1xf32>
    %138 = vector.broadcast %137 : vector<4x16x1xf32> to vector<4x16x16xf32>
    %139 = arith.subf %135, %138 : vector<4x16x16xf32>
    %140 = math.exp %139 : vector<4x16x16xf32>
    %cst_49 = arith.constant dense<0.000000e+00> : vector<4x16xf32>
    %141 = vector.multi_reduction <add>, %140, %cst_49 [2] : vector<4x16x16xf32> to vector<4x16xf32>
    %142 = vector.shape_cast %141 : vector<4x16xf32> to vector<4x16x1xf32>
    %143 = tpu.reciprocal %142 {approx = true} : vector<4x16x1xf32> -> vector<4x16x1xf32>
    %144 = vector.broadcast %143 : vector<4x16x1xf32> to vector<4x16x16xf32>
    %145 = arith.mulf %140, %144 : vector<4x16x16xf32>
    %146 = arith.truncf %145 : vector<4x16x16xf32> to vector<4x16x16xbf16>
    %147 = arith.truncf %130 : vector<4x16x16xf32> to vector<4x16x16xbf16>
    "tpu.trace_start"() <{level = 10 : i32, message = "hnm,hmd->hnd"}> : () -> ()
    %cst_50 = arith.constant dense<0.000000e+00> : vector<4x16x16xf32>
    %148 = tpu.matmul %146, %147, %cst_50 {dimension_numbers = #tpu.dot_dimension_numbers<[2], [1], [1], [2], [0, 0, 0, 1, 1, 2], [0], [0]>} : vector<4x16x16xbf16>, vector<4x16x16xbf16>, vector<4x16x16xf32> -> vector<4x16x16xf32>
    "tpu.trace_stop"() : () -> ()
    %149 = vector.extract_strided_slice %148 {offsets = [0, 0, 0], sizes = [1, 16, 16], strides = [1, 1, 1]} : vector<4x16x16xf32> to vector<1x16x16xf32>
    %150 = vector.shape_cast %149 : vector<1x16x16xf32> to vector<16x16xf32>
    %151 = vector.extract_strided_slice %148 {offsets = [1, 0, 0], sizes = [1, 16, 16], strides = [1, 1, 1]} : vector<4x16x16xf32> to vector<1x16x16xf32>
    %152 = vector.shape_cast %151 : vector<1x16x16xf32> to vector<16x16xf32>
    %153 = vector.extract_strided_slice %148 {offsets = [2, 0, 0], sizes = [1, 16, 16], strides = [1, 1, 1]} : vector<4x16x16xf32> to vector<1x16x16xf32>
    %154 = vector.shape_cast %153 : vector<1x16x16xf32> to vector<16x16xf32>
    %155 = vector.extract_strided_slice %148 {offsets = [3, 0, 0], sizes = [1, 16, 16], strides = [1, 1, 1]} : vector<4x16x16xf32> to vector<1x16x16xf32>
    %156 = vector.shape_cast %155 : vector<1x16x16xf32> to vector<16x16xf32>
    %157 = tpu.concatenate %150, %152, %154, %156 in 1 : vector<16x16xf32>, vector<16x16xf32>, vector<16x16xf32>, vector<16x16xf32> -> vector<16x64xf32>
    %c0_51 = arith.constant 0 : index
    %c0_52 = arith.constant 0 : index
    %158 = vector.load %arg13[%c0_51, %c0_52] : memref<64x32xbf16, #tpu.memory_space<vmem>>, vector<64x32xbf16>
    %159 = arith.truncf %157 : vector<16x64xf32> to vector<16x64xbf16>
    %cst_53 = arith.constant dense<0.000000e+00> : vector<16x32xf32>
    %160 = tpu.matmul %159, %158, %cst_53 {dimension_numbers = #tpu.dot_dimension_numbers<[1], [0], [0], [1], [0, 0, 1, 1], [], []>} : vector<16x64xbf16>, vector<64x32xbf16>, vector<16x32xf32> -> vector<16x32xf32>
    %161 = arith.addf %46, %160 : vector<16x32xf32>
    %c0_54 = arith.constant 0 : index
    %c0_55 = arith.constant 0 : index
    %162 = vector.load %arg14[%c0_54, %c0_55] : memref<1x32xf32, #tpu.memory_space<vmem>>, vector<1x32xf32>
    %163 = vector.broadcast %162 : vector<1x32xf32> to vector<16x32xf32>
    %164 = arith.addf %161, %163 : vector<16x32xf32>
    %c0_56 = arith.constant 0 : index
    %c0_57 = arith.constant 0 : index
    %165 = vector.load %arg17[%c0_56, %c0_57] : memref<1x32xf32, #tpu.memory_space<vmem>>, vector<1x32xf32>
    %c0_58 = arith.constant 0 : index
    %c0_59 = arith.constant 0 : index
    %166 = vector.load %arg18[%c0_58, %c0_59] : memref<1x32xf32, #tpu.memory_space<vmem>>, vector<1x32xf32>
    %cst_60 = arith.constant dense<0.000000e+00> : vector<16xf32>
    %167 = vector.multi_reduction <add>, %164, %cst_60 [1] : vector<16x32xf32> to vector<16xf32>
    %168 = vector.shape_cast %167 : vector<16xf32> to vector<16x1xf32>
    %cst_61 = arith.constant 3.200000e+01 : f32
    %169 = vector.broadcast %cst_61 : f32 to vector<16x1xf32>
    %170 = arith.divf %168, %169 : vector<16x1xf32>
    %171 = vector.broadcast %170 : vector<16x1xf32> to vector<16x32xf32>
    %172 = arith.subf %164, %171 : vector<16x32xf32>
    %173 = arith.mulf %172, %172 : vector<16x32xf32>
    %cst_62 = arith.constant dense<0.000000e+00> : vector<16xf32>
    %174 = vector.multi_reduction <add>, %173, %cst_62 [1] : vector<16x32xf32> to vector<16xf32>
    %175 = vector.shape_cast %174 : vector<16xf32> to vector<16x1xf32>
    %cst_63 = arith.constant 3.200000e+01 : f32
    %176 = vector.broadcast %cst_63 : f32 to vector<16x1xf32>
    %177 = arith.divf %175, %176 : vector<16x1xf32>
    %178 = vector.broadcast %170 : vector<16x1xf32> to vector<16x32xf32>
    %179 = arith.subf %164, %178 : vector<16x32xf32>
    %cst_64 = arith.constant 9.99999974E-6 : f32
    %180 = vector.broadcast %cst_64 : f32 to vector<16x1xf32>
    %181 = arith.addf %177, %180 : vector<16x1xf32>
    %182 = math.rsqrt %181 : vector<16x1xf32>
    %183 = vector.broadcast %182 : vector<16x1xf32> to vector<16x32xf32>
    %184 = arith.mulf %179, %183 : vector<16x32xf32>
    %185 = vector.broadcast %165 : vector<1x32xf32> to vector<16x32xf32>
    %186 = arith.mulf %184, %185 : vector<16x32xf32>
    %187 = vector.broadcast %166 : vector<1x32xf32> to vector<16x32xf32>
    %188 = arith.addf %186, %187 : vector<16x32xf32>
    %c0_65 = arith.constant 0 : index
    %c0_66 = arith.constant 0 : index
    %189 = vector.load %arg19[%c0_65, %c0_66] : memref<32x64xbf16, #tpu.memory_space<vmem>>, vector<32x64xbf16>
    %190 = arith.truncf %188 : vector<16x32xf32> to vector<16x32xbf16>
    %cst_67 = arith.constant dense<0.000000e+00> : vector<16x64xf32>
    %191 = tpu.matmul %190, %189, %cst_67 {dimension_numbers = #tpu.dot_dimension_numbers<[1], [0], [0], [1], [0, 0, 1, 1], [], []>} : vector<16x32xbf16>, vector<32x64xbf16>, vector<16x64xf32> -> vector<16x64xf32>
    %c0_68 = arith.constant 0 : index
    %c0_69 = arith.constant 0 : index
    %192 = vector.load %arg20[%c0_68, %c0_69] : memref<1x64xf32, #tpu.memory_space<vmem>>, vector<1x64xf32>
    %193 = vector.broadcast %192 : vector<1x64xf32> to vector<16x64xf32>
    %194 = arith.addf %191, %193 : vector<16x64xf32>
    %c0_70 = arith.constant 0 : index
    %c0_71 = arith.constant 0 : index
    %195 = vector.load %arg21[%c0_70, %c0_71] : memref<32x64xbf16, #tpu.memory_space<vmem>>, vector<32x64xbf16>
    %196 = arith.truncf %188 : vector<16x32xf32> to vector<16x32xbf16>
    %cst_72 = arith.constant dense<0.000000e+00> : vector<16x64xf32>
    %197 = tpu.matmul %196, %195, %cst_72 {dimension_numbers = #tpu.dot_dimension_numbers<[1], [0], [0], [1], [0, 0, 1, 1], [], []>} : vector<16x32xbf16>, vector<32x64xbf16>, vector<16x64xf32> -> vector<16x64xf32>
    %c0_73 = arith.constant 0 : index
    %c0_74 = arith.constant 0 : index
    %198 = vector.load %arg22[%c0_73, %c0_74] : memref<1x64xf32, #tpu.memory_space<vmem>>, vector<1x64xf32>
    %199 = vector.broadcast %198 : vector<1x64xf32> to vector<16x64xf32>
    %200 = arith.addf %197, %199 : vector<16x64xf32>
    %201 = arith.negf %200 : vector<16x64xf32>
    %202 = math.exp %201 : vector<16x64xf32>
    %cst_75 = arith.constant 1.000000e+00 : f32
    %203 = vector.broadcast %cst_75 : f32 to vector<16x64xf32>
    %204 = arith.addf %203, %202 : vector<16x64xf32>
    %205 = arith.divf %203, %204 : vector<16x64xf32>
    %206 = arith.mulf %194, %205 : vector<16x64xf32>
    %c0_76 = arith.constant 0 : index
    %c0_77 = arith.constant 0 : index
    %c0_78 = arith.constant 0 : index
    %207 = vector.load %arg23[%c0_76, %c0_77, %c0_78] : memref<7x1x64xf32, #tpu.memory_space<vmem>>, vector<7x1x64xf32>
    %208 = tpu.iota {dimensions = array<i32: 0>} : vector<16x64xi32>
    %c0_79 = arith.constant 0 : index
    %c0_80 = arith.constant 0 : index
    %209 = vector.load %arg24[%c0_79, %c0_80] : memref<1x64xf32, #tpu.memory_space<vmem>>, vector<1x64xf32>
    %210 = vector.shape_cast %209 : vector<1x64xf32> to vector<1x64xf32>
    %211 = vector.broadcast %210 : vector<1x64xf32> to vector<16x64xf32>
    %c3_i32 = arith.constant 3 : i32
    %212 = tpu.dynamic_rotate %206 by %c3_i32 dim 0 : vector<16x64xf32>, i32 -> vector<16x64xf32>
    %c3_i32_81 = arith.constant 3 : i32
    %213 = vector.broadcast %c3_i32_81 : i32 to vector<16x64xi32>
    %214 = arith.cmpi sge, %208, %213 : vector<16x64xi32>
    %cst_82 = arith.constant 0.000000e+00 : f32
    %215 = vector.broadcast %cst_82 : f32 to vector<16x64xf32>
    %216 = arith.select %214, %212, %215 : vector<16x64xi1>, vector<16x64xf32>
    %217 = vector.extract_strided_slice %207 {offsets = [0, 0, 0], sizes = [1, 1, 64], strides = [1, 1, 1]} : vector<7x1x64xf32> to vector<1x1x64xf32>
    %218 = vector.shape_cast %217 : vector<1x1x64xf32> to vector<1x64xf32>
    %219 = vector.broadcast %218 : vector<1x64xf32> to vector<16x64xf32>
    %220 = arith.mulf %216, %219 : vector<16x64xf32>
    %221 = arith.addf %211, %220 : vector<16x64xf32>
    %c2_i32 = arith.constant 2 : i32
    %222 = tpu.dynamic_rotate %206 by %c2_i32 dim 0 : vector<16x64xf32>, i32 -> vector<16x64xf32>
    %c2_i32_83 = arith.constant 2 : i32
    %223 = vector.broadcast %c2_i32_83 : i32 to vector<16x64xi32>
    %224 = arith.cmpi sge, %208, %223 : vector<16x64xi32>
    %cst_84 = arith.constant 0.000000e+00 : f32
    %225 = vector.broadcast %cst_84 : f32 to vector<16x64xf32>
    %226 = arith.select %224, %222, %225 : vector<16x64xi1>, vector<16x64xf32>
    %227 = vector.extract_strided_slice %207 {offsets = [1, 0, 0], sizes = [1, 1, 64], strides = [1, 1, 1]} : vector<7x1x64xf32> to vector<1x1x64xf32>
    %228 = vector.shape_cast %227 : vector<1x1x64xf32> to vector<1x64xf32>
    %229 = vector.broadcast %228 : vector<1x64xf32> to vector<16x64xf32>
    %230 = arith.mulf %226, %229 : vector<16x64xf32>
    %231 = arith.addf %221, %230 : vector<16x64xf32>
    %c1_i32 = arith.constant 1 : i32
    %232 = tpu.dynamic_rotate %206 by %c1_i32 dim 0 : vector<16x64xf32>, i32 -> vector<16x64xf32>
    %c1_i32_85 = arith.constant 1 : i32
    %233 = vector.broadcast %c1_i32_85 : i32 to vector<16x64xi32>
    %234 = arith.cmpi sge, %208, %233 : vector<16x64xi32>
    %cst_86 = arith.constant 0.000000e+00 : f32
    %235 = vector.broadcast %cst_86 : f32 to vector<16x64xf32>
    %236 = arith.select %234, %232, %235 : vector<16x64xi1>, vector<16x64xf32>
    %237 = vector.extract_strided_slice %207 {offsets = [2, 0, 0], sizes = [1, 1, 64], strides = [1, 1, 1]} : vector<7x1x64xf32> to vector<1x1x64xf32>
    %238 = vector.shape_cast %237 : vector<1x1x64xf32> to vector<1x64xf32>
    %239 = vector.broadcast %238 : vector<1x64xf32> to vector<16x64xf32>
    %240 = arith.mulf %236, %239 : vector<16x64xf32>
    %241 = arith.addf %231, %240 : vector<16x64xf32>
    %242 = vector.extract_strided_slice %207 {offsets = [3, 0, 0], sizes = [1, 1, 64], strides = [1, 1, 1]} : vector<7x1x64xf32> to vector<1x1x64xf32>
    %243 = vector.shape_cast %242 : vector<1x1x64xf32> to vector<1x64xf32>
    %244 = vector.broadcast %243 : vector<1x64xf32> to vector<16x64xf32>
    %245 = arith.mulf %206, %244 : vector<16x64xf32>
    %246 = arith.addf %241, %245 : vector<16x64xf32>
    %c15_i32 = arith.constant 15 : i32
    %247 = tpu.dynamic_rotate %206 by %c15_i32 dim 0 : vector<16x64xf32>, i32 -> vector<16x64xf32>
    %c15_i32_87 = arith.constant 15 : i32
    %248 = vector.broadcast %c15_i32_87 : i32 to vector<16x64xi32>
    %249 = arith.cmpi slt, %208, %248 : vector<16x64xi32>
    %cst_88 = arith.constant 0.000000e+00 : f32
    %250 = vector.broadcast %cst_88 : f32 to vector<16x64xf32>
    %251 = arith.select %249, %247, %250 : vector<16x64xi1>, vector<16x64xf32>
    %252 = vector.extract_strided_slice %207 {offsets = [4, 0, 0], sizes = [1, 1, 64], strides = [1, 1, 1]} : vector<7x1x64xf32> to vector<1x1x64xf32>
    %253 = vector.shape_cast %252 : vector<1x1x64xf32> to vector<1x64xf32>
    %254 = vector.broadcast %253 : vector<1x64xf32> to vector<16x64xf32>
    %255 = arith.mulf %251, %254 : vector<16x64xf32>
    %256 = arith.addf %246, %255 : vector<16x64xf32>
    %c14_i32 = arith.constant 14 : i32
    %257 = tpu.dynamic_rotate %206 by %c14_i32 dim 0 : vector<16x64xf32>, i32 -> vector<16x64xf32>
    %c14_i32_89 = arith.constant 14 : i32
    %258 = vector.broadcast %c14_i32_89 : i32 to vector<16x64xi32>
    %259 = arith.cmpi slt, %208, %258 : vector<16x64xi32>
    %cst_90 = arith.constant 0.000000e+00 : f32
    %260 = vector.broadcast %cst_90 : f32 to vector<16x64xf32>
    %261 = arith.select %259, %257, %260 : vector<16x64xi1>, vector<16x64xf32>
    %262 = vector.extract_strided_slice %207 {offsets = [5, 0, 0], sizes = [1, 1, 64], strides = [1, 1, 1]} : vector<7x1x64xf32> to vector<1x1x64xf32>
    %263 = vector.shape_cast %262 : vector<1x1x64xf32> to vector<1x64xf32>
    %264 = vector.broadcast %263 : vector<1x64xf32> to vector<16x64xf32>
    %265 = arith.mulf %261, %264 : vector<16x64xf32>
    %266 = arith.addf %256, %265 : vector<16x64xf32>
    %c13_i32 = arith.constant 13 : i32
    %267 = tpu.dynamic_rotate %206 by %c13_i32 dim 0 : vector<16x64xf32>, i32 -> vector<16x64xf32>
    %c13_i32_91 = arith.constant 13 : i32
    %268 = vector.broadcast %c13_i32_91 : i32 to vector<16x64xi32>
    %269 = arith.cmpi slt, %208, %268 : vector<16x64xi32>
    %cst_92 = arith.constant 0.000000e+00 : f32
    %270 = vector.broadcast %cst_92 : f32 to vector<16x64xf32>
    %271 = arith.select %269, %267, %270 : vector<16x64xi1>, vector<16x64xf32>
    %272 = vector.extract_strided_slice %207 {offsets = [6, 0, 0], sizes = [1, 1, 64], strides = [1, 1, 1]} : vector<7x1x64xf32> to vector<1x1x64xf32>
    %273 = vector.shape_cast %272 : vector<1x1x64xf32> to vector<1x64xf32>
    %274 = vector.broadcast %273 : vector<1x64xf32> to vector<16x64xf32>
    %275 = arith.mulf %271, %274 : vector<16x64xf32>
    %276 = arith.addf %266, %275 : vector<16x64xf32>
    %277 = arith.negf %276 : vector<16x64xf32>
    %278 = math.exp %277 : vector<16x64xf32>
    %cst_93 = arith.constant 1.000000e+00 : f32
    %279 = vector.broadcast %cst_93 : f32 to vector<16x64xf32>
    %280 = arith.addf %279, %278 : vector<16x64xf32>
    %281 = arith.divf %279, %280 : vector<16x64xf32>
    %282 = arith.mulf %276, %281 : vector<16x64xf32>
    %cst_94 = arith.constant dense<0.000000e+00> : vector<16xf32>
    %283 = vector.multi_reduction <add>, %282, %cst_94 [1] : vector<16x64xf32> to vector<16xf32>
    %284 = vector.shape_cast %283 : vector<16xf32> to vector<16x1xf32>
    %cst_95 = arith.constant 6.400000e+01 : f32
    %285 = vector.broadcast %cst_95 : f32 to vector<16x1xf32>
    %286 = arith.divf %284, %285 : vector<16x1xf32>
    %287 = vector.broadcast %286 : vector<16x1xf32> to vector<16x64xf32>
    %288 = arith.subf %282, %287 : vector<16x64xf32>
    %289 = arith.mulf %288, %288 : vector<16x64xf32>
    %cst_96 = arith.constant dense<0.000000e+00> : vector<16xf32>
    %290 = vector.multi_reduction <add>, %289, %cst_96 [1] : vector<16x64xf32> to vector<16xf32>
    %291 = vector.shape_cast %290 : vector<16xf32> to vector<16x1xf32>
    %cst_97 = arith.constant 6.400000e+01 : f32
    %292 = vector.broadcast %cst_97 : f32 to vector<16x1xf32>
    %293 = arith.divf %291, %292 : vector<16x1xf32>
    %294 = vector.broadcast %286 : vector<16x1xf32> to vector<16x64xf32>
    %295 = arith.subf %282, %294 : vector<16x64xf32>
    %cst_98 = arith.constant 9.99999997E-7 : f32
    %296 = vector.broadcast %cst_98 : f32 to vector<16x1xf32>
    %297 = arith.maximumf %293, %296 : vector<16x1xf32>
    %298 = math.rsqrt %297 : vector<16x1xf32>
    %299 = vector.broadcast %298 : vector<16x1xf32> to vector<16x64xf32>
    %300 = arith.mulf %295, %299 : vector<16x64xf32>
    %c0_99 = arith.constant 0 : index
    %c0_100 = arith.constant 0 : index
    %301 = vector.load %arg25[%c0_99, %c0_100] : memref<1x64xf32, #tpu.memory_space<vmem>>, vector<1x64xf32>
    %302 = vector.broadcast %301 : vector<1x64xf32> to vector<16x64xf32>
    %303 = arith.mulf %300, %302 : vector<16x64xf32>
    %c0_101 = arith.constant 0 : index
    %c0_102 = arith.constant 0 : index
    %304 = vector.load %arg26[%c0_101, %c0_102] : memref<64x32xbf16, #tpu.memory_space<vmem>>, vector<64x32xbf16>
    %305 = arith.truncf %303 : vector<16x64xf32> to vector<16x64xbf16>
    %cst_103 = arith.constant dense<0.000000e+00> : vector<16x32xf32>
    %306 = tpu.matmul %305, %304, %cst_103 {dimension_numbers = #tpu.dot_dimension_numbers<[1], [0], [0], [1], [0, 0, 1, 1], [], []>} : vector<16x64xbf16>, vector<64x32xbf16>, vector<16x32xf32> -> vector<16x32xf32>
    %307 = arith.addf %164, %306 : vector<16x32xf32>
    %c0_104 = arith.constant 0 : index
    %c0_105 = arith.constant 0 : index
    %308 = vector.load %arg27[%c0_104, %c0_105] : memref<1x32xf32, #tpu.memory_space<vmem>>, vector<1x32xf32>
    %309 = vector.broadcast %308 : vector<1x32xf32> to vector<16x32xf32>
    %310 = arith.addf %307, %309 : vector<16x32xf32>
    %c0_106 = arith.constant 0 : index
    %c0_107 = arith.constant 0 : index
    %311 = vector.load %arg28[%c0_106, %c0_107] : memref<1x32xf32, #tpu.memory_space<vmem>>, vector<1x32xf32>
    %c0_108 = arith.constant 0 : index
    %c0_109 = arith.constant 0 : index
    %312 = vector.load %arg29[%c0_108, %c0_109] : memref<1x32xf32, #tpu.memory_space<vmem>>, vector<1x32xf32>
    %cst_110 = arith.constant dense<0.000000e+00> : vector<16xf32>
    %313 = vector.multi_reduction <add>, %310, %cst_110 [1] : vector<16x32xf32> to vector<16xf32>
    %314 = vector.shape_cast %313 : vector<16xf32> to vector<16x1xf32>
    %cst_111 = arith.constant 3.200000e+01 : f32
    %315 = vector.broadcast %cst_111 : f32 to vector<16x1xf32>
    %316 = arith.divf %314, %315 : vector<16x1xf32>
    %317 = vector.broadcast %316 : vector<16x1xf32> to vector<16x32xf32>
    %318 = arith.subf %310, %317 : vector<16x32xf32>
    %319 = arith.mulf %318, %318 : vector<16x32xf32>
    %cst_112 = arith.constant dense<0.000000e+00> : vector<16xf32>
    %320 = vector.multi_reduction <add>, %319, %cst_112 [1] : vector<16x32xf32> to vector<16xf32>
    %321 = vector.shape_cast %320 : vector<16xf32> to vector<16x1xf32>
    %cst_113 = arith.constant 3.200000e+01 : f32
    %322 = vector.broadcast %cst_113 : f32 to vector<16x1xf32>
    %323 = arith.divf %321, %322 : vector<16x1xf32>
    %324 = vector.broadcast %316 : vector<16x1xf32> to vector<16x32xf32>
    %325 = arith.subf %310, %324 : vector<16x32xf32>
    %cst_114 = arith.constant 9.99999974E-6 : f32
    %326 = vector.broadcast %cst_114 : f32 to vector<16x1xf32>
    %327 = arith.addf %323, %326 : vector<16x1xf32>
    %328 = math.rsqrt %327 : vector<16x1xf32>
    %329 = vector.broadcast %328 : vector<16x1xf32> to vector<16x32xf32>
    %330 = arith.mulf %325, %329 : vector<16x32xf32>
    %331 = vector.broadcast %311 : vector<1x32xf32> to vector<16x32xf32>
    %332 = arith.mulf %330, %331 : vector<16x32xf32>
    %333 = vector.broadcast %312 : vector<1x32xf32> to vector<16x32xf32>
    %334 = arith.addf %332, %333 : vector<16x32xf32>
    %c0_115 = arith.constant 0 : index
    %c0_116 = arith.constant 0 : index
    %335 = vector.load %arg30[%c0_115, %c0_116] : memref<32x128xbf16, #tpu.memory_space<vmem>>, vector<32x128xbf16>
    %336 = arith.truncf %334 : vector<16x32xf32> to vector<16x32xbf16>
    %cst_117 = arith.constant dense<0.000000e+00> : vector<16x128xf32>
    %337 = tpu.matmul %336, %335, %cst_117 {dimension_numbers = #tpu.dot_dimension_numbers<[1], [0], [0], [1], [0, 0, 1, 1], [], []>} : vector<16x32xbf16>, vector<32x128xbf16>, vector<16x128xf32> -> vector<16x128xf32>
    %c0_118 = arith.constant 0 : index
    %c0_119 = arith.constant 0 : index
    %338 = vector.load %arg31[%c0_118, %c0_119] : memref<1x128xf32, #tpu.memory_space<vmem>>, vector<1x128xf32>
    %339 = vector.broadcast %338 : vector<1x128xf32> to vector<16x128xf32>
    %340 = arith.addf %337, %339 : vector<16x128xf32>
    %341 = arith.negf %340 : vector<16x128xf32>
    %342 = math.exp %341 : vector<16x128xf32>
    %cst_120 = arith.constant 1.000000e+00 : f32
    %343 = vector.broadcast %cst_120 : f32 to vector<16x128xf32>
    %344 = arith.addf %343, %342 : vector<16x128xf32>
    %345 = arith.divf %343, %344 : vector<16x128xf32>
    %346 = arith.mulf %340, %345 : vector<16x128xf32>
    %c0_121 = arith.constant 0 : index
    %c0_122 = arith.constant 0 : index
    %347 = vector.load %arg32[%c0_121, %c0_122] : memref<128x32xbf16, #tpu.memory_space<vmem>>, vector<128x32xbf16>
    %348 = arith.truncf %346 : vector<16x128xf32> to vector<16x128xbf16>
    %cst_123 = arith.constant dense<0.000000e+00> : vector<16x32xf32>
    %349 = tpu.matmul %348, %347, %cst_123 {dimension_numbers = #tpu.dot_dimension_numbers<[1], [0], [0], [1], [0, 0, 1, 1], [], []>} : vector<16x128xbf16>, vector<128x32xbf16>, vector<16x32xf32> -> vector<16x32xf32>
    %c0_124 = arith.constant 0 : index
    %c0_125 = arith.constant 0 : index
    %350 = vector.load %arg33[%c0_124, %c0_125] : memref<1x32xf32, #tpu.memory_space<vmem>>, vector<1x32xf32>
    %351 = vector.broadcast %350 : vector<1x32xf32> to vector<16x32xf32>
    %352 = arith.addf %349, %351 : vector<16x32xf32>
    %cst_126 = arith.constant 5.000000e-01 : f32
    %353 = vector.broadcast %cst_126 : f32 to vector<16x32xf32>
    %354 = arith.mulf %353, %352 : vector<16x32xf32>
    %355 = arith.addf %310, %354 : vector<16x32xf32>
    %c0_127 = arith.constant 0 : index
    %c0_128 = arith.constant 0 : index
    %356 = vector.load %arg34[%c0_127, %c0_128] : memref<1x32xf32, #tpu.memory_space<vmem>>, vector<1x32xf32>
    %c0_129 = arith.constant 0 : index
    %c0_130 = arith.constant 0 : index
    %357 = vector.load %arg35[%c0_129, %c0_130] : memref<1x32xf32, #tpu.memory_space<vmem>>, vector<1x32xf32>
    %cst_131 = arith.constant dense<0.000000e+00> : vector<16xf32>
    %358 = vector.multi_reduction <add>, %355, %cst_131 [1] : vector<16x32xf32> to vector<16xf32>
    %359 = vector.shape_cast %358 : vector<16xf32> to vector<16x1xf32>
    %cst_132 = arith.constant 3.200000e+01 : f32
    %360 = vector.broadcast %cst_132 : f32 to vector<16x1xf32>
    %361 = arith.divf %359, %360 : vector<16x1xf32>
    %362 = vector.broadcast %361 : vector<16x1xf32> to vector<16x32xf32>
    %363 = arith.subf %355, %362 : vector<16x32xf32>
    %364 = arith.mulf %363, %363 : vector<16x32xf32>
    %cst_133 = arith.constant dense<0.000000e+00> : vector<16xf32>
    %365 = vector.multi_reduction <add>, %364, %cst_133 [1] : vector<16x32xf32> to vector<16xf32>
    %366 = vector.shape_cast %365 : vector<16xf32> to vector<16x1xf32>
    %cst_134 = arith.constant 3.200000e+01 : f32
    %367 = vector.broadcast %cst_134 : f32 to vector<16x1xf32>
    %368 = arith.divf %366, %367 : vector<16x1xf32>
    %369 = vector.broadcast %361 : vector<16x1xf32> to vector<16x32xf32>
    %370 = arith.subf %355, %369 : vector<16x32xf32>
    %cst_135 = arith.constant 9.99999974E-6 : f32
    %371 = vector.broadcast %cst_135 : f32 to vector<16x1xf32>
    %372 = arith.addf %368, %371 : vector<16x1xf32>
    %373 = math.rsqrt %372 : vector<16x1xf32>
    %374 = vector.broadcast %373 : vector<16x1xf32> to vector<16x32xf32>
    %375 = arith.mulf %370, %374 : vector<16x32xf32>
    %376 = vector.broadcast %356 : vector<1x32xf32> to vector<16x32xf32>
    %377 = arith.mulf %375, %376 : vector<16x32xf32>
    %378 = vector.broadcast %357 : vector<1x32xf32> to vector<16x32xf32>
    %379 = arith.addf %377, %378 : vector<16x32xf32>
    %c0_136 = arith.constant 0 : index
    %c0_137 = arith.constant 0 : index
    %c0_138 = arith.constant 0 : index
    %380 = vector.load %arg36[%c0_136, %c0_137, %c0_138] : memref<1x16x32xf32, #tpu.memory_space<vmem>>, vector<1x16x32xf32>
    %381 = vector.shape_cast %380 : vector<1x16x32xf32> to vector<16x32xf32>
    %382 = vector.shape_cast %379 : vector<16x32xf32> to vector<1x16x32xf32>
    tpu.vector_store %arg36[%c0_136, %c0_137, %c0_138], %382 {strides = array<i32>} : memref<1x16x32xf32, #tpu.memory_space<vmem>>, vector<1x16x32xf32>,
    return
  }
  func.func @transform_0(%arg0: i32) -> (i32, i32, i32) {
    %c0_i32 = arith.constant 0 : i32
    %c0_i32_0 = arith.constant 0 : i32
    %c0_i32_1 = arith.constant 0 : i32
    return %arg0, %c0_i32, %c0_i32_0 : i32, i32, i32
  }
  func.func @transform_1(%arg0: i32) -> (i32, i32) {
    %c0_i32 = arith.constant 0 : i32
    %c0_i32_0 = arith.constant 0 : i32
    %c0_i32_1 = arith.constant 0 : i32
    return %c0_i32, %c0_i32_0 : i32, i32
  }
  func.func @transform_2(%arg0: i32) -> (i32, i32) {
    %c0_i32 = arith.constant 0 : i32
    %c0_i32_0 = arith.constant 0 : i32
    %c0_i32_1 = arith.constant 0 : i32
    return %c0_i32, %c0_i32_0 : i32, i32
  }
  func.func @transform_3(%arg0: i32) -> (i32, i32) {
    %c0_i32 = arith.constant 0 : i32
    %c0_i32_0 = arith.constant 0 : i32
    %c0_i32_1 = arith.constant 0 : i32
    return %c0_i32, %c0_i32_0 : i32, i32
  }
  func.func @transform_4(%arg0: i32) -> (i32, i32) {
    %c0_i32 = arith.constant 0 : i32
    %c0_i32_0 = arith.constant 0 : i32
    %c0_i32_1 = arith.constant 0 : i32
    return %c0_i32, %c0_i32_0 : i32, i32
  }
  func.func @transform_5(%arg0: i32) -> (i32, i32) {
    %c0_i32 = arith.constant 0 : i32
    %c0_i32_0 = arith.constant 0 : i32
    %c0_i32_1 = arith.constant 0 : i32
    return %c0_i32, %c0_i32_0 : i32, i32
  }
  func.func @transform_6(%arg0: i32) -> (i32, i32) {
    %c0_i32 = arith.constant 0 : i32
    %c0_i32_0 = arith.constant 0 : i32
    %c0_i32_1 = arith.constant 0 : i32
    return %c0_i32, %c0_i32_0 : i32, i32
  }
  func.func @transform_7(%arg0: i32) -> (i32, i32) {
    %c0_i32 = arith.constant 0 : i32
    %c0_i32_0 = arith.constant 0 : i32
    %c0_i32_1 = arith.constant 0 : i32
    return %c0_i32, %c0_i32_0 : i32, i32
  }
  func.func @transform_8(%arg0: i32) -> (i32, i32) {
    %c0_i32 = arith.constant 0 : i32
    %c0_i32_0 = arith.constant 0 : i32
    %c0_i32_1 = arith.constant 0 : i32
    return %c0_i32, %c0_i32_0 : i32, i32
  }
  func.func @transform_9(%arg0: i32) -> (i32, i32) {
    %c0_i32 = arith.constant 0 : i32
    %c0_i32_0 = arith.constant 0 : i32
    %c0_i32_1 = arith.constant 0 : i32
    return %c0_i32, %c0_i32_0 : i32, i32
  }
  func.func @transform_10(%arg0: i32) -> (i32, i32) {
    %c0_i32 = arith.constant 0 : i32
    %c0_i32_0 = arith.constant 0 : i32
    %c0_i32_1 = arith.constant 0 : i32
    return %c0_i32, %c0_i32_0 : i32, i32
  }
  func.func @transform_11(%arg0: i32) -> (i32, i32) {
    %c0_i32 = arith.constant 0 : i32
    %c0_i32_0 = arith.constant 0 : i32
    %c0_i32_1 = arith.constant 0 : i32
    return %c0_i32, %c0_i32_0 : i32, i32
  }
  func.func @transform_12(%arg0: i32) -> (i32, i32) {
    %c0_i32 = arith.constant 0 : i32
    %c0_i32_0 = arith.constant 0 : i32
    %c0_i32_1 = arith.constant 0 : i32
    return %c0_i32, %c0_i32_0 : i32, i32
  }
  func.func @transform_13(%arg0: i32) -> (i32, i32) {
    %c0_i32 = arith.constant 0 : i32
    %c0_i32_0 = arith.constant 0 : i32
    %c0_i32_1 = arith.constant 0 : i32
    return %c0_i32, %c0_i32_0 : i32, i32
  }
  func.func @transform_14(%arg0: i32) -> (i32, i32) {
    %c0_i32 = arith.constant 0 : i32
    %c0_i32_0 = arith.constant 0 : i32
    %c0_i32_1 = arith.constant 0 : i32
    return %c0_i32, %c0_i32_0 : i32, i32
  }
  func.func @transform_15(%arg0: i32) -> (i32, i32) {
    %c0_i32 = arith.constant 0 : i32
    %c0_i32_0 = arith.constant 0 : i32
    %c0_i32_1 = arith.constant 0 : i32
    return %c0_i32, %c0_i32_0 : i32, i32
  }
  func.func @transform_16(%arg0: i32) -> (i32, i32) {
    %c0_i32 = arith.constant 0 : i32
    %c0_i32_0 = arith.constant 0 : i32
    %c0_i32_1 = arith.constant 0 : i32
    return %c0_i32, %c0_i32_0 : i32, i32
  }
  func.func @transform_17(%arg0: i32) -> (i32, i32) {
    %c0_i32 = arith.constant 0 : i32
    %c0_i32_0 = arith.constant 0 : i32
    %c0_i32_1 = arith.constant 0 : i32
    return %c0_i32, %c0_i32_0 : i32, i32
  }
  func.func @transform_18(%arg0: i32) -> (i32, i32) {
    %c0_i32 = arith.constant 0 : i32
    %c0_i32_0 = arith.constant 0 : i32
    %c0_i32_1 = arith.constant 0 : i32
    return %c0_i32, %c0_i32_0 : i32, i32
  }
  func.func @transform_19(%arg0: i32) -> (i32, i32) {
    %c0_i32 = arith.constant 0 : i32
    %c0_i32_0 = arith.constant 0 : i32
    %c0_i32_1 = arith.constant 0 : i32
    return %c0_i32, %c0_i32_0 : i32, i32
  }
  func.func @transform_20(%arg0: i32) -> (i32, i32) {
    %c0_i32 = arith.constant 0 : i32
    %c0_i32_0 = arith.constant 0 : i32
    %c0_i32_1 = arith.constant 0 : i32
    return %c0_i32, %c0_i32_0 : i32, i32
  }
  func.func @transform_21(%arg0: i32) -> (i32, i32) {
    %c0_i32 = arith.constant 0 : i32
    %c0_i32_0 = arith.constant 0 : i32
    %c0_i32_1 = arith.constant 0 : i32
    return %c0_i32, %c0_i32_0 : i32, i32
  }
  func.func @transform_22(%arg0: i32) -> (i32, i32, i32) {
    %c0_i32 = arith.constant 0 : i32
    %c0_i32_0 = arith.constant 0 : i32
    %c0_i32_1 = arith.constant 0 : i32
    %c0_i32_2 = arith.constant 0 : i32
    return %c0_i32, %c0_i32_0, %c0_i32_1 : i32, i32, i32
  }
  func.func @transform_23(%arg0: i32) -> (i32, i32) {
    %c0_i32 = arith.constant 0 : i32
    %c0_i32_0 = arith.constant 0 : i32
    %c0_i32_1 = arith.constant 0 : i32
    return %c0_i32, %c0_i32_0 : i32, i32
  }
  func.func @transform_24(%arg0: i32) -> (i32, i32) {
    %c0_i32 = arith.constant 0 : i32
    %c0_i32_0 = arith.constant 0 : i32
    %c0_i32_1 = arith.constant 0 : i32
    return %c0_i32, %c0_i32_0 : i32, i32
  }
  func.func @transform_25(%arg0: i32) -> (i32, i32) {
    %c0_i32 = arith.constant 0 : i32
    %c0_i32_0 = arith.constant 0 : i32
    %c0_i32_1 = arith.constant 0 : i32
    return %c0_i32, %c0_i32_0 : i32, i32
  }
  func.func @transform_26(%arg0: i32) -> (i32, i32) {
    %c0_i32 = arith.constant 0 : i32
    %c0_i32_0 = arith.constant 0 : i32
    %c0_i32_1 = arith.constant 0 : i32
    return %c0_i32, %c0_i32_0 : i32, i32
  }
  func.func @transform_27(%arg0: i32) -> (i32, i32) {
    %c0_i32 = arith.constant 0 : i32
    %c0_i32_0 = arith.constant 0 : i32
    %c0_i32_1 = arith.constant 0 : i32
    return %c0_i32, %c0_i32_0 : i32, i32
  }
  func.func @transform_28(%arg0: i32) -> (i32, i32) {
    %c0_i32 = arith.constant 0 : i32
    %c0_i32_0 = arith.constant 0 : i32
    %c0_i32_1 = arith.constant 0 : i32
    return %c0_i32, %c0_i32_0 : i32, i32
  }
  func.func @transform_29(%arg0: i32) -> (i32, i32) {
    %c0_i32 = arith.constant 0 : i32
    %c0_i32_0 = arith.constant 0 : i32
    %c0_i32_1 = arith.constant 0 : i32
    return %c0_i32, %c0_i32_0 : i32, i32
  }
  func.func @transform_30(%arg0: i32) -> (i32, i32) {
    %c0_i32 = arith.constant 0 : i32
    %c0_i32_0 = arith.constant 0 : i32
    %c0_i32_1 = arith.constant 0 : i32
    return %c0_i32, %c0_i32_0 : i32, i32
  }
  func.func @transform_31(%arg0: i32) -> (i32, i32) {
    %c0_i32 = arith.constant 0 : i32
    %c0_i32_0 = arith.constant 0 : i32
    %c0_i32_1 = arith.constant 0 : i32
    return %c0_i32, %c0_i32_0 : i32, i32
  }
  func.func @transform_32(%arg0: i32) -> (i32, i32) {
    %c0_i32 = arith.constant 0 : i32
    %c0_i32_0 = arith.constant 0 : i32
    %c0_i32_1 = arith.constant 0 : i32
    return %c0_i32, %c0_i32_0 : i32, i32
  }
  func.func @transform_33(%arg0: i32) -> (i32, i32) {
    %c0_i32 = arith.constant 0 : i32
    %c0_i32_0 = arith.constant 0 : i32
    %c0_i32_1 = arith.constant 0 : i32
    return %c0_i32, %c0_i32_0 : i32, i32
  }
  func.func @transform_34(%arg0: i32) -> (i32, i32) {
    %c0_i32 = arith.constant 0 : i32
    %c0_i32_0 = arith.constant 0 : i32
    %c0_i32_1 = arith.constant 0 : i32
    return %c0_i32, %c0_i32_0 : i32, i32
  }
  func.func @transform_35(%arg0: i32) -> (i32, i32, i32) {
    %c0_i32 = arith.constant 0 : i32
    %c0_i32_0 = arith.constant 0 : i32
    %c0_i32_1 = arith.constant 0 : i32
    return %arg0, %c0_i32, %c0_i32_0 : i32, i32, i32
  }
}

module attributes {stable_mosaic.version = 11 : i64} {
  func.func @_conformer_layer_kernel(%arg0: i32, %arg1: memref<1x16x32xf32, #tpu.memory_space<vmem>>, %arg2: memref<1x32xf32, #tpu.memory_space<vmem>>, %arg3: memref<1x32xf32, #tpu.memory_space<vmem>>, %arg4: memref<32x128xbf16, #tpu.memory_space<vmem>>, %arg5: memref<1x128xf32, #tpu.memory_space<vmem>>, %arg6: memref<128x32xbf16, #tpu.memory_space<vmem>>, %arg7: memref<1x32xf32, #tpu.memory_space<vmem>>, %arg8: memref<1x32xf32, #tpu.memory_space<vmem>>, %arg9: memref<1x32xf32, #tpu.memory_space<vmem>>, %arg10: memref<32x64xbf16, #tpu.memory_space<vmem>>, %arg11: memref<32x64xbf16, #tpu.memory_space<vmem>>, %arg12: memref<32x64xbf16, #tpu.memory_space<vmem>>, %arg13: memref<64x32xbf16, #tpu.memory_space<vmem>>, %arg14: memref<1x32xf32, #tpu.memory_space<vmem>>, %arg15: memref<16x16xf32, #tpu.memory_space<vmem>>, %arg16: memref<16x16xf32, #tpu.memory_space<vmem>>, %arg17: memref<1x32xf32, #tpu.memory_space<vmem>>, %arg18: memref<1x32xf32, #tpu.memory_space<vmem>>, %arg19: memref<32x64xbf16, #tpu.memory_space<vmem>>, %arg20: memref<1x64xf32, #tpu.memory_space<vmem>>, %arg21: memref<32x64xbf16, #tpu.memory_space<vmem>>, %arg22: memref<1x64xf32, #tpu.memory_space<vmem>>, %arg23: memref<7x1x64xf32, #tpu.memory_space<vmem>>, %arg24: memref<1x64xf32, #tpu.memory_space<vmem>>, %arg25: memref<1x64xf32, #tpu.memory_space<vmem>>, %arg26: memref<64x32xbf16, #tpu.memory_space<vmem>>, %arg27: memref<1x32xf32, #tpu.memory_space<vmem>>, %arg28: memref<1x32xf32, #tpu.memory_space<vmem>>, %arg29: memref<1x32xf32, #tpu.memory_space<vmem>>, %arg30: memref<32x128xbf16, #tpu.memory_space<vmem>>, %arg31: memref<1x128xf32, #tpu.memory_space<vmem>>, %arg32: memref<128x32xbf16, #tpu.memory_space<vmem>>, %arg33: memref<1x32xf32, #tpu.memory_space<vmem>>, %arg34: memref<1x32xf32, #tpu.memory_space<vmem>>, %arg35: memref<1x32xf32, #tpu.memory_space<vmem>>, %arg36: memref<1x16x32xf32, #tpu.memory_space<vmem>>) attributes {dimension_semantics = [#tpu.dimension_semantics<parallel>], iteration_bounds = array<i64: 2>, scalar_prefetch = 0 : i64, scratch_operands = 0 : i64, tpu.core_type = #tpu.core_type<tc>, window_params = [{transform_indices = @transform_0, window_bounds = array<i64: 1, 16, 32>}, {pipeline_mode = #tpu.pipeline_mode<synchronous>, transform_indices = @transform_1, window_bounds = array<i64: 1, 32>}, {pipeline_mode = #tpu.pipeline_mode<synchronous>, transform_indices = @transform_2, window_bounds = array<i64: 1, 32>}, {pipeline_mode = #tpu.pipeline_mode<synchronous>, transform_indices = @transform_3, window_bounds = array<i64: 32, 128>}, {pipeline_mode = #tpu.pipeline_mode<synchronous>, transform_indices = @transform_4, window_bounds = array<i64: 1, 128>}, {pipeline_mode = #tpu.pipeline_mode<synchronous>, transform_indices = @transform_5, window_bounds = array<i64: 128, 32>}, {pipeline_mode = #tpu.pipeline_mode<synchronous>, transform_indices = @transform_6, window_bounds = array<i64: 1, 32>}, {pipeline_mode = #tpu.pipeline_mode<synchronous>, transform_indices = @transform_7, window_bounds = array<i64: 1, 32>}, {pipeline_mode = #tpu.pipeline_mode<synchronous>, transform_indices = @transform_8, window_bounds = array<i64: 1, 32>}, {pipeline_mode = #tpu.pipeline_mode<synchronous>, transform_indices = @transform_9, window_bounds = array<i64: 32, 64>}, {pipeline_mode = #tpu.pipeline_mode<synchronous>, transform_indices = @transform_10, window_bounds = array<i64: 32, 64>}, {pipeline_mode = #tpu.pipeline_mode<synchronous>, transform_indices = @transform_11, window_bounds = array<i64: 32, 64>}, {pipeline_mode = #tpu.pipeline_mode<synchronous>, transform_indices = @transform_12, window_bounds = array<i64: 64, 32>}, {pipeline_mode = #tpu.pipeline_mode<synchronous>, transform_indices = @transform_13, window_bounds = array<i64: 1, 32>}, {pipeline_mode = #tpu.pipeline_mode<synchronous>, transform_indices = @transform_14, window_bounds = array<i64: 16, 16>}, {pipeline_mode = #tpu.pipeline_mode<synchronous>, transform_indices = @transform_15, window_bounds = array<i64: 16, 16>}, {pipeline_mode = #tpu.pipeline_mode<synchronous>, transform_indices = @transform_16, window_bounds = array<i64: 1, 32>}, {pipeline_mode = #tpu.pipeline_mode<synchronous>, transform_indices = @transform_17, window_bounds = array<i64: 1, 32>}, {pipeline_mode = #tpu.pipeline_mode<synchronous>, transform_indices = @transform_18, window_bounds = array<i64: 32, 64>}, {pipeline_mode = #tpu.pipeline_mode<synchronous>, transform_indices = @transform_19, window_bounds = array<i64: 1, 64>}, {pipeline_mode = #tpu.pipeline_mode<synchronous>, transform_indices = @transform_20, window_bounds = array<i64: 32, 64>}, {pipeline_mode = #tpu.pipeline_mode<synchronous>, transform_indices = @transform_21, window_bounds = array<i64: 1, 64>}, {pipeline_mode = #tpu.pipeline_mode<synchronous>, transform_indices = @transform_22, window_bounds = array<i64: 7, 1, 64>}, {pipeline_mode = #tpu.pipeline_mode<synchronous>, transform_indices = @transform_23, window_bounds = array<i64: 1, 64>}, {pipeline_mode = #tpu.pipeline_mode<synchronous>, transform_indices = @transform_24, window_bounds = array<i64: 1, 64>}, {pipeline_mode = #tpu.pipeline_mode<synchronous>, transform_indices = @transform_25, window_bounds = array<i64: 64, 32>}, {pipeline_mode = #tpu.pipeline_mode<synchronous>, transform_indices = @transform_26, window_bounds = array<i64: 1, 32>}, {pipeline_mode = #tpu.pipeline_mode<synchronous>, transform_indices = @transform_27, window_bounds = array<i64: 1, 32>}, {pipeline_mode = #tpu.pipeline_mode<synchronous>, transform_indices = @transform_28, window_bounds = array<i64: 1, 32>}, {pipeline_mode = #tpu.pipeline_mode<synchronous>, transform_indices = @transform_29, window_bounds = array<i64: 32, 128>}, {pipeline_mode = #tpu.pipeline_mode<synchronous>, transform_indices = @transform_30, window_bounds = array<i64: 1, 128>}, {pipeline_mode = #tpu.pipeline_mode<synchronous>, transform_indices = @transform_31, window_bounds = array<i64: 128, 32>}, {pipeline_mode = #tpu.pipeline_mode<synchronous>, transform_indices = @transform_32, window_bounds = array<i64: 1, 32>}, {pipeline_mode = #tpu.pipeline_mode<synchronous>, transform_indices = @transform_33, window_bounds = array<i64: 1, 32>}, {pipeline_mode = #tpu.pipeline_mode<synchronous>, transform_indices = @transform_34, window_bounds = array<i64: 1, 32>}, {transform_indices = @transform_35, window_bounds = array<i64: 1, 16, 32>}]} {
    %c0 = arith.constant 0 : index
    %c0_0 = arith.constant 0 : index
    %c0_1 = arith.constant 0 : index
    %0 = vector.load %arg1[%c0, %c0_0, %c0_1] : memref<1x16x32xf32, #tpu.memory_space<vmem>>, vector<1x16x32xf32>
    %1 = vector.shape_cast %0 : vector<1x16x32xf32> to vector<16x32xf32>
    %c0_2 = arith.constant 0 : index
    %c0_3 = arith.constant 0 : index
    %2 = vector.load %arg2[%c0_2, %c0_3] : memref<1x32xf32, #tpu.memory_space<vmem>>, vector<1x32xf32>
    %c0_4 = arith.constant 0 : index
    %c0_5 = arith.constant 0 : index
    %3 = vector.load %arg3[%c0_4, %c0_5] : memref<1x32xf32, #tpu.memory_space<vmem>>, vector<1x32xf32>
    %cst = arith.constant dense<0.000000e+00> : vector<16xf32>
    %4 = vector.multi_reduction <add>, %1, %cst [1] : vector<16x32xf32> to vector<16xf32>
    %5 = vector.shape_cast %4 : vector<16xf32> to vector<16x1xf32>
    %cst_6 = arith.constant 3.200000e+01 : f32
    %6 = vector.broadcast %cst_6 : f32 to vector<16x1xf32>
    %7 = arith.divf %5, %6 : vector<16x1xf32>
    %8 = vector.broadcast %7 : vector<16x1xf32> to vector<16x32xf32>
    %9 = arith.subf %1, %8 : vector<16x32xf32>
    %10 = arith.mulf %9, %9 : vector<16x32xf32>
    %cst_7 = arith.constant dense<0.000000e+00> : vector<16xf32>
    %11 = vector.multi_reduction <add>, %10, %cst_7 [1] : vector<16x32xf32> to vector<16xf32>
    %12 = vector.shape_cast %11 : vector<16xf32> to vector<16x1xf32>
    %cst_8 = arith.constant 3.200000e+01 : f32
    %13 = vector.broadcast %cst_8 : f32 to vector<16x1xf32>
    %14 = arith.divf %12, %13 : vector<16x1xf32>
    %15 = vector.broadcast %7 : vector<16x1xf32> to vector<16x32xf32>
    %16 = arith.subf %1, %15 : vector<16x32xf32>
    %cst_9 = arith.constant 9.99999974E-6 : f32
    %17 = vector.broadcast %cst_9 : f32 to vector<16x1xf32>
    %18 = arith.addf %14, %17 : vector<16x1xf32>
    %19 = math.rsqrt %18 : vector<16x1xf32>
    %20 = vector.broadcast %19 : vector<16x1xf32> to vector<16x32xf32>
    %21 = arith.mulf %16, %20 : vector<16x32xf32>
    %22 = vector.broadcast %2 : vector<1x32xf32> to vector<16x32xf32>
    %23 = arith.mulf %21, %22 : vector<16x32xf32>
    %24 = vector.broadcast %3 : vector<1x32xf32> to vector<16x32xf32>
    %25 = arith.addf %23, %24 : vector<16x32xf32>
    %c0_10 = arith.constant 0 : index
    %c0_11 = arith.constant 0 : index
    %26 = vector.load %arg4[%c0_10, %c0_11] : memref<32x128xbf16, #tpu.memory_space<vmem>>, vector<32x128xbf16>
    %27 = arith.truncf %25 : vector<16x32xf32> to vector<16x32xbf16>
    %cst_12 = arith.constant dense<0.000000e+00> : vector<16x128xf32>
    %28 = tpu.matmul %27, %26, %cst_12 {dimension_numbers = #tpu.dot_dimension_numbers<[1], [0], [0], [1], [0, 0, 1, 1], [], []>} : vector<16x32xbf16>, vector<32x128xbf16>, vector<16x128xf32> -> vector<16x128xf32>
    %c0_13 = arith.constant 0 : index
    %c0_14 = arith.constant 0 : index
    %29 = vector.load %arg5[%c0_13, %c0_14] : memref<1x128xf32, #tpu.memory_space<vmem>>, vector<1x128xf32>
    %30 = vector.broadcast %29 : vector<1x128xf32> to vector<16x128xf32>
    %31 = arith.addf %28, %30 : vector<16x128xf32>
    %32 = arith.negf %31 : vector<16x128xf32>
    %33 = math.exp %32 : vector<16x128xf32>
    %cst_15 = arith.constant 1.000000e+00 : f32
    %34 = vector.broadcast %cst_15 : f32 to vector<16x128xf32>
    %35 = arith.addf %34, %33 : vector<16x128xf32>
    %36 = arith.divf %34, %35 : vector<16x128xf32>
    %37 = arith.mulf %31, %36 : vector<16x128xf32>
    %c0_16 = arith.constant 0 : index
    %c0_17 = arith.constant 0 : index
    %38 = vector.load %arg6[%c0_16, %c0_17] : memref<128x32xbf16, #tpu.memory_space<vmem>>, vector<128x32xbf16>
    %39 = arith.truncf %37 : vector<16x128xf32> to vector<16x128xbf16>
    %cst_18 = arith.constant dense<0.000000e+00> : vector<16x32xf32>
    %40 = tpu.matmul %39, %38, %cst_18 {dimension_numbers = #tpu.dot_dimension_numbers<[1], [0], [0], [1], [0, 0, 1, 1], [], []>} : vector<16x128xbf16>, vector<128x32xbf16>, vector<16x32xf32> -> vector<16x32xf32>
    %c0_19 = arith.constant 0 : index
    %c0_20 = arith.constant 0 : index
    %41 = vector.load %arg7[%c0_19, %c0_20] : memref<1x32xf32, #tpu.memory_space<vmem>>, vector<1x32xf32>
    %42 = vector.broadcast %41 : vector<1x32xf32> to vector<16x32xf32>
    %43 = arith.addf %40, %42 : vector<16x32xf32>
    %cst_21 = arith.constant 5.000000e-01 : f32
    %44 = vector.broadcast %cst_21 : f32 to vector<16x32xf32>
    %45 = arith.mulf %44, %43 : vector<16x32xf32>
    %46 = arith.addf %1, %45 : vector<16x32xf32>
    %c0_22 = arith.constant 0 : index
    %c0_23 = arith.constant 0 : index
    %47 = vector.load %arg8[%c0_22, %c0_23] : memref<1x32xf32, #tpu.memory_space<vmem>>, vector<1x32xf32>
    %c0_24 = arith.constant 0 : index
    %c0_25 = arith.constant 0 : index
    %48 = vector.load %arg9[%c0_24, %c0_25] : memref<1x32xf32, #tpu.memory_space<vmem>>, vector<1x32xf32>
    %cst_26 = arith.constant dense<0.000000e+00> : vector<16xf32>
    %49 = vector.multi_reduction <add>, %46, %cst_26 [1] : vector<16x32xf32> to vector<16xf32>
    %50 = vector.shape_cast %49 : vector<16xf32> to vector<16x1xf32>
    %cst_27 = arith.constant 3.200000e+01 : f32
    %51 = vector.broadcast %cst_27 : f32 to vector<16x1xf32>
    %52 = arith.divf %50, %51 : vector<16x1xf32>
    %53 = vector.broadcast %52 : vector<16x1xf32> to vector<16x32xf32>
    %54 = arith.subf %46, %53 : vector<16x32xf32>
    %55 = arith.mulf %54, %54 : vector<16x32xf32>
    %cst_28 = arith.constant dense<0.000000e+00> : vector<16xf32>
    %56 = vector.multi_reduction <add>, %55, %cst_28 [1] : vector<16x32xf32> to vector<16xf32>
    %57 = vector.shape_cast %56 : vector<16xf32> to vector<16x1xf32>
    %cst_29 = arith.constant 3.200000e+01 : f32
    %58 = vector.broadcast %cst_29 : f32 to vector<16x1xf32>
    %59 = arith.divf %57, %58 : vector<16x1xf32>
    %60 = vector.broadcast %52 : vector<16x1xf32> to vector<16x32xf32>
    %61 = arith.subf %46, %60 : vector<16x32xf32>
    %cst_30 = arith.constant 9.99999974E-6 : f32
    %62 = vector.broadcast %cst_30 : f32 to vector<16x1xf32>
    %63 = arith.addf %59, %62 : vector<16x1xf32>
    %64 = math.rsqrt %63 : vector<16x1xf32>
    %65 = vector.broadcast %64 : vector<16x1xf32> to vector<16x32xf32>
    %66 = arith.mulf %61, %65 : vector<16x32xf32>
    %67 = vector.broadcast %47 : vector<1x32xf32> to vector<16x32xf32>
    %68 = arith.mulf %66, %67 : vector<16x32xf32>
    %69 = vector.broadcast %48 : vector<1x32xf32> to vector<16x32xf32>
    %70 = arith.addf %68, %69 : vector<16x32xf32>
    %c0_31 = arith.constant 0 : index
    %c0_32 = arith.constant 0 : index
    %71 = vector.load %arg10[%c0_31, %c0_32] : memref<32x64xbf16, #tpu.memory_space<vmem>>, vector<32x64xbf16>
    %72 = arith.truncf %70 : vector<16x32xf32> to vector<16x32xbf16>
    %cst_33 = arith.constant dense<0.000000e+00> : vector<16x64xf32>
    %73 = tpu.matmul %72, %71, %cst_33 {dimension_numbers = #tpu.dot_dimension_numbers<[1], [0], [0], [1], [0, 0, 1, 1], [], []>} : vector<16x32xbf16>, vector<32x64xbf16>, vector<16x64xf32> -> vector<16x64xf32>
    %c0_34 = arith.constant 0 : index
    %c0_35 = arith.constant 0 : index
    %74 = vector.load %arg11[%c0_34, %c0_35] : memref<32x64xbf16, #tpu.memory_space<vmem>>, vector<32x64xbf16>
    %75 = arith.truncf %70 : vector<16x32xf32> to vector<16x32xbf16>
    %cst_36 = arith.constant dense<0.000000e+00> : vector<16x64xf32>
    %76 = tpu.matmul %75, %74, %cst_36 {dimension_numbers = #tpu.dot_dimension_numbers<[1], [0], [0], [1], [0, 0, 1, 1], [], []>} : vector<16x32xbf16>, vector<32x64xbf16>, vector<16x64xf32> -> vector<16x64xf32>
    %c0_37 = arith.constant 0 : index
    %c0_38 = arith.constant 0 : index
    %77 = vector.load %arg12[%c0_37, %c0_38] : memref<32x64xbf16, #tpu.memory_space<vmem>>, vector<32x64xbf16>
    %78 = arith.truncf %70 : vector<16x32xf32> to vector<16x32xbf16>
    %cst_39 = arith.constant dense<0.000000e+00> : vector<16x64xf32>
    %79 = tpu.matmul %78, %77, %cst_39 {dimension_numbers = #tpu.dot_dimension_numbers<[1], [0], [0], [1], [0, 0, 1, 1], [], []>} : vector<16x32xbf16>, vector<32x64xbf16>, vector<16x64xf32> -> vector<16x64xf32>
    %c0_40 = arith.constant 0 : index
    %c0_41 = arith.constant 0 : index
    %80 = vector.load %arg15[%c0_40, %c0_41] : memref<16x16xf32, #tpu.memory_space<vmem>>, vector<16x16xf32>
    %81 = vector.shape_cast %80 : vector<16x16xf32> to vector<1x16x16xf32>
    %c0_42 = arith.constant 0 : index
    %c0_43 = arith.constant 0 : index
    %82 = vector.load %arg16[%c0_42, %c0_43] : memref<16x16xf32, #tpu.memory_space<vmem>>, vector<16x16xf32>
    %83 = vector.shape_cast %82 : vector<16x16xf32> to vector<1x16x16xf32>
    %84 = vector.extract_strided_slice %73 {offsets = [0, 0], sizes = [16, 16], strides = [1, 1]} : vector<16x64xf32> to vector<16x16xf32>
    %85 = vector.extract_strided_slice %73 {offsets = [0, 16], sizes = [16, 16], strides = [1, 1]} : vector<16x64xf32> to vector<16x16xf32>
    %86 = vector.extract_strided_slice %73 {offsets = [0, 32], sizes = [16, 16], strides = [1, 1]} : vector<16x64xf32> to vector<16x16xf32>
    %87 = vector.extract_strided_slice %73 {offsets = [0, 48], sizes = [16, 16], strides = [1, 1]} : vector<16x64xf32> to vector<16x16xf32>
    %88 = vector.shape_cast %84 : vector<16x16xf32> to vector<1x16x16xf32>
    %89 = vector.shape_cast %85 : vector<16x16xf32> to vector<1x16x16xf32>
    %90 = vector.shape_cast %86 : vector<16x16xf32> to vector<1x16x16xf32>
    %91 = vector.shape_cast %87 : vector<16x16xf32> to vector<1x16x16xf32>
    %92 = tpu.concatenate %88, %89, %90, %91 in 0 : vector<1x16x16xf32>, vector<1x16x16xf32>, vector<1x16x16xf32>, vector<1x16x16xf32> -> vector<4x16x16xf32>
    %93 = vector.extract_strided_slice %92 {offsets = [0, 0, 0], sizes = [4, 16, 8], strides = [1, 1, 1]} : vector<4x16x16xf32> to vector<4x16x8xf32>
    %94 = vector.extract_strided_slice %92 {offsets = [0, 0, 8], sizes = [4, 16, 8], strides = [1, 1, 1]} : vector<4x16x16xf32> to vector<4x16x8xf32>
    %cst_44 = arith.constant 0.000000e+00 : f32
    %95 = vector.broadcast %cst_44 : f32 to vector<4x16x8xf32>
    %96 = arith.subf %95, %94 : vector<4x16x8xf32>
    %97 = tpu.concatenate %96, %93 in 2 : vector<4x16x8xf32>, vector<4x16x8xf32> -> vector<4x16x16xf32>
    %98 = vector.broadcast %81 : vector<1x16x16xf32> to vector<4x16x16xf32>
    %99 = arith.mulf %92, %98 : vector<4x16x16xf32>
    %100 = vector.broadcast %83 : vector<1x16x16xf32> to vector<4x16x16xf32>
    %101 = arith.mulf %97, %100 : vector<4x16x16xf32>
    %102 = arith.addf %99, %101 : vector<4x16x16xf32>
    %103 = vector.extract_strided_slice %76 {offsets = [0, 0], sizes = [16, 16], strides = [1, 1]} : vector<16x64xf32> to vector<16x16xf32>
    %104 = vector.extract_strided_slice %76 {offsets = [0, 16], sizes = [16, 16], strides = [1, 1]} : vector<16x64xf32> to vector<16x16xf32>
    %105 = vector.extract_strided_slice %76 {offsets = [0, 32], sizes = [16, 16], strides = [1, 1]} : vector<16x64xf32> to vector<16x16xf32>
    %106 = vector.extract_strided_slice %76 {offsets = [0, 48], sizes = [16, 16], strides = [1, 1]} : vector<16x64xf32> to vector<16x16xf32>
    %107 = vector.shape_cast %103 : vector<16x16xf32> to vector<1x16x16xf32>
    %108 = vector.shape_cast %104 : vector<16x16xf32> to vector<1x16x16xf32>
    %109 = vector.shape_cast %105 : vector<16x16xf32> to vector<1x16x16xf32>
    %110 = vector.shape_cast %106 : vector<16x16xf32> to vector<1x16x16xf32>
    %111 = tpu.concatenate %107, %108, %109, %110 in 0 : vector<1x16x16xf32>, vector<1x16x16xf32>, vector<1x16x16xf32>, vector<1x16x16xf32> -> vector<4x16x16xf32>
    %112 = vector.extract_strided_slice %111 {offsets = [0, 0, 0], sizes = [4, 16, 8], strides = [1, 1, 1]} : vector<4x16x16xf32> to vector<4x16x8xf32>
    %113 = vector.extract_strided_slice %111 {offsets = [0, 0, 8], sizes = [4, 16, 8], strides = [1, 1, 1]} : vector<4x16x16xf32> to vector<4x16x8xf32>
    %cst_45 = arith.constant 0.000000e+00 : f32
    %114 = vector.broadcast %cst_45 : f32 to vector<4x16x8xf32>
    %115 = arith.subf %114, %113 : vector<4x16x8xf32>
    %116 = tpu.concatenate %115, %112 in 2 : vector<4x16x8xf32>, vector<4x16x8xf32> -> vector<4x16x16xf32>
    %117 = vector.broadcast %81 : vector<1x16x16xf32> to vector<4x16x16xf32>
    %118 = arith.mulf %111, %117 : vector<4x16x16xf32>
    %119 = vector.broadcast %83 : vector<1x16x16xf32> to vector<4x16x16xf32>
    %120 = arith.mulf %116, %119 : vector<4x16x16xf32>
    %121 = arith.addf %118, %120 : vector<4x16x16xf32>
    %122 = vector.extract_strided_slice %79 {offsets = [0, 0], sizes = [16, 16], strides = [1, 1]} : vector<16x64xf32> to vector<16x16xf32>
    %123 = vector.extract_strided_slice %79 {offsets = [0, 16], sizes = [16, 16], strides = [1, 1]} : vector<16x64xf32> to vector<16x16xf32>
    %124 = vector.extract_strided_slice %79 {offsets = [0, 32], sizes = [16, 16], strides = [1, 1]} : vector<16x64xf32> to vector<16x16xf32>
    %125 = vector.extract_strided_slice %79 {offsets = [0, 48], sizes = [16, 16], strides = [1, 1]} : vector<16x64xf32> to vector<16x16xf32>
    %126 = vector.shape_cast %122 : vector<16x16xf32> to vector<1x16x16xf32>
    %127 = vector.shape_cast %123 : vector<16x16xf32> to vector<1x16x16xf32>
    %128 = vector.shape_cast %124 : vector<16x16xf32> to vector<1x16x16xf32>
    %129 = vector.shape_cast %125 : vector<16x16xf32> to vector<1x16x16xf32>
    %130 = tpu.concatenate %126, %127, %128, %129 in 0 : vector<1x16x16xf32>, vector<1x16x16xf32>, vector<1x16x16xf32>, vector<1x16x16xf32> -> vector<4x16x16xf32>
    %131 = arith.truncf %102 : vector<4x16x16xf32> to vector<4x16x16xbf16>
    %132 = arith.truncf %121 : vector<4x16x16xf32> to vector<4x16x16xbf16>
    "tpu.trace_start"() <{level = 10 : i32, message = "hnd,hmd->hnm"}> : () -> ()
    %cst_46 = arith.constant dense<0.000000e+00> : vector<4x16x16xf32>
    %133 = tpu.matmul %131, %132, %cst_46 {dimension_numbers = #tpu.dot_dimension_numbers<[2], [2], [1], [1], [0, 0, 0, 1, 1, 1], [0], [0]>} : vector<4x16x16xbf16>, vector<4x16x16xbf16>, vector<4x16x16xf32> -> vector<4x16x16xf32>
    "tpu.trace_stop"() : () -> ()
    %cst_47 = arith.constant 2.500000e-01 : f32
    %134 = vector.broadcast %cst_47 : f32 to vector<4x16x16xf32>
    %135 = arith.mulf %133, %134 : vector<4x16x16xf32>
    %cst_48 = arith.constant dense<0xFF800000> : vector<4x16xf32>
    %136 = vector.multi_reduction <maximumf>, %135, %cst_48 [2] : vector<4x16x16xf32> to vector<4x16xf32>
    %137 = vector.shape_cast %136 : vector<4x16xf32> to vector<4x16x1xf32>
    %138 = vector.broadcast %137 : vector<4x16x1xf32> to vector<4x16x16xf32>
    %139 = arith.subf %135, %138 : vector<4x16x16xf32>
    %140 = math.exp %139 : vector<4x16x16xf32>
    %cst_49 = arith.constant dense<0.000000e+00> : vector<4x16xf32>
    %141 = vector.multi_reduction <add>, %140, %cst_49 [2] : vector<4x16x16xf32> to vector<4x16xf32>
    %142 = vector.shape_cast %141 : vector<4x16xf32> to vector<4x16x1xf32>
    %143 = tpu.reciprocal %142 {approx = true} : vector<4x16x1xf32> -> vector<4x16x1xf32>
    %144 = vector.broadcast %143 : vector<4x16x1xf32> to vector<4x16x16xf32>
    %145 = arith.mulf %140, %144 : vector<4x16x16xf32>
    %146 = arith.truncf %145 : vector<4x16x16xf32> to vector<4x16x16xbf16>
    %147 = arith.truncf %130 : vector<4x16x16xf32> to vector<4x16x16xbf16>
    "tpu.trace_start"() <{level = 10 : i32, message = "hnm,hmd->hnd"}> : () -> ()
    %cst_50 = arith.constant dense<0.000000e+00> : vector<4x16x16xf32>
    %148 = tpu.matmul %146, %147, %cst_50 {dimension_numbers = #tpu.dot_dimension_numbers<[2], [1], [1], [2], [0, 0, 0, 1, 1, 2], [0], [0]>} : vector<4x16x16xbf16>, vector<4x16x16xbf16>, vector<4x16x16xf32> -> vector<4x16x16xf32>
    "tpu.trace_stop"() : () -> ()
    %149 = vector.extract_strided_slice %148 {offsets = [0, 0, 0], sizes = [1, 16, 16], strides = [1, 1, 1]} : vector<4x16x16xf32> to vector<1x16x16xf32>
    %150 = vector.shape_cast %149 : vector<1x16x16xf32> to vector<16x16xf32>
    %151 = vector.extract_strided_slice %148 {offsets = [1, 0, 0], sizes = [1, 16, 16], strides = [1, 1, 1]} : vector<4x16x16xf32> to vector<1x16x16xf32>
    %152 = vector.shape_cast %151 : vector<1x16x16xf32> to vector<16x16xf32>
    %153 = vector.extract_strided_slice %148 {offsets = [2, 0, 0], sizes = [1, 16, 16], strides = [1, 1, 1]} : vector<4x16x16xf32> to vector<1x16x16xf32>
    %154 = vector.shape_cast %153 : vector<1x16x16xf32> to vector<16x16xf32>
    %155 = vector.extract_strided_slice %148 {offsets = [3, 0, 0], sizes = [1, 16, 16], strides = [1, 1, 1]} : vector<4x16x16xf32> to vector<1x16x16xf32>
    %156 = vector.shape_cast %155 : vector<1x16x16xf32> to vector<16x16xf32>
    %157 = tpu.concatenate %150, %152, %154, %156 in 1 : vector<16x16xf32>, vector<16x16xf32>, vector<16x16xf32>, vector<16x16xf32> -> vector<16x64xf32>
    %c0_51 = arith.constant 0 : index
    %c0_52 = arith.constant 0 : index
    %158 = vector.load %arg13[%c0_51, %c0_52] : memref<64x32xbf16, #tpu.memory_space<vmem>>, vector<64x32xbf16>
    %159 = arith.truncf %157 : vector<16x64xf32> to vector<16x64xbf16>
    %cst_53 = arith.constant dense<0.000000e+00> : vector<16x32xf32>
    %160 = tpu.matmul %159, %158, %cst_53 {dimension_numbers = #tpu.dot_dimension_numbers<[1], [0], [0], [1], [0, 0, 1, 1], [], []>} : vector<16x64xbf16>, vector<64x32xbf16>, vector<16x32xf32> -> vector<16x32xf32>
    %161 = arith.addf %46, %160 : vector<16x32xf32>
    %c0_54 = arith.constant 0 : index
    %c0_55 = arith.constant 0 : index
    %162 = vector.load %arg14[%c0_54, %c0_55] : memref<1x32xf32, #tpu.memory_space<vmem>>, vector<1x32xf32>
    %163 = vector.broadcast %162 : vector<1x32xf32> to vector<16x32xf32>
    %164 = arith.addf %161, %163 : vector<16x32xf32>
    %c0_56 = arith.constant 0 : index
    %c0_57 = arith.constant 0 : index
    %165 = vector.load %arg17[%c0_56, %c0_57] : memref<1x32xf32, #tpu.memory_space<vmem>>, vector<1x32xf32>
    %c0_58 = arith.constant 0 : index
    %c0_59 = arith.constant 0 : index
    %166 = vector.load %arg18[%c0_58, %c0_59] : memref<1x32xf32, #tpu.memory_space<vmem>>, vector<1x32xf32>
    %cst_60 = arith.constant dense<0.000000e+00> : vector<16xf32>
    %167 = vector.multi_reduction <add>, %164, %cst_60 [1] : vector<16x32xf32> to vector<16xf32>
    %168 = vector.shape_cast %167 : vector<16xf32> to vector<16x1xf32>
    %cst_61 = arith.constant 3.200000e+01 : f32
    %169 = vector.broadcast %cst_61 : f32 to vector<16x1xf32>
    %170 = arith.divf %168, %169 : vector<16x1xf32>
    %171 = vector.broadcast %170 : vector<16x1xf32> to vector<16x32xf32>
    %172 = arith.subf %164, %171 : vector<16x32xf32>
    %173 = arith.mulf %172, %172 : vector<16x32xf32>
    %cst_62 = arith.constant dense<0.000000e+00> : vector<16xf32>
    %174 = vector.multi_reduction <add>, %173, %cst_62 [1] : vector<16x32xf32> to vector<16xf32>
    %175 = vector.shape_cast %174 : vector<16xf32> to vector<16x1xf32>
    %cst_63 = arith.constant 3.200000e+01 : f32
    %176 = vector.broadcast %cst_63 : f32 to vector<16x1xf32>
    %177 = arith.divf %175, %176 : vector<16x1xf32>
    %178 = vector.broadcast %170 : vector<16x1xf32> to vector<16x32xf32>
    %179 = arith.subf %164, %178 : vector<16x32xf32>
    %cst_64 = arith.constant 9.99999974E-6 : f32
    %180 = vector.broadcast %cst_64 : f32 to vector<16x1xf32>
    %181 = arith.addf %177, %180 : vector<16x1xf32>
    %182 = math.rsqrt %181 : vector<16x1xf32>
    %183 = vector.broadcast %182 : vector<16x1xf32> to vector<16x32xf32>
    %184 = arith.mulf %179, %183 : vector<16x32xf32>
    %185 = vector.broadcast %165 : vector<1x32xf32> to vector<16x32xf32>
    %186 = arith.mulf %184, %185 : vector<16x32xf32>
    %187 = vector.broadcast %166 : vector<1x32xf32> to vector<16x32xf32>
    %188 = arith.addf %186, %187 : vector<16x32xf32>
    %c0_65 = arith.constant 0 : index
    %c0_66 = arith.constant 0 : index
    %189 = vector.load %arg19[%c0_65, %c0_66] : memref<32x64xbf16, #tpu.memory_space<vmem>>, vector<32x64xbf16>
    %190 = arith.truncf %188 : vector<16x32xf32> to vector<16x32xbf16>
    %cst_67 = arith.constant dense<0.000000e+00> : vector<16x64xf32>
    %191 = tpu.matmul %190, %189, %cst_67 {dimension_numbers = #tpu.dot_dimension_numbers<[1], [0], [0], [1], [0, 0, 1, 1], [], []>} : vector<16x32xbf16>, vector<32x64xbf16>, vector<16x64xf32> -> vector<16x64xf32>
    %c0_68 = arith.constant 0 : index
    %c0_69 = arith.constant 0 : index
    %192 = vector.load %arg20[%c0_68, %c0_69] : memref<1x64xf32, #tpu.memory_space<vmem>>, vector<1x64xf32>
    %193 = vector.broadcast %192 : vector<1x64xf32> to vector<16x64xf32>
    %194 = arith.addf %191, %193 : vector<16x64xf32>
    %c0_70 = arith.constant 0 : index
    %c0_71 = arith.constant 0 : index
    %195 = vector.load %arg21[%c0_70, %c0_71] : memref<32x64xbf16, #tpu.memory_space<vmem>>, vector<32x64xbf16>
    %196 = arith.truncf %188 : vector<16x32xf32> to vector<16x32xbf16>
    %cst_72 = arith.constant dense<0.000000e+00> : vector<16x64xf32>
    %197 = tpu.matmul %196, %195, %cst_72 {dimension_numbers = #tpu.dot_dimension_numbers<[1], [0], [0], [1], [0, 0, 1, 1], [], []>} : vector<16x32xbf16>, vector<32x64xbf16>, vector<16x64xf32> -> vector<16x64xf32>
    %c0_73 = arith.constant 0 : index
    %c0_74 = arith.constant 0 : index
    %198 = vector.load %arg22[%c0_73, %c0_74] : memref<1x64xf32, #tpu.memory_space<vmem>>, vector<1x64xf32>
    %199 = vector.broadcast %198 : vector<1x64xf32> to vector<16x64xf32>
    %200 = arith.addf %197, %199 : vector<16x64xf32>
    %201 = arith.negf %200 : vector<16x64xf32>
    %202 = math.exp %201 : vector<16x64xf32>
    %cst_75 = arith.constant 1.000000e+00 : f32
    %203 = vector.broadcast %cst_75 : f32 to vector<16x64xf32>
    %204 = arith.addf %203, %202 : vector<16x64xf32>
    %205 = arith.divf %203, %204 : vector<16x64xf32>
    %206 = arith.mulf %194, %205 : vector<16x64xf32>
    %c0_76 = arith.constant 0 : index
    %c0_77 = arith.constant 0 : index
    %c0_78 = arith.constant 0 : index
    %207 = vector.load %arg23[%c0_76, %c0_77, %c0_78] : memref<7x1x64xf32, #tpu.memory_space<vmem>>, vector<7x1x64xf32>
    %208 = tpu.iota {dimensions = array<i32: 0>} : vector<16x64xi32>
    %c0_79 = arith.constant 0 : index
    %c0_80 = arith.constant 0 : index
    %209 = vector.load %arg24[%c0_79, %c0_80] : memref<1x64xf32, #tpu.memory_space<vmem>>, vector<1x64xf32>
    %210 = vector.shape_cast %209 : vector<1x64xf32> to vector<1x64xf32>
    %211 = vector.broadcast %210 : vector<1x64xf32> to vector<16x64xf32>
    %c3_i32 = arith.constant 3 : i32
    %212 = tpu.dynamic_rotate %206 by %c3_i32 dim 0 : vector<16x64xf32>, i32 -> vector<16x64xf32>
    %c3_i32_81 = arith.constant 3 : i32
    %213 = vector.broadcast %c3_i32_81 : i32 to vector<16x64xi32>
    %214 = arith.cmpi sge, %208, %213 : vector<16x64xi32>
    %cst_82 = arith.constant 0.000000e+00 : f32
    %215 = vector.broadcast %cst_82 : f32 to vector<16x64xf32>
    %216 = arith.select %214, %212, %215 : vector<16x64xi1>, vector<16x64xf32>
    %217 = vector.extract_strided_slice %207 {offsets = [0, 0, 0], sizes = [1, 1, 64], strides = [1, 1, 1]} : vector<7x1x64xf32> to vector<1x1x64xf32>
    %218 = vector.shape_cast %217 : vector<1x1x64xf32> to vector<1x64xf32>
    %219 = vector.broadcast %218 : vector<1x64xf32> to vector<16x64xf32>
    %220 = arith.mulf %216, %219 : vector<16x64xf32>
    %221 = arith.addf %211, %220 : vector<16x64xf32>
    %c2_i32 = arith.constant 2 : i32
    %222 = tpu.dynamic_rotate %206 by %c2_i32 dim 0 : vector<16x64xf32>, i32 -> vector<16x64xf32>
    %c2_i32_83 = arith.constant 2 : i32
    %223 = vector.broadcast %c2_i32_83 : i32 to vector<16x64xi32>
    %224 = arith.cmpi sge, %208, %223 : vector<16x64xi32>
    %cst_84 = arith.constant 0.000000e+00 : f32
    %225 = vector.broadcast %cst_84 : f32 to vector<16x64xf32>
    %226 = arith.select %224, %222, %225 : vector<16x64xi1>, vector<16x64xf32>
    %227 = vector.extract_strided_slice %207 {offsets = [1, 0, 0], sizes = [1, 1, 64], strides = [1, 1, 1]} : vector<7x1x64xf32> to vector<1x1x64xf32>
    %228 = vector.shape_cast %227 : vector<1x1x64xf32> to vector<1x64xf32>
    %229 = vector.broadcast %228 : vector<1x64xf32> to vector<16x64xf32>
    %230 = arith.mulf %226, %229 : vector<16x64xf32>
    %231 = arith.addf %221, %230 : vector<16x64xf32>
    %c1_i32 = arith.constant 1 : i32
    %232 = tpu.dynamic_rotate %206 by %c1_i32 dim 0 : vector<16x64xf32>, i32 -> vector<16x64xf32>
    %c1_i32_85 = arith.constant 1 : i32
    %233 = vector.broadcast %c1_i32_85 : i32 to vector<16x64xi32>
    %234 = arith.cmpi sge, %208, %233 : vector<16x64xi32>
    %cst_86 = arith.constant 0.000000e+00 : f32
    %235 = vector.broadcast %cst_86 : f32 to vector<16x64xf32>
    %236 = arith.select %234, %232, %235 : vector<16x64xi1>, vector<16x64xf32>
    %237 = vector.extract_strided_slice %207 {offsets = [2, 0, 0], sizes = [1, 1, 64], strides = [1, 1, 1]} : vector<7x1x64xf32> to vector<1x1x64xf32>
    %238 = vector.shape_cast %237 : vector<1x1x64xf32> to vector<1x64xf32>
    %239 = vector.broadcast %238 : vector<1x64xf32> to vector<16x64xf32>
    %240 = arith.mulf %236, %239 : vector<16x64xf32>
    %241 = arith.addf %231, %240 : vector<16x64xf32>
    %242 = vector.extract_strided_slice %207 {offsets = [3, 0, 0], sizes = [1, 1, 64], strides = [1, 1, 1]} : vector<7x1x64xf32> to vector<1x1x64xf32>
    %243 = vector.shape_cast %242 : vector<1x1x64xf32> to vector<1x64xf32>
    %244 = vector.broadcast %243 : vector<1x64xf32> to vector<16x64xf32>
    %245 = arith.mulf %206, %244 : vector<16x64xf32>
    %246 = arith.addf %241, %245 : vector<16x64xf32>
    %c15_i32 = arith.constant 15 : i32
    %247 = tpu.dynamic_rotate %206 by %c15_i32 dim 0 : vector<16x64xf32>, i32 -> vector<16x64xf32>
    %c15_i32_87 = arith.constant 15 : i32
    %248 = vector.broadcast %c15_i32_87 : i32 to vector<16x64xi32>
    %249 = arith.cmpi slt, %208, %248 : vector<16x64xi32>
    %cst_88 = arith.constant 0.000000e+00 : f32
    %250 = vector.broadcast %cst_88 : f32 to vector<16x64xf32>
    %251 = arith.select %249, %247, %250 : vector<16x64xi1>, vector<16x64xf32>
    %252 = vector.extract_strided_slice %207 {offsets = [4, 0, 0], sizes = [1, 1, 64], strides = [1, 1, 1]} : vector<7x1x64xf32> to vector<1x1x64xf32>
    %253 = vector.shape_cast %252 : vector<1x1x64xf32> to vector<1x64xf32>
    %254 = vector.broadcast %253 : vector<1x64xf32> to vector<16x64xf32>
    %255 = arith.mulf %251, %254 : vector<16x64xf32>
    %256 = arith.addf %246, %255 : vector<16x64xf32>
    %c14_i32 = arith.constant 14 : i32
    %257 = tpu.dynamic_rotate %206 by %c14_i32 dim 0 : vector<16x64xf32>, i32 -> vector<16x64xf32>
    %c14_i32_89 = arith.constant 14 : i32
    %258 = vector.broadcast %c14_i32_89 : i32 to vector<16x64xi32>
    %259 = arith.cmpi slt, %208, %258 : vector<16x64xi32>
    %cst_90 = arith.constant 0.000000e+00 : f32
    %260 = vector.broadcast %cst_90 : f32 to vector<16x64xf32>
    %261 = arith.select %259, %257, %260 : vector<16x64xi1>, vector<16x64xf32>
    %262 = vector.extract_strided_slice %207 {offsets = [5, 0, 0], sizes = [1, 1, 64], strides = [1, 1, 1]} : vector<7x1x64xf32> to vector<1x1x64xf32>
    %263 = vector.shape_cast %262 : vector<1x1x64xf32> to vector<1x64xf32>
    %264 = vector.broadcast %263 : vector<1x64xf32> to vector<16x64xf32>
    %265 = arith.mulf %261, %264 : vector<16x64xf32>
    %266 = arith.addf %256, %265 : vector<16x64xf32>
    %c13_i32 = arith.constant 13 : i32
    %267 = tpu.dynamic_rotate %206 by %c13_i32 dim 0 : vector<16x64xf32>, i32 -> vector<16x64xf32>
    %c13_i32_91 = arith.constant 13 : i32
    %268 = vector.broadcast %c13_i32_91 : i32 to vector<16x64xi32>
    %269 = arith.cmpi slt, %208, %268 : vector<16x64xi32>
    %cst_92 = arith.constant 0.000000e+00 : f32
    %270 = vector.broadcast %cst_92 : f32 to vector<16x64xf32>
    %271 = arith.select %269, %267, %270 : vector<16x64xi1>, vector<16x64xf32>
    %272 = vector.extract_strided_slice %207 {offsets = [6, 0, 0], sizes = [1, 1, 64], strides = [1, 1, 1]} : vector<7x1x64xf32> to vector<1x1x64xf32>
    %273 = vector.shape_cast %272 : vector<1x1x64xf32> to vector<1x64xf32>
    %274 = vector.broadcast %273 : vector<1x64xf32> to vector<16x64xf32>
    %275 = arith.mulf %271, %274 : vector<16x64xf32>
    %276 = arith.addf %266, %275 : vector<16x64xf32>
    %277 = arith.negf %276 : vector<16x64xf32>
    %278 = math.exp %277 : vector<16x64xf32>
    %cst_93 = arith.constant 1.000000e+00 : f32
    %279 = vector.broadcast %cst_93 : f32 to vector<16x64xf32>
    %280 = arith.addf %279, %278 : vector<16x64xf32>
    %281 = arith.divf %279, %280 : vector<16x64xf32>
    %282 = arith.mulf %276, %281 : vector<16x64xf32>
    %cst_94 = arith.constant dense<0.000000e+00> : vector<16xf32>
    %283 = vector.multi_reduction <add>, %282, %cst_94 [1] : vector<16x64xf32> to vector<16xf32>
    %284 = vector.shape_cast %283 : vector<16xf32> to vector<16x1xf32>
    %cst_95 = arith.constant 6.400000e+01 : f32
    %285 = vector.broadcast %cst_95 : f32 to vector<16x1xf32>
    %286 = arith.divf %284, %285 : vector<16x1xf32>
    %287 = vector.broadcast %286 : vector<16x1xf32> to vector<16x64xf32>
    %288 = arith.subf %282, %287 : vector<16x64xf32>
    %289 = arith.mulf %288, %288 : vector<16x64xf32>
    %cst_96 = arith.constant dense<0.000000e+00> : vector<16xf32>
    %290 = vector.multi_reduction <add>, %289, %cst_96 [1] : vector<16x64xf32> to vector<16xf32>
    %291 = vector.shape_cast %290 : vector<16xf32> to vector<16x1xf32>
    %cst_97 = arith.constant 6.400000e+01 : f32
    %292 = vector.broadcast %cst_97 : f32 to vector<16x1xf32>
    %293 = arith.divf %291, %292 : vector<16x1xf32>
    %294 = vector.broadcast %286 : vector<16x1xf32> to vector<16x64xf32>
    %295 = arith.subf %282, %294 : vector<16x64xf32>
    %cst_98 = arith.constant 9.99999997E-7 : f32
    %296 = vector.broadcast %cst_98 : f32 to vector<16x1xf32>
    %297 = arith.maximumf %293, %296 : vector<16x1xf32>
    %298 = math.rsqrt %297 : vector<16x1xf32>
    %299 = vector.broadcast %298 : vector<16x1xf32> to vector<16x64xf32>
    %300 = arith.mulf %295, %299 : vector<16x64xf32>
    %c0_99 = arith.constant 0 : index
    %c0_100 = arith.constant 0 : index
    %301 = vector.load %arg25[%c0_99, %c0_100] : memref<1x64xf32, #tpu.memory_space<vmem>>, vector<1x64xf32>
    %302 = vector.broadcast %301 : vector<1x64xf32> to vector<16x64xf32>
    %303 = arith.mulf %300, %302 : vector<16x64xf32>
    %c0_101 = arith.constant 0 : index
    %c0_102 = arith.constant 0 : index
    %304 = vector.load %arg26[%c0_101, %c0_102] : memref<64x32xbf16, #tpu.memory_space<vmem>>, vector<64x32xbf16>
    %305 = arith.truncf %303 : vector<16x64xf32> to vector<16x64xbf16>
    %cst_103 = arith.constant dense<0.000000e+00> : vector<16x32xf32>
    %306 = tpu.matmul %305, %304, %cst_103 {dimension_numbers = #tpu.dot_dimension_numbers<[1], [0], [0], [1], [0, 0, 1, 1], [], []>} : vector<16x64xbf16>, vector<64x32xbf16>, vector<16x32xf32> -> vector<16x32xf32>
    %307 = arith.addf %164, %306 : vector<16x32xf32>
    %c0_104 = arith.constant 0 : index
    %c0_105 = arith.constant 0 : index
    %308 = vector.load %arg27[%c0_104, %c0_105] : memref<1x32xf32, #tpu.memory_space<vmem>>, vector<1x32xf32>
    %309 = vector.broadcast %308 : vector<1x32xf32> to vector<16x32xf32>
    %310 = arith.addf %307, %309 : vector<16x32xf32>
    %c0_106 = arith.constant 0 : index
    %c0_107 = arith.constant 0 : index
    %311 = vector.load %arg28[%c0_106, %c0_107] : memref<1x32xf32, #tpu.memory_space<vmem>>, vector<1x32xf32>
    %c0_108 = arith.constant 0 : index
    %c0_109 = arith.constant 0 : index
    %312 = vector.load %arg29[%c0_108, %c0_109] : memref<1x32xf32, #tpu.memory_space<vmem>>, vector<1x32xf32>
    %cst_110 = arith.constant dense<0.000000e+00> : vector<16xf32>
    %313 = vector.multi_reduction <add>, %310, %cst_110 [1] : vector<16x32xf32> to vector<16xf32>
    %314 = vector.shape_cast %313 : vector<16xf32> to vector<16x1xf32>
    %cst_111 = arith.constant 3.200000e+01 : f32
    %315 = vector.broadcast %cst_111 : f32 to vector<16x1xf32>
    %316 = arith.divf %314, %315 : vector<16x1xf32>
    %317 = vector.broadcast %316 : vector<16x1xf32> to vector<16x32xf32>
    %318 = arith.subf %310, %317 : vector<16x32xf32>
    %319 = arith.mulf %318, %318 : vector<16x32xf32>
    %cst_112 = arith.constant dense<0.000000e+00> : vector<16xf32>
    %320 = vector.multi_reduction <add>, %319, %cst_112 [1] : vector<16x32xf32> to vector<16xf32>
    %321 = vector.shape_cast %320 : vector<16xf32> to vector<16x1xf32>
    %cst_113 = arith.constant 3.200000e+01 : f32
    %322 = vector.broadcast %cst_113 : f32 to vector<16x1xf32>
    %323 = arith.divf %321, %322 : vector<16x1xf32>
    %324 = vector.broadcast %316 : vector<16x1xf32> to vector<16x32xf32>
    %325 = arith.subf %310, %324 : vector<16x32xf32>
    %cst_114 = arith.constant 9.99999974E-6 : f32
    %326 = vector.broadcast %cst_114 : f32 to vector<16x1xf32>
    %327 = arith.addf %323, %326 : vector<16x1xf32>
    %328 = math.rsqrt %327 : vector<16x1xf32>
    %329 = vector.broadcast %328 : vector<16x1xf32> to vector<16x32xf32>
    %330 = arith.mulf %325, %329 : vector<16x32xf32>
    %331 = vector.broadcast %311 : vector<1x32xf32> to vector<16x32xf32>
    %332 = arith.mulf %330, %331 : vector<16x32xf32>
    %333 = vector.broadcast %312 : vector<1x32xf32> to vector<16x32xf32>
    %334 = arith.addf %332, %333 : vector<16x32xf32>
    %c0_115 = arith.constant 0 : index
    %c0_116 = arith.constant 0 : index
    %335 = vector.load %arg30[%c0_115, %c0_116] : memref<32x128xbf16, #tpu.memory_space<vmem>>, vector<32x128xbf16>
    %336 = arith.truncf %334 : vector<16x32xf32> to vector<16x32xbf16>
    %cst_117 = arith.constant dense<0.000000e+00> : vector<16x128xf32>
    %337 = tpu.matmul %336, %335, %cst_117 {dimension_numbers = #tpu.dot_dimension_numbers<[1], [0], [0], [1], [0, 0, 1, 1], [], []>} : vector<16x32xbf16>, vector<32x128xbf16>, vector<16x128xf32> -> vector<16x128xf32>
    %c0_118 = arith.constant 0 : index
    %c0_119 = arith.constant 0 : index
    %338 = vector.load %arg31[%c0_118, %c0_119] : memref<1x128xf32, #tpu.memory_space<vmem>>, vector<1x128xf32>
    %339 = vector.broadcast %338 : vector<1x128xf32> to vector<16x128xf32>
    %340 = arith.addf %337, %339 : vector<16x128xf32>
    %341 = arith.negf %340 : vector<16x128xf32>
    %342 = math.exp %341 : vector<16x128xf32>
    %cst_120 = arith.constant 1.000000e+00 : f32
    %343 = vector.broadcast %cst_120 : f32 to vector<16x128xf32>
    %344 = arith.addf %343, %342 : vector<16x128xf32>
    %345 = arith.divf %343, %344 : vector<16x128xf32>
    %346 = arith.mulf %340, %345 : vector<16x128xf32>
    %c0_121 = arith.constant 0 : index
    %c0_122 = arith.constant 0 : index
    %347 = vector.load %arg32[%c0_121, %c0_122] : memref<128x32xbf16, #tpu.memory_space<vmem>>, vector<128x32xbf16>
    %348 = arith.truncf %346 : vector<16x128xf32> to vector<16x128xbf16>
    %cst_123 = arith.constant dense<0.000000e+00> : vector<16x32xf32>
    %349 = tpu.matmul %348, %347, %cst_123 {dimension_numbers = #tpu.dot_dimension_numbers<[1], [0], [0], [1], [0, 0, 1, 1], [], []>} : vector<16x128xbf16>, vector<128x32xbf16>, vector<16x32xf32> -> vector<16x32xf32>
    %c0_124 = arith.constant 0 : index
    %c0_125 = arith.constant 0 : index
    %350 = vector.load %arg33[%c0_124, %c0_125] : memref<1x32xf32, #tpu.memory_space<vmem>>, vector<1x32xf32>
    %351 = vector.broadcast %350 : vector<1x32xf32> to vector<16x32xf32>
    %352 = arith.addf %349, %351 : vector<16x32xf32>
    %cst_126 = arith.constant 5.000000e-01 : f32
    %353 = vector.broadcast %cst_126 : f32 to vector<16x32xf32>
    %354 = arith.mulf %353, %352 : vector<16x32xf32>
    %355 = arith.addf %310, %354 : vector<16x32xf32>
    %c0_127 = arith.constant 0 : index
    %c0_128 = arith.constant 0 : index
    %356 = vector.load %arg34[%c0_127, %c0_128] : memref<1x32xf32, #tpu.memory_space<vmem>>, vector<1x32xf32>
    %c0_129 = arith.constant 0 : index
    %c0_130 = arith.constant 0 : index
    %357 = vector.load %arg35[%c0_129, %c0_130] : memref<1x32xf32, #tpu.memory_space<vmem>>, vector<1x32xf32>
    %cst_131 = arith.constant dense<0.000000e+00> : vector<16xf32>
    %358 = vector.multi_reduction <add>, %355, %cst_131 [1] : vector<16x32xf32> to vector<16xf32>
    %359 = vector.shape_cast %358 : vector<16xf32> to vector<16x1xf32>
    %cst_132 = arith.constant 3.200000e+01 : f32
    %360 = vector.broadcast %cst_132 : f32 to vector<16x1xf32>
    %361 = arith.divf %359, %360 : vector<16x1xf32>
    %362 = vector.broadcast %361 : vector<16x1xf32> to vector<16x32xf32>
    %363 = arith.subf %355, %362 : vector<16x32xf32>
    %364 = arith.mulf %363, %363 : vector<16x32xf32>
    %cst_133 = arith.constant dense<0.000000e+00> : vector<16xf32>
    %365 = vector.multi_reduction <add>, %364, %cst_133 [1] : vector<16x32xf32> to vector<16xf32>
    %366 = vector.shape_cast %365 : vector<16xf32> to vector<16x1xf32>
    %cst_134 = arith.constant 3.200000e+01 : f32
    %367 = vector.broadcast %cst_134 : f32 to vector<16x1xf32>
    %368 = arith.divf %366, %367 : vector<16x1xf32>
    %369 = vector.broadcast %361 : vector<16x1xf32> to vector<16x32xf32>
    %370 = arith.subf %355, %369 : vector<16x32xf32>
    %cst_135 = arith.constant 9.99999974E-6 : f32
    %371 = vector.broadcast %cst_135 : f32 to vector<16x1xf32>
    %372 = arith.addf %368, %371 : vector<16x1xf32>
    %373 = math.rsqrt %372 : vector<16x1xf32>
    %374 = vector.broadcast %373 : vector<16x1xf32> to vector<16x32xf32>
    %375 = arith.mulf %370, %374 : vector<16x32xf32>
    %376 = vector.broadcast %356 : vector<1x32xf32> to vector<16x32xf32>
    %377 = arith.mulf %375, %376 : vector<16x32xf32>
    %378 = vector.broadcast %357 : vector<1x32xf32> to vector<16x32xf32>
    %379 = arith.addf %377, %378 : vector<16x32xf32>
    %c0_136 = arith.constant 0 : index
    %c0_137 = arith.constant 0 : index
    %c0_138 = arith.constant 0 : index
    %380 = vector.load %arg36[%c0_136, %c0_137, %c0_138] : memref<1x16x32xf32, #tpu.memory_space<vmem>>, vector<1x16x32xf32>
    %381 = vector.shape_cast %380 : vector<1x16x32xf32> to vector<16x32xf32>
    %382 = vector.shape_cast %379 : vector<16x32xf32> to vector<1x16x32xf32>
    tpu.vector_store %arg36[%c0_136, %c0_137, %c0_138], %382 {strides = array<i32>} : memref<1x16x32xf32, #tpu.memory_space<vmem>>, vector<1x16x32xf32>,
    return
  }
  func.func @transform_0(%arg0: i32) -> (i32, i32, i32) {
    %c0_i32 = arith.constant 0 : i32
    %c0_i32_0 = arith.constant 0 : i32
    %c0_i32_1 = arith.constant 0 : i32
    return %arg0, %c0_i32, %c0_i32_0 : i32, i32, i32
  }
  func.func @transform_1(%arg0: i32) -> (i32, i32) {
    %c0_i32 = arith.constant 0 : i32
    %c0_i32_0 = arith.constant 0 : i32
    %c0_i32_1 = arith.constant 0 : i32
    return %c0_i32, %c0_i32_0 : i32, i32
  }
  func.func @transform_2(%arg0: i32) -> (i32, i32) {
    %c0_i32 = arith.constant 0 : i32
    %c0_i32_0 = arith.constant 0 : i32
    %c0_i32_1 = arith.constant 0 : i32
    return %c0_i32, %c0_i32_0 : i32, i32
  }
  func.func @transform_3(%arg0: i32) -> (i32, i32) {
    %c0_i32 = arith.constant 0 : i32
    %c0_i32_0 = arith.constant 0 : i32
    %c0_i32_1 = arith.constant 0 : i32
    return %c0_i32, %c0_i32_0 : i32, i32
  }
  func.func @transform_4(%arg0: i32) -> (i32, i32) {
    %c0_i32 = arith.constant 0 : i32
    %c0_i32_0 = arith.constant 0 : i32
    %c0_i32_1 = arith.constant 0 : i32
    return %c0_i32, %c0_i32_0 : i32, i32
  }
  func.func @transform_5(%arg0: i32) -> (i32, i32) {
    %c0_i32 = arith.constant 0 : i32
    %c0_i32_0 = arith.constant 0 : i32
    %c0_i32_1 = arith.constant 0 : i32
    return %c0_i32, %c0_i32_0 : i32, i32
  }
  func.func @transform_6(%arg0: i32) -> (i32, i32) {
    %c0_i32 = arith.constant 0 : i32
    %c0_i32_0 = arith.constant 0 : i32
    %c0_i32_1 = arith.constant 0 : i32
    return %c0_i32, %c0_i32_0 : i32, i32
  }
  func.func @transform_7(%arg0: i32) -> (i32, i32) {
    %c0_i32 = arith.constant 0 : i32
    %c0_i32_0 = arith.constant 0 : i32
    %c0_i32_1 = arith.constant 0 : i32
    return %c0_i32, %c0_i32_0 : i32, i32
  }
  func.func @transform_8(%arg0: i32) -> (i32, i32) {
    %c0_i32 = arith.constant 0 : i32
    %c0_i32_0 = arith.constant 0 : i32
    %c0_i32_1 = arith.constant 0 : i32
    return %c0_i32, %c0_i32_0 : i32, i32
  }
  func.func @transform_9(%arg0: i32) -> (i32, i32) {
    %c0_i32 = arith.constant 0 : i32
    %c0_i32_0 = arith.constant 0 : i32
    %c0_i32_1 = arith.constant 0 : i32
    return %c0_i32, %c0_i32_0 : i32, i32
  }
  func.func @transform_10(%arg0: i32) -> (i32, i32) {
    %c0_i32 = arith.constant 0 : i32
    %c0_i32_0 = arith.constant 0 : i32
    %c0_i32_1 = arith.constant 0 : i32
    return %c0_i32, %c0_i32_0 : i32, i32
  }
  func.func @transform_11(%arg0: i32) -> (i32, i32) {
    %c0_i32 = arith.constant 0 : i32
    %c0_i32_0 = arith.constant 0 : i32
    %c0_i32_1 = arith.constant 0 : i32
    return %c0_i32, %c0_i32_0 : i32, i32
  }
  func.func @transform_12(%arg0: i32) -> (i32, i32) {
    %c0_i32 = arith.constant 0 : i32
    %c0_i32_0 = arith.constant 0 : i32
    %c0_i32_1 = arith.constant 0 : i32
    return %c0_i32, %c0_i32_0 : i32, i32
  }
  func.func @transform_13(%arg0: i32) -> (i32, i32) {
    %c0_i32 = arith.constant 0 : i32
    %c0_i32_0 = arith.constant 0 : i32
    %c0_i32_1 = arith.constant 0 : i32
    return %c0_i32, %c0_i32_0 : i32, i32
  }
  func.func @transform_14(%arg0: i32) -> (i32, i32) {
    %c0_i32 = arith.constant 0 : i32
    %c0_i32_0 = arith.constant 0 : i32
    %c0_i32_1 = arith.constant 0 : i32
    return %c0_i32, %c0_i32_0 : i32, i32
  }
  func.func @transform_15(%arg0: i32) -> (i32, i32) {
    %c0_i32 = arith.constant 0 : i32
    %c0_i32_0 = arith.constant 0 : i32
    %c0_i32_1 = arith.constant 0 : i32
    return %c0_i32, %c0_i32_0 : i32, i32
  }
  func.func @transform_16(%arg0: i32) -> (i32, i32) {
    %c0_i32 = arith.constant 0 : i32
    %c0_i32_0 = arith.constant 0 : i32
    %c0_i32_1 = arith.constant 0 : i32
    return %c0_i32, %c0_i32_0 : i32, i32
  }
  func.func @transform_17(%arg0: i32) -> (i32, i32) {
    %c0_i32 = arith.constant 0 : i32
    %c0_i32_0 = arith.constant 0 : i32
    %c0_i32_1 = arith.constant 0 : i32
    return %c0_i32, %c0_i32_0 : i32, i32
  }
  func.func @transform_18(%arg0: i32) -> (i32, i32) {
    %c0_i32 = arith.constant 0 : i32
    %c0_i32_0 = arith.constant 0 : i32
    %c0_i32_1 = arith.constant 0 : i32
    return %c0_i32, %c0_i32_0 : i32, i32
  }
  func.func @transform_19(%arg0: i32) -> (i32, i32) {
    %c0_i32 = arith.constant 0 : i32
    %c0_i32_0 = arith.constant 0 : i32
    %c0_i32_1 = arith.constant 0 : i32
    return %c0_i32, %c0_i32_0 : i32, i32
  }
  func.func @transform_20(%arg0: i32) -> (i32, i32) {
    %c0_i32 = arith.constant 0 : i32
    %c0_i32_0 = arith.constant 0 : i32
    %c0_i32_1 = arith.constant 0 : i32
    return %c0_i32, %c0_i32_0 : i32, i32
  }
  func.func @transform_21(%arg0: i32) -> (i32, i32) {
    %c0_i32 = arith.constant 0 : i32
    %c0_i32_0 = arith.constant 0 : i32
    %c0_i32_1 = arith.constant 0 : i32
    return %c0_i32, %c0_i32_0 : i32, i32
  }
  func.func @transform_22(%arg0: i32) -> (i32, i32, i32) {
    %c0_i32 = arith.constant 0 : i32
    %c0_i32_0 = arith.constant 0 : i32
    %c0_i32_1 = arith.constant 0 : i32
    %c0_i32_2 = arith.constant 0 : i32
    return %c0_i32, %c0_i32_0, %c0_i32_1 : i32, i32, i32
  }
  func.func @transform_23(%arg0: i32) -> (i32, i32) {
    %c0_i32 = arith.constant 0 : i32
    %c0_i32_0 = arith.constant 0 : i32
    %c0_i32_1 = arith.constant 0 : i32
    return %c0_i32, %c0_i32_0 : i32, i32
  }
  func.func @transform_24(%arg0: i32) -> (i32, i32) {
    %c0_i32 = arith.constant 0 : i32
    %c0_i32_0 = arith.constant 0 : i32
    %c0_i32_1 = arith.constant 0 : i32
    return %c0_i32, %c0_i32_0 : i32, i32
  }
  func.func @transform_25(%arg0: i32) -> (i32, i32) {
    %c0_i32 = arith.constant 0 : i32
    %c0_i32_0 = arith.constant 0 : i32
    %c0_i32_1 = arith.constant 0 : i32
    return %c0_i32, %c0_i32_0 : i32, i32
  }
  func.func @transform_26(%arg0: i32) -> (i32, i32) {
    %c0_i32 = arith.constant 0 : i32
    %c0_i32_0 = arith.constant 0 : i32
    %c0_i32_1 = arith.constant 0 : i32
    return %c0_i32, %c0_i32_0 : i32, i32
  }
  func.func @transform_27(%arg0: i32) -> (i32, i32) {
    %c0_i32 = arith.constant 0 : i32
    %c0_i32_0 = arith.constant 0 : i32
    %c0_i32_1 = arith.constant 0 : i32
    return %c0_i32, %c0_i32_0 : i32, i32
  }
  func.func @transform_28(%arg0: i32) -> (i32, i32) {
    %c0_i32 = arith.constant 0 : i32
    %c0_i32_0 = arith.constant 0 : i32
    %c0_i32_1 = arith.constant 0 : i32
    return %c0_i32, %c0_i32_0 : i32, i32
  }
  func.func @transform_29(%arg0: i32) -> (i32, i32) {
    %c0_i32 = arith.constant 0 : i32
    %c0_i32_0 = arith.constant 0 : i32
    %c0_i32_1 = arith.constant 0 : i32
    return %c0_i32, %c0_i32_0 : i32, i32
  }
  func.func @transform_30(%arg0: i32) -> (i32, i32) {
    %c0_i32 = arith.constant 0 : i32
    %c0_i32_0 = arith.constant 0 : i32
    %c0_i32_1 = arith.constant 0 : i32
    return %c0_i32, %c0_i32_0 : i32, i32
  }
  func.func @transform_31(%arg0: i32) -> (i32, i32) {
    %c0_i32 = arith.constant 0 : i32
    %c0_i32_0 = arith.constant 0 : i32
    %c0_i32_1 = arith.constant 0 : i32
    return %c0_i32, %c0_i32_0 : i32, i32
  }
  func.func @transform_32(%arg0: i32) -> (i32, i32) {
    %c0_i32 = arith.constant 0 : i32
    %c0_i32_0 = arith.constant 0 : i32
    %c0_i32_1 = arith.constant 0 : i32
    return %c0_i32, %c0_i32_0 : i32, i32
  }
  func.func @transform_33(%arg0: i32) -> (i32, i32) {
    %c0_i32 = arith.constant 0 : i32
    %c0_i32_0 = arith.constant 0 : i32
    %c0_i32_1 = arith.constant 0 : i32
    return %c0_i32, %c0_i32_0 : i32, i32
  }
  func.func @transform_34(%arg0: i32) -> (i32, i32) {
    %c0_i32 = arith.constant 0 : i32
    %c0_i32_0 = arith.constant 0 : i32
    %c0_i32_1 = arith.constant 0 : i32
    return %c0_i32, %c0_i32_0 : i32, i32
  }
  func.func @transform_35(%arg0: i32) -> (i32, i32, i32) {
    %c0_i32 = arith.constant 0 : i32
    %c0_i32_0 = arith.constant 0 : i32
    %c0_i32_1 = arith.constant 0 : i32
    return %arg0, %c0_i32, %c0_i32_0 : i32, i32, i32
  }
}

</mosaic_0001>

<bundles_post_ra>
// kernel: conformer_forward.2
= control target key start
LH: loop header
LB: loop body
LE: loop exit
PB: predicated region body
PF: predicated region fallthrough
CT: control target
= control target key end

     0   :  { %s3793_s6 = smov 1   ;;  %s3794_s10 = smov 2   ;;  %s4584_s0 = inlined_call_operand.smem [shape: u32[36], index: -1, kind: input, shape index: {}] }
   0x1   :  { %s3846_s5 = sld [smem:[%s4584_s0]]   ;;  %s3795_s14 = smov 3  }
   0x2   :  { %s3851_s9 = sld [smem:[%s4584_s0 + %s3793_s6]]   ;;  %s3796_s18 = smov 4  }
   0x3   :  { %s3856_s13 = sld [smem:[%s4584_s0 + %s3794_s10]]   ;;  %s3797_s22 = smov 5  }
   0x4   :  { %s3861_s17 = sld [smem:[%s4584_s0 + %s3795_s14]]   ;;  %s3798_s26 = smov 6  }
   0x5   :  { %s3866_s21 = sld [smem:[%s4584_s0 + %s3796_s18]]   ;;  %s3799_s30 = smov 7  }
   0x6   :  { %s3871_s25 = sld [smem:[%s4584_s0 + %s3797_s22]]   ;;  %s3800_s4 = smov 8  }
   0x7   :  { %s3876_s29 = sld [smem:[%s4584_s0 + %s3798_s26]]   ;;  %s3801_s10 = smov 9  }
   0x8   :  { %s3881_s3 = sld [smem:[%s4584_s0 + %s3799_s30]]   ;;  %s3802_s15 = smov 10  }
   0x9   :  { %s3886_s8 = sld [smem:[%s4584_s0 + %s3800_s4]]   ;;  %s3803_s20 = smov 11  }
   0xa   :  { %s3891_s14 = sld [smem:[%s4584_s0 + %s3801_s10]]   ;;  %s3804_s26 = smov 12  }
   0xb   :  { %s3896_s19 = sld [smem:[%s4584_s0 + %s3802_s15]]   ;;  %s3805_s1 = smov 13  }
   0xc   :  { %s3901_s24 = sld [smem:[%s4584_s0 + %s3803_s20]]   ;;  %s3806_s7 = smov 14  }
   0xd   :  { %s3906_s30 = sld [smem:[%s4584_s0 + %s3804_s26]]   ;;  %s3807_s15 = smov 15  }
   0xe   :  { %s3911_s6 = sld [smem:[%s4584_s0 + %s3805_s1]]   ;;  %s3808_s22 = smov 16  }
   0xf   :  { %s3916_s12 = sld [smem:[%s4584_s0 + %s3806_s7]]   ;;  %s3809_s28 = smov 17  }
  0x10   :  { %s3921_s20 = sld [smem:[%s4584_s0 + %s3807_s15]]   ;;  %s3810_s7 = smov 18  }
  0x11   :  { %s3926_s27 = sld [smem:[%s4584_s0 + %s3808_s22]]   ;;  %s3811_s15 = smov 19  }
  0x12   :  { %s3931_s4 = sld [smem:[%s4584_s0 + %s3809_s28]]   ;;  %s3812_s22 = smov 20  }
  0x13   :  { %4592 = sst [smem:[#allocation2_spill]] %s3906_s30  ;;  %s3813_s28 = smov 21  }
  0x14   :  { %4593 = sst [smem:[#allocation3_spill]] %s3911_s6 }
  0x15   :  { %s3936_s6 = sld [smem:[%s4584_s0 + %s3810_s7]]   ;;  %s3814_s7 = smov 22  }
  0x16   :  { %s3941_s30 = sld [smem:[%s4584_s0 + %s3811_s15]]   ;;  %s3815_s15 = smov 23  }
  0x17   :  { %4594 = sst [smem:[#allocation4_spill]] %s3926_s27 }
  0x18   :  { %4595 = sst [smem:[#allocation5_spill]] %s3931_s4 }
  0x19   :  { %s3946_s27 = sld [smem:[%s4584_s0 + %s3812_s22]]   ;;  %s3816_s22 = smov 24  }
  0x1a   :  { %s3951_s4 = sld [smem:[%s4584_s0 + %s3813_s28]]   ;;  %s3817_s28 = smov 25  }
  0x1b   :  { %4596 = sst [smem:[#allocation6_spill]] %s3936_s6 }
  0x1c   :  { %4597 = sst [smem:[#allocation7_spill]] %s3941_s30 }
  0x1d   :  { %s3956_s6 = sld [smem:[%s4584_s0 + %s3814_s7]]   ;;  %s3818_s7 = smov 26  }
  0x1e   :  { %s3961_s30 = sld [smem:[%s4584_s0 + %s3815_s15]]   ;;  %s3819_s15 = smov 27  }
  0x1f   :  { %4598 = sst [smem:[#allocation8_spill]] %s3946_s27 }
  0x20   :  { %4599 = sst [smem:[#allocation9_spill]] %s3951_s4 }
  0x21   :  { %s3966_s27 = sld [smem:[%s4584_s0 + %s3816_s22]]   ;;  %s3820_s22 = smov 28  }
  0x22   :  { %s3971_s4 = sld [smem:[%s4584_s0 + %s3817_s28]]   ;;  %s3821_s28 = smov 29  }
  0x23   :  { %4600 = sst [smem:[#allocation10_spill]] %s3956_s6 }
  0x24   :  { %4601 = sst [smem:[#allocation11_spill]] %s3961_s30 }
  0x25   :  { %s3976_s6 = sld [smem:[%s4584_s0 + %s3818_s7]]   ;;  %s3822_s7 = smov 30  }
  0x26   :  { %s3981_s30 = sld [smem:[%s4584_s0 + %s3819_s15]]   ;;  %s3823_s15 = smov 31  }
  0x27   :  { %4602 = sst [smem:[#allocation12_spill]] %s3966_s27 }
  0x28   :  { %4603 = sst [smem:[#allocation13_spill]] %s3971_s4 }
  0x29   :  { %s3986_s27 = sld [smem:[%s4584_s0 + %s3820_s22]]   ;;  %s3824_s22 = smov 32  }
  0x2a   :  { %s3991_s4 = sld [smem:[%s4584_s0 + %s3821_s28]]   ;;  %s3825_s28 = smov 33  }
  0x2b   :  { %4604 = sst [smem:[#allocation14_spill]] %s3976_s6 }
  0x2c   :  { %4605 = sst [smem:[#allocation15_spill]] %s3981_s30 }
  0x2d   :  { %s3996_s6 = sld [smem:[%s4584_s0 + %s3822_s7]]   ;;  %s3826_s7 = smov 34  }
  0x2e   :  { %s4001_s30 = sld [smem:[%s4584_s0 + %s3823_s15]]   ;;  %s3827_s15 = smov 35  }
  0x2f   :  { %4606 = sst [smem:[#allocation16_spill]] %s3986_s27 }
  0x30   :  { %4607 = sst [smem:[#allocation17_spill]] %s3991_s4 }
  0x31   :  { %s4006_s27 = sld [smem:[%s4584_s0 + %s3824_s22]]   ;;  %s4023_s22 = smov 0  }
  0x32   :  { %s4011_s4 = sld [smem:[%s4584_s0 + %s3825_s28]]  }
  0x33   :  { %4608 = sst [smem:[#allocation18_spill]] %s3996_s6 }
  0x34   :  { %4609 = sst [smem:[#allocation19_spill]] %s4001_s30 }
  0x35   :  { %s4016_s6 = sld [smem:[%s4584_s0 + %s3826_s7]]  }
  0x36   :  { %s4021_s30 = sld [smem:[%s4584_s0 + %s3827_s15]]  }
  0x37 LB: > { %s3240_s23 = sadd.s32 4294967295, %s3791_s22   ;;  %p3244_p0 = scmp.ge.s32.totalorder %s3791_s22, 1  ;;  %s3791_s22 = sphi %s4023_s22, %s81_s22  }
  0x38   : > { %p973_p1 = scmp.lt.s32.totalorder %s3791_s22, 3 }
  0x3a   : > { %p974_p2 = pnand %p3244_p0, %p973_p1 }
  0x3b   : > { %p1061_p3 = scmp.lt.s32.totalorder (!%p974_p2), %s3240_s23, 1  ;;  %vm1076_vm0 = vcmask (!%p974_p2), 261120   ;;  %v3659_v14 = vld [vmem:[%s3861_s17] sm:$0xff] (!%p974_p2)   ;;  %v3828_v15 = vmov (!%p974_p2), 0.0   ;;  %v3660_v16 = vld [vmem:[%s3861_s17 + $0x8] sm:$0xff] (!%p974_p2)   ;;  %vm3829_vm1 = vmmov (!%p974_p2), 0  }
  0x3c   : > { %977 = sbr.rel (%p974_p2) target bundleno = 5056 (0x13c0), region = 160  ;;  %3408 = vmatprep.subr.bf16.mxu0 (!%p974_p2), %v3828_v15  ;;  %3416 = vmatprep.subr.bf16.mxu1 (!%p974_p2), %v3828_v15  ;;  %v3249_v25 = vld [vmem:[%s3851_s9] ss:$0 sm:$0xff] (!%p974_p2)  ;;  %v3662_v35 = vld [vmem:[%s3871_s25 + $0x8] sm:$0xff] (!%p974_p2)   ;;  %v3663_v36 = vld [vmem:[%s3871_s25 + $0x10] sm:$0xff] (!%p974_p2)   ;;  %s3830_s28 = smov (!%p974_p2), 112  }
  0x3d   : > { %3409 = vmatpush3.bf16.msra.mxu0 (!%p974_p2), %v3659_v14  ;;  %3412 = vmatprep.mubr.msk.bf16.mxu0 (!%p974_p2), %vm3829_vm1, %v3828_v15  ;;  %v3250_v29 = vld [vmem:[%s3856_s13] ss:$0 sm:$0xff] (!%p974_p2)  ;;  %v3664_v37 = vld [vmem:[%s3871_s25 + $0x18] sm:$0xff] (!%p974_p2)   ;;  %v3666_v39 = vld [vmem:[%s3871_s25 + $0x28] sm:$0xff] (!%p974_p2)   ;;  %s3831_s1 = smov (!%p974_p2), 96   ;;  %s3832_s2 = smov (!%p974_p2), 80  }
  0x3e   : > { %3410 = vmatprep.subr.bf16.mxu0 (!%p974_p2), %v3828_v15  ;;  %3432 = vmatprep.mubr.msk.bf16.mxu1 (!%p974_p2), %vm3829_vm1, %v3828_v15  ;;  %v3661_v34 = vld [vmem:[%s3871_s25] sm:$0xff] (!%p974_p2)   ;;  %v3667_v40 = vld [vmem:[%s3871_s25 + $0x30] sm:$0xff] (!%p974_p2)   ;;  %v3668_v41 = vld [vmem:[%s3871_s25 + $0x38] sm:$0xff] (!%p974_p2)   ;;  %s3833_s7 = smov (!%p974_p2), 8   ;;  %s3834_s10 = smov (!%p974_p2), 120   ;;  %vm1626_vm2 = vcmask (!%p974_p2), 64512  }
  0x3f   : > { %3417 = vmatpush3.bf16.msra.mxu1 (!%p974_p2), %v3661_v34  ;;  %v3665_v38 = vld [vmem:[%s3871_s25 + $0x20] sm:$0xff] (!%p974_p2)   ;;  %vm1803_vm3 = vcmask (!%p974_p2), 130048   ;;  %s4610_s11 = sld [smem:[#allocation2_spill]] (!%p974_p2)  ;;  %s3835_s15 = smov (!%p974_p2), 16   ;;  %vm2300_vm4 = vcmask (!%p974_p2), 392192   ;;  %vm2336_vm5 = vcmask (!%p974_p2), 523264  }
  0x40   : > { %3418 = vmatprep.subr.bf16.mxu1 (!%p974_p2), %v3828_v15  ;;  %v3251_v42 = vld [vmem:[%s3866_s21] ss:$0 sm:$0xff] (!%p974_p2)  ;;  %s3836_s16 = smov (!%p974_p2), 48   ;;  %s3837_s18 = smov (!%p974_p2), 32  }
  0x41   : > { %3411 = vmatpush3.bf16.msra.mxu0 (!%p974_p2), %v3660_v16  ;;  %v3257_v60 = vld [vmem:[%s3876_s29] ss:$0 sm:$0xff] (!%p974_p2) }
  0x42   : > { %3436 = vmatprep.subr.bf16.mxu0 (!%p974_p2), %v3828_v15  ;;  %v3267_v34 = vld [vmem:[%s3886_s8] ss:$0 sm:$0xff] (!%p974_p2) }
  0x43   : > { %s4629_s23 = smov (!%p1061_p3, %s3240_s23), 1  ;;  %3419 = vmatpush3.bf16.msra.mxu1 %v3662_v35 }
  0x44   : > { %s3341_s0 = sshll.u32 %s4629_s23, 4  ;;  %3420 = vmatprep.subr.bf16.mxu1 %v3828_v15 }
  0x45   : > { %s1065_s26 = scalar_lea.vmem %s3846_s5, %s3341_s0 }
  0x46   : > { %v4037_v0 = vld [vmem:[%s1065_s26] sm:$0xff]  ;;  %v4039_v1 = vld [vmem:[%s1065_s26 + $0x8] sm:$0xff]  ;;  %s4611_s26 = sld [smem:[#allocation3_spill]] }
  0x47   : > { %v1077_v2 = vsel %vm1076_vm0, %v4037_v0, 0.0  ;;  %v1080_v3 = vsel %vm1076_vm0, %v4039_v1, 0.0  ;;  %3421 = vmatpush3.bf16.msra.mxu1 %v3663_v36 }
  0x48   : > { %1078 = vadd.xlane.f32.xlu0 %v1077_v2  ;;  %3422 = vmatprep.subr.bf16.mxu1 %v3828_v15 }
  0x4b   : > { %3423 = vmatpush3.bf16.msra.mxu1 %v3664_v37 }
  0x4c   : > { %1081 = vadd.xlane.f32.xlu0 %v1080_v3  ;;  %3424 = vmatprep.subr.bf16.mxu1 %v3828_v15 }
  0x4f   : > { %3425 = vmatpush3.bf16.msra.mxu1 %v3665_v38  ;;  %v3671_v38 = vld [vmem:[%s3896_s19] sm:$0xff]  }
  0x50   : > { %3426 = vmatprep.subr.bf16.mxu1 %v3828_v15 }
  0x53   : > { %3427 = vmatpush3.bf16.msra.mxu1 %v3666_v39 }
  0x54   : > { %3428 = vmatprep.subr.bf16.mxu1 %v3828_v15 }
  0x57   : > { %3429 = vmatpush3.bf16.msra.mxu1 %v3667_v40  ;;  %v3672_v40 = vld [vmem:[%s3896_s19 + $0x8] sm:$0xff]  }
  0x58   : > { %3430 = vmatprep.subr.bf16.mxu1 %v3828_v15 }
  0x5b   : > { %3431 = vmatpush3.bf16.msra.mxu1 %v3668_v41  ;;  %v3673_v41 = vld [vmem:[%s3901_s24] sm:$0xff]  }
  0x5c   : > { %3478 = vmatprep.subr.bf16.mxu1 %v3828_v15 }
  0xd5   : > { %v1079_v4 = vpop.xlane.xlu0 %1078 }
  0xd6   : > { %v1084_v5 = vmul.f32 0.03125, %v1079_v4 }
  0xd8   : > { %v1086_v6 = vsub.f32 %v4037_v0, %v1084_v5 }
  0xd9   : > { %v1082_v7 = vpop.xlane.xlu0 %1081 }
  0xda   : > { %v1085_v8 = vmul.f32 0.03125, %v1082_v7  ;;  %v1088_v9 = vmul.f32 %v1086_v6, %v1086_v6 }
  0xdc   : > { %v1087_v10 = vsub.f32 %v4039_v1, %v1085_v8  ;;  %v1090_v11 = vsel %vm1076_vm0, %v1088_v9, 0.0 }
  0xdd   : > { %1091 = vadd.xlane.f32.xlu1 %v1090_v11 }
  0xde   : > { %v1089_v12 = vmul.f32 %v1087_v10, %v1087_v10 }
  0xe0   : > { %v1093_v13 = vsel %vm1076_vm0, %v1089_v12, 0.0 }
  0xe1   : > { %1094 = vadd.xlane.f32.xlu1 %v1093_v13 }
 0x16a   : > { %v1092_v17 = vpop.xlane.xlu1 %1091 }
 0x16b   : > { %v1096_v18 = vmul.f32 0.03125, %v1092_v17 }
 0x16d   : > { %v1098_v19 = vadd.f32 1e-05, %v1096_v18 }
 0x16e   : > { %v1095_v20 = vpop.xlane.xlu1 %1094 }
 0x16f   : > { %3697 = vrsqrt.f32 %v1098_v19  ;;  %v1097_v21 = vmul.f32 0.03125, %v1095_v20  ;;  %v3669_v20 = vld [vmem:[%s3891_s14] sm:$0xff]  }
 0x171   : > { %v1099_v22 = vadd.f32 1e-05, %v1097_v21  ;;  %v3670_v21 = vld [vmem:[%s3891_s14 + $0x8] sm:$0xff]  }
 0x173   : > { %3699 = vrsqrt.f32 %v1099_v22 }
 0x179   : > { %v3698_v23 = vpop.eup %3697 }
 0x17a   : > { %v1102_v24 = vmul.f32 %v3698_v23, %v1086_v6 }
 0x17c   : > { %v1110_v28 = vmul.f32 %v3249_v25, %v1102_v24 }
 0x17d   : > { %v3700_v26 = vpop.eup %3699 }
 0x17e   : > { %v1103_v27 = vmul.f32 %v3700_v26, %v1087_v10  ;;  %v1118_v31 = vadd.f32 %v3250_v29, %v1110_v28 }
 0x180   : > { %v1111_v30 = vmul.f32 %v3249_v25, %v1103_v27 }
 0x182   : > { %v1119_v32 = vadd.f32 %v3250_v29, %v1111_v30  ;;  %v3266_v29 = vld [vmem:[%s3881_s3] ss:$0 sm:$0xff] }
 0x184   : > { %v1124_v33 = vpack.c.bf16 %v1119_v32, %v1118_v31 }
 0x186   : > { %3413 = vmatmul.mubr.msk.bf16.vlgmr.msra.gmra.mrb[0].mxu0 %vm1076_vm0, %v1124_v33 }
 0x187   : > { %3440 = vmatprep.mubr.msk.bf16.mxu0 %vm3829_vm1, %v3828_v15  ;;  %3437 = vmatpush3.bf16.msra.mxu0 %v3669_v20 }
 0x188   : > { %3438 = vmatprep.subr.bf16.mxu0 %v3828_v15 }
 0x18b   : > { %3439 = vmatpush3.bf16.msra.mxu0 %v3670_v21  ;;  %v4232_v21 = vld [vmem:[%s3921_s20 + $0x8] sm:$0xff] }
 0x18c   : > { %3444 = vmatprep.subr.bf16.mxu0 %v3828_v15 }
 0x259   : > { %v1181_v43 = vpop.f32.mrb[0].mxu0 }
 0x25a   : > { %v1182_v44 = vadd.f32 %v3251_v42, %v1181_v43  ;;  %v3414_v45 = vpop.f32.mrb[1].mxu0 }
 0x25b   : > { %v1184_v46 = vpop.f32.mrb[2].mxu0 }
 0x25c   : > { %v3255_v47 = vmul.f32 -1.442695, %v1182_v44  ;;  %v1185_v48 = vadd.f32 %v3251_v42, %v1184_v46  ;;  %v3415_v49 = vpop.f32.mrb[3].mxu0  ;;  %v3674_v42 = vld [vmem:[%s3901_s24 + $0x8] sm:$0xff]  }
 0x25e   : > { %3701 = vpow2.f32 %v3255_v47  ;;  %v3256_v50 = vmul.f32 -1.442695, %v1185_v48 }
 0x260   : > { %3703 = vpow2.f32 %v3256_v50 }
 0x268   : > { %v3702_v51 = vpop.eup %3701 }
 0x269   : > { %v1194_v52 = vadd.f32 1.0, %v3702_v51 }
 0x26a   : > { %v3704_v53 = vpop.eup %3703 }
 0x26b   : > { %3705 = vrcp.f32 %v1194_v52  ;;  %v1195_v54 = vadd.f32 1.0, %v3704_v53 }
 0x26d   : > { %3707 = vrcp.f32 %v1195_v54 }
 0x275   : > { %v3706_v55 = vpop.eup %3705 }
 0x276   : > { %v1200_v57 = vmul.f32 %v3706_v55, %v1182_v44 }
 0x277   : > { %v3708_v56 = vpop.eup %3707 }
 0x278   : > { %v1201_v58 = vmul.f32 %v3708_v56, %v1185_v48 }
 0x27a   : > { %v1218_v59 = vpack.c.bf16 %v1201_v58, %v1200_v57 }
 0x27c   : > { %3433 = vmatmul.mubr.bf16.vlgmr.msra.gmra.mrb[0].mxu1 %v1218_v59 }
 0x27d   : > { %3480 = vmatprep.mubr.msk.bf16.mxu1 %vm3829_vm1, %v3828_v15 }
 0x34f   : > { %v1308_v61 = vpop.f32.mrb[0].mxu1 }
 0x350   : > { %v1309_v62 = vadd.f32 %v3257_v60, %v1308_v61  ;;  %v3434_v63 = vpop.f32.mrb[1].mxu1 }
 0x351   : > { %v1311_v2 = vpop.f32.mrb[2].mxu1 }
 0x352   : > { %v1315_v3 = vmul.f32 0.5, %v1309_v62  ;;  %v1312_v4 = vadd.f32 %v3257_v60, %v1311_v2  ;;  %v3435_v5 = vpop.f32.mrb[3].mxu1 }
 0x354   : > { %v4085_v6 = vadd.f32 %v1315_v3, %v4037_v0  ;;  %v1316_v7 = vmul.f32 0.5, %v1312_v4 }
 0x356   : > { %v4088_v8 = vadd.f32 %v1316_v7, %v4039_v1  ;;  %v1321_v9 = vsel %vm1076_vm0, %v4085_v6, 0.0 }
 0x357   : > { %1322 = vadd.xlane.f32.xlu0 %v1321_v9 }
 0x358   : > { %v1324_v10 = vsel %vm1076_vm0, %v4088_v8, 0.0 }
 0x359   : > { %1325 = vadd.xlane.f32.xlu1 %v1324_v10 }
 0x3e4   : > { %v1323_v11 = vpop.xlane.xlu0 %1322 }
 0x3e5   : > { %v1327_v12 = vmul.f32 0.03125, %v1323_v11 }
 0x3e6   : > { %v1326_v13 = vpop.xlane.xlu1 %1325 }
 0x3e7   : > { %v1329_v0 = vsub.f32 %v4085_v6, %v1327_v12  ;;  %v1328_v14 = vmul.f32 0.03125, %v1326_v13 }
 0x3e9   : > { %v1330_v16 = vsub.f32 %v4088_v8, %v1328_v14  ;;  %v1331_v1 = vmul.f32 %v1329_v0, %v1329_v0 }
 0x3eb   : > { %v1333_v17 = vsel %vm1076_vm0, %v1331_v1, 0.0  ;;  %v1332_v18 = vmul.f32 %v1330_v16, %v1330_v16 }
 0x3ec   : > { %1334 = vadd.xlane.f32.xlu0 %v1333_v17 }
 0x3ed   : > { %v1336_v19 = vsel %vm1076_vm0, %v1332_v18, 0.0 }
 0x3ee   : > { %1337 = vadd.xlane.f32.xlu1 %v1336_v19 }
 0x479   : > { %v1335_v22 = vpop.xlane.xlu0 %1334 }
 0x47a   : > { %v1339_v23 = vmul.f32 0.03125, %v1335_v22 }
 0x47b   : > { %v1338_v24 = vpop.xlane.xlu1 %1337 }
 0x47c   : > { %v1341_v25 = vadd.f32 1e-05, %v1339_v23  ;;  %v1340_v26 = vmul.f32 0.03125, %v1338_v24  ;;  %v4235_v23 = vld [vmem:[%s3916_s12] sm:$0xff]  ;;  %v4238_v24 = vld [vmem:[%s3916_s12 + $0x8] sm:$0xff] }
 0x47e   : > { %3709 = vrsqrt.f32 %v1341_v25  ;;  %v1342_v27 = vadd.f32 1e-05, %v1340_v26  ;;  %v4244_v26 = vld [vmem:[%s3921_s20] sm:$0xff] }
 0x480   : > { %3711 = vrsqrt.f32 %v1342_v27 }
 0x488   : > { %v3710_v28 = vpop.eup %3709 }
 0x489   : > { %v1345_v30 = vmul.f32 %v3710_v28, %v1329_v0 }
 0x48a   : > { %v3712_v31 = vpop.eup %3711 }
 0x48b   : > { %v1353_v32 = vmul.f32 %v3266_v29, %v1345_v30  ;;  %v1346_v33 = vmul.f32 %v3712_v31, %v1330_v16 }
 0x48d   : > { %v1354_v35 = vmul.f32 %v3266_v29, %v1346_v33  ;;  %v1361_v36 = vadd.f32 %v3267_v34, %v1353_v32 }
 0x48f   : > { %v1362_v37 = vadd.f32 %v3267_v34, %v1354_v35 }
 0x491   : > { %v1367_v39 = vpack.c.bf16 %v1362_v37, %v1361_v36 }
 0x493   : > { %3441 = vmatmul.mubr.msk.bf16.vlgmr.msra.gmra.mrb[4].mxu0 %vm1076_vm0, %v1367_v39 }
 0x494   : > { %3445 = vmatpush3.bf16.msra.mxu0 %v3671_v38  ;;  %3448 = vmatprep.mubr.msk.bf16.mxu0 %vm3829_vm1, %v3828_v15 }
 0x495   : > { %3446 = vmatprep.subr.bf16.mxu0 %v3828_v15 }
 0x498   : > { %3447 = vmatpush3.bf16.msra.mxu0 %v3672_v40 }
 0x499   : > { %3452 = vmatprep.subr.bf16.mxu0 %v3828_v15 }
 0x49b   : > { %3449 = vmatmul.mubr.msk.bf16.vlgmr.msra.gmra.mrb[8].mxu0 %vm1076_vm0, %v1367_v39 }
 0x49c   : > { %3453 = vmatpush3.bf16.msra.mxu0 %v3673_v41  ;;  %3456 = vmatprep.mubr.msk.bf16.mxu0 %vm3829_vm1, %v3828_v15 }
 0x49d   : > { %3454 = vmatprep.subr.bf16.mxu0 %v3828_v15 }
 0x4a0   : > { %3455 = vmatpush3.bf16.msra.mxu0 %v3674_v42 }
 0x4a1   : > { %3460 = vmatprep.subr.bf16.mxu0 %v3828_v15 }
 0x4a3   : > { %3457 = vmatmul.mubr.msk.bf16.vlgmr.msra.gmra.mrb[12].mxu0 %vm1076_vm0, %v1367_v39 }
 0x4a4   : > { %3462 = vmatprep.mubr.msk.bf16.mxu0 %vm3829_vm1, %v3828_v15 }
 0x566   : > { %v4121_v43 = vpop.f32.mrb[4].mxu0 }
 0x567   : > { %1544 = vrot.lane.b32.xlu1 %v4121_v43, %s3830_s28  ;;  %v3442_v44 = vpop.f32.mrb[5].mxu0  ;;  %v1562_v58 = vsub.f32 0.0, %v4121_v43  ;;  %v1635_v32 = vmul.f32 %v4235_v23, %v4121_v43 }
 0x568   : > { %v4125_v45 = vpop.f32.mrb[6].mxu0 }
 0x569   : > { %v3443_v46 = vpop.f32.mrb[7].mxu0  ;;  %v1563_v57 = vsub.f32 0.0, %v4125_v45  ;;  %v1636_v31 = vmul.f32 %v4238_v24, %v4125_v45 }
 0x56b   : > { %1546 = vrot.lane.b32.xlu1 %v4125_v45, %s3830_s28 }
 0x56e   : > { %v4129_v47 = vpop.f32.mrb[8].mxu0 }
 0x56f   : > { %1661 = vrot.lane.b32.xlu0 %v4129_v47, %s3830_s28  ;;  %v3450_v48 = vpop.f32.mrb[9].mxu0  ;;  %v1679_v59 = vsub.f32 0.0, %v4129_v47  ;;  %v1751_v46 = vmul.f32 %v4235_v23, %v4129_v47 }
 0x570   : > { %v4133_v49 = vpop.f32.mrb[10].mxu0 }
 0x571   : > { %1663 = vrot.lane.b32.xlu1 %v4133_v49, %s3830_s28  ;;  %v3451_v50 = vpop.f32.mrb[11].mxu0  ;;  %v1680_v60 = vsub.f32 0.0, %v4133_v49  ;;  %v1752_v48 = vmul.f32 %v4238_v24, %v4133_v49 }
 0x573   : > { %1550 = vrot.lane.b32.xlu0 %v4121_v43, %s3831_s1 }
 0x575   : > { %1552 = vrot.lane.b32.xlu1 %v4125_v45, %s3831_s1 }
 0x576   : > { %v4141_v51 = vpop.f32.mrb[12].mxu0 }
 0x577   : > { %1667 = vrot.lane.b32.xlu0 %v4129_v47, %s3831_s1  ;;  %v3458_v52 = vpop.f32.mrb[13].mxu0 }
 0x578   : > { %v4145_v53 = vpop.f32.mrb[14].mxu0 }
 0x579   : > { %v2092_v54 = vpack.c.bf16 %v4145_v53, %v4141_v51  ;;  %1669 = vrot.lane.b32.xlu1 %v4133_v49, %s3831_s1  ;;  %v3459_v55 = vpop.f32.mrb[15].mxu0  ;;  %v4153_v56 = vpack.i.bf16 %v4145_v53, %v4141_v51 }
 0x57b   : > { %1673 = vrot.lane.b32.xlu0 %v4129_v47, %s3832_s2 }
 0x57d   : > { %1675 = vrot.lane.b32.xlu1 %v4133_v49, %s3832_s2 }
 0x57f   : > { %1556 = vrot.lane.b32.xlu0 %v4121_v43, %s3832_s2 }
 0x581   : > { %1558 = vrot.lane.b32.xlu1 %v4125_v45, %s3832_s2 }
 0x583   : > { %1719 = vrot.lane.b32.xlu0 %v4129_v47, %s3833_s7 }
 0x585   : > { %1580 = vrot.lane.b32.xlu1 %v1563_v57, %s3834_s10 }
 0x587   : > { %1578 = vrot.lane.b32.xlu0 %v1562_v58, %s3834_s10 }
 0x589   : > { %1604 = vrot.lane.b32.xlu1 %v4125_v45, %s3833_s7 }
 0x58b   : > { %1602 = vrot.lane.b32.xlu0 %v4121_v43, %s3833_s7 }
 0x58d   : > { %1721 = vrot.lane.b32.xlu1 %v4133_v49, %s3833_s7 }
 0x58f   : > { %1695 = vrot.lane.b32.xlu0 %v1679_v59, %s3834_s10 }
 0x591   : > { %1697 = vrot.lane.b32.xlu1 %v1680_v60, %s3834_s10 }
 0x5d9   : > { %v4179_v61 = vpop.permute.xlu1 %1544 }
 0x5da   : > { %1606 = vrot.lane.b32.xlu0 %v4179_v61, %s3833_s7  ;;  %v1564_v62 = vsub.f32 0.0, %v4179_v61 }
 0x5dd   : > { %v4184_v63 = vpop.permute.xlu1 %1546 }
 0x5de   : > { %1582 = vrot.lane.b32.xlu0 %v1564_v62, %s3834_s10  ;;  %1608 = vrot.lane.b32.xlu1 %v4184_v63, %s3833_s7  ;;  %v1565_v2 = vsub.f32 0.0, %v4184_v63 }
 0x5e1   : > { %v4190_v3 = vpop.permute.xlu0 %1661 }
 0x5e2   : > { %1584 = vrot.lane.b32.xlu1 %v1565_v2, %s3834_s10  ;;  %v1681_v17 = vsub.f32 0.0, %v4190_v3 }
 0x5e3   : > { %v4193_v4 = vpop.permute.xlu1 %1663 }
 0x5e4   : > { %v1682_v19 = vsub.f32 0.0, %v4193_v4 }
 0x5e5   : > { %v4195_v5 = vpop.permute.xlu0 %1550 }
 0x5e6   : > { %v1566_v7 = vsub.f32 0.0, %v4195_v5 }
 0x5e7   : > { %v4198_v9 = vpop.permute.xlu1 %1552 }
 0x5e8   : > { %v1567_v10 = vsub.f32 0.0, %v4198_v9  ;;  %1586 = vrot.lane.b32.xlu0 %v1566_v7, %s3834_s10 }
 0x5e9   : > { %v4202_v11 = vpop.permute.xlu0 %1667 }
 0x5ea   : > { %1588 = vrot.lane.b32.xlu1 %v1567_v10, %s3834_s10  ;;  %v1683_v29 = vsub.f32 0.0, %v4202_v11 }
 0x5eb   : > { %v4205_v12 = vpop.permute.xlu1 %1669 }
 0x5ec   : > { %1723 = vrot.lane.b32.xlu0 %v4190_v3, %s3833_s7  ;;  %v1684_v35 = vsub.f32 0.0, %v4205_v12 }
 0x5ed   : > { %v4209_v13 = vpop.permute.xlu0 %1673 }
 0x5ee   : > { %1725 = vrot.lane.b32.xlu1 %v4193_v4, %s3833_s7  ;;  %v1685_v39 = vsub.f32 0.0, %v4209_v13 }
 0x5ef   : > { %v4213_v0 = vpop.permute.xlu1 %1675 }
 0x5f0   : > { %1727 = vrot.lane.b32.xlu0 %v4202_v11, %s3833_s7  ;;  %v1686_v44 = vsub.f32 0.0, %v4213_v0 }
 0x5f1   : > { %v4217_v14 = vpop.permute.xlu0 %1556 }
 0x5f2   : > { %1729 = vrot.lane.b32.xlu1 %v4205_v12, %s3833_s7  ;;  %v1568_v52 = vsub.f32 0.0, %v4217_v14 }
 0x5f3   : > { %v4221_v16 = vpop.permute.xlu1 %1558 }
 0x5f4   : > { %1731 = vrot.lane.b32.xlu0 %v4209_v13, %s3833_s7  ;;  %v1569_v58 = vsub.f32 0.0, %v4221_v16 }
 0x5f5   : > { %v1720_v1 = vpop.permute.xlu0 %1719 }
 0x5f6   : > { %1733 = vrot.lane.b32.xlu1 %v4213_v0, %s3833_s7 }
 0x5f7   : > { %v1581_v18 = vpop.permute.xlu1 %1580 }
 0x5f8   : > { %1699 = vrot.lane.b32.xlu0 %v1681_v17, %s3834_s10  ;;  %v1637_v17 = vmul.f32 %v4179_v61, %v4235_v23 }
 0x5f9   : > { %v1579_v20 = vpop.permute.xlu0 %1578 }
 0x5fa   : > { %1701 = vrot.lane.b32.xlu1 %v1682_v19, %s3834_s10 }
 0x5fb   : > { %v1605_v22 = vpop.permute.xlu1 %1604 }
 0x5fc   : > { %v1628_v25 = vsel %vm1626_vm2, %v1581_v18, %v1605_v22  ;;  %1610 = vrot.lane.b32.xlu0 %v4195_v5, %s3833_s7  ;;  %v1638_v18 = vmul.f32 %v4184_v63, %v4238_v24 }
 0x5fd   : > { %v1644_v27 = vmul.f32 %v1628_v25, %v4232_v21  ;;  %v1603_v28 = vpop.permute.xlu0 %1602 }
 0x5fe   : > { %v1627_v30 = vsel %vm1626_vm2, %v1579_v20, %v1603_v28  ;;  %1612 = vrot.lane.b32.xlu1 %v4198_v9, %s3833_s7 }
 0x5ff   : > { %v1643_v33 = vmul.f32 %v1627_v30, %v4244_v26  ;;  %v1722_v34 = vpop.permute.xlu1 %1721  ;;  %v1652_v36 = vadd.f32 %v1644_v27, %v1636_v31 }
 0x600   : > { %1703 = vrot.lane.b32.xlu0 %v1683_v29, %s3834_s10 }
 0x601   : > { %v1651_v37 = vadd.f32 %v1643_v33, %v1635_v32  ;;  %v1696_v38 = vpop.permute.xlu0 %1695 }
 0x602   : > { %v1743_v40 = vsel %vm1626_vm2, %v1696_v38, %v1720_v1  ;;  %1705 = vrot.lane.b32.xlu1 %v1684_v35, %s3834_s10  ;;  %v1753_v38 = vmul.f32 %v4190_v3, %v4235_v23  ;;  %v1640_v3 = vmul.f32 %v4198_v9, %v4238_v24  ;;  %v1756_v9 = vmul.f32 %v4205_v12, %v4238_v24 }
 0x603   : > { %v1795_v41 = vpack.c.bf16 %v1652_v36, %v1651_v37  ;;  %v1759_v42 = vmul.f32 %v1743_v40, %v4244_v26  ;;  %v1698_v43 = vpop.permute.xlu1 %1697  ;;  %v1758_v12 = vmul.f32 %v4213_v0, %v4238_v24 }
 0x604   : > { %v1744_v45 = vsel %vm1626_vm2, %v1698_v43, %v1722_v34  ;;  %1707 = vrot.lane.b32.xlu0 %v1685_v39, %s3834_s10  ;;  %v1754_v39 = vmul.f32 %v4193_v4, %v4238_v24 }
 0x605   : > { %v1760_v50 = vmul.f32 %v1744_v45, %v4232_v21  ;;  %v1767_v55 = vadd.f32 %v1759_v42, %v1751_v46 }
 0x606   : > { %1709 = vrot.lane.b32.xlu1 %v1686_v44, %s3834_s10 }
 0x607   : > { %v1768_v57 = vadd.f32 %v1760_v50, %v1752_v48  ;;  %v1639_v50 = vmul.f32 %v4195_v5, %v4235_v23  ;;  %v1755_v5 = vmul.f32 %v4202_v11, %v4235_v23  ;;  %v1757_v11 = vmul.f32 %v4209_v13, %v4235_v23 }
 0x608   : > { %1590 = vrot.lane.b32.xlu0 %v1568_v52, %s3834_s10 }
 0x609   : > { %v1799_v59 = vpack.c.bf16 %v1768_v57, %v1767_v55 }
 0x60a   : > { %1592 = vrot.lane.b32.xlu1 %v1569_v58, %s3834_s10  ;;  %s4616_s10 = sld [smem:[#allocation9_spill]] }
 0x60b   : > { %v1808_v47 = vsel %vm1803_vm3, %v1799_v59, 0 }
 0x60c   : > { %1614 = vrot.lane.b32.xlu0 %v4217_v14, %s3833_s7  ;;  %3461 = vmatpush3.bf16.xpose.msra.mxu0 %v1808_v47 }
 0x60d   : > { %3466 = vmatprep.subr.bf16.mxu0 %v3828_v15 }
 0x60e   : > { %1616 = vrot.lane.b32.xlu1 %v4221_v16, %s3833_s7  ;;  %s4615_s7 = sld [smem:[#allocation8_spill]] }
 0x613   : > { %3463 = vmatmul.mubr.msk.bf16.vlgmr.msra.gmra.mrb[16].mxu0 %vm1803_vm3, %v1795_v41 }
 0x614   : > { %3468 = vmatprep.mubr.msk.bf16.mxu0 %vm3829_vm1, %v3828_v15 }
 0x64c   : > { %v1607_v49 = vpop.permute.xlu0 %1606 }
 0x650   : > { %v1583_v60 = vpop.permute.xlu0 %1582  ;;  %v1609_v62 = vpop.permute.xlu1 %1608 }
 0x651   : > { %v1629_v2 = vsel %vm1626_vm2, %v1583_v60, %v1607_v49 }
 0x652   : > { %v1645_v7 = vmul.f32 %v1629_v2, %v4244_v26 }
 0x654   : > { %v1585_v10 = vpop.permute.xlu1 %1584  ;;  %v1653_v20 = vadd.f32 %v1645_v7, %v1637_v17 }
 0x655   : > { %v1630_v1 = vsel %vm1626_vm2, %v1585_v10, %v1609_v62 }
 0x656   : > { %v1646_v19 = vmul.f32 %v1630_v1, %v4232_v21 }
 0x658   : > { %v1654_v22 = vadd.f32 %v1646_v19, %v1638_v18 }
 0x65a   : > { %v1796_v25 = vpack.c.bf16 %v1654_v22, %v1653_v20  ;;  %v1587_v27 = vpop.permute.xlu0 %1586 }
 0x65c   : > { %v1589_v28 = vpop.permute.xlu1 %1588 }
 0x65e   : > { %v1724_v29 = vpop.permute.xlu0 %1723 }
 0x660   : > { %v1726_v30 = vpop.permute.xlu1 %1725 }
 0x662   : > { %v1728_v31 = vpop.permute.xlu0 %1727 }
 0x664   : > { %v1730_v32 = vpop.permute.xlu1 %1729 }
 0x666   : > { %v1732_v33 = vpop.permute.xlu0 %1731 }
 0x668   : > { %v1734_v34 = vpop.permute.xlu1 %1733 }
 0x66a   : > { %v1700_v35 = vpop.permute.xlu0 %1699 }
 0x66b   : > { %v1745_v36 = vsel %vm1626_vm2, %v1700_v35, %v1724_v29 }
 0x66c   : > { %v1761_v61 = vmul.f32 %v1745_v36, %v4244_v26  ;;  %v1702_v37 = vpop.permute.xlu1 %1701 }
 0x66d   : > { %v1746_v63 = vsel %vm1626_vm2, %v1702_v37, %v1726_v30  ;;  %v1641_v37 = vmul.f32 %v4217_v14, %v4235_v23 }
 0x66e   : > { %v1762_v40 = vmul.f32 %v1746_v63, %v4232_v21  ;;  %v1611_v41 = vpop.permute.xlu0 %1610  ;;  %v1769_v43 = vadd.f32 %v1761_v61, %v1753_v38  ;;  %v1642_v63 = vmul.f32 %v4221_v16, %v4238_v24 }
 0x66f   : > { %v1631_v42 = vsel %vm1626_vm2, %v1587_v27, %v1611_v41 }
 0x670   : > { %v1770_v44 = vadd.f32 %v1762_v40, %v1754_v39  ;;  %v1647_v45 = vmul.f32 %v1631_v42, %v4244_v26  ;;  %v1613_v46 = vpop.permute.xlu1 %1612 }
 0x671   : > { %v1632_v48 = vsel %vm1626_vm2, %v1589_v28, %v1613_v46 }
 0x672   : > { %v1648_v4 = vmul.f32 %v1632_v48, %v4232_v21  ;;  %v1704_v52 = vpop.permute.xlu0 %1703  ;;  %v1800_v55 = vpack.c.bf16 %v1770_v44, %v1769_v43  ;;  %v1655_v58 = vadd.f32 %v1647_v45, %v1639_v50 }
 0x673   : > { %v1747_v57 = vsel %vm1626_vm2, %v1704_v52, %v1728_v31 }
 0x674   : > { %v1656_v59 = vadd.f32 %v1648_v4, %v1640_v3  ;;  %v1763_v47 = vmul.f32 %v1747_v57, %v4244_v26  ;;  %v1706_v49 = vpop.permute.xlu1 %1705  ;;  %v1855_v60 = vsel %vm1803_vm3, %v1800_v55, 0 }
 0x675   : > { %v1748_v62 = vsel %vm1626_vm2, %v1706_v49, %v1730_v32  ;;  %3467 = vmatpush3.bf16.xpose.msra.mxu0 %v1855_v60 }
 0x676   : > { %v1797_v2 = vpack.c.bf16 %v1656_v59, %v1655_v58  ;;  %v1764_v7 = vmul.f32 %v1748_v62, %v4232_v21  ;;  %v1708_v10 = vpop.permute.xlu0 %1707  ;;  %3472 = vmatprep.subr.bf16.mxu0 %v3828_v15  ;;  %v1771_v17 = vadd.f32 %v1763_v47, %v1755_v5 }
 0x677   : > { %v1749_v1 = vsel %vm1626_vm2, %v1708_v10, %v1732_v33 }
 0x678   : > { %v1772_v18 = vadd.f32 %v1764_v7, %v1756_v9  ;;  %v1765_v19 = vmul.f32 %v1749_v1, %v4244_v26  ;;  %v1710_v20 = vpop.permute.xlu1 %1709 }
 0x679   : > { %v1750_v22 = vsel %vm1626_vm2, %v1710_v20, %v1734_v34 }
 0x67a   : > { %v1766_v27 = vmul.f32 %v1750_v22, %v4232_v21  ;;  %v1591_v28 = vpop.permute.xlu0 %1590  ;;  %v1801_v29 = vpack.c.bf16 %v1772_v18, %v1771_v17  ;;  %v1773_v30 = vadd.f32 %v1765_v19, %v1757_v11 }
 0x67c   : > { %v1774_v31 = vadd.f32 %v1766_v27, %v1758_v12  ;;  %3469 = vmatmul.mubr.msk.bf16.vlgmr.msra.gmra.mrb[20].mxu0 %vm1803_vm3, %v1796_v25  ;;  %v1593_v32 = vpop.permute.xlu1 %1592  ;;  %v1902_v33 = vsel %vm1803_vm3, %v1801_v29, 0 }
 0x67d   : > { %3473 = vmatpush3.bf16.xpose.msra.mxu0 %v1902_v33  ;;  %3474 = vmatprep.mubr.msk.bf16.mxu0 %vm3829_vm1, %v3828_v15 }
 0x67e   : > { %v1615_v34 = vpop.permute.xlu0 %1614  ;;  %v1802_v13 = vpack.c.bf16 %v1774_v31, %v1773_v30  ;;  %3484 = vmatprep.subr.bf16.mxu0 %v3828_v15 }
 0x67f   : > { %v1633_v0 = vsel %vm1626_vm2, %v1591_v28, %v1615_v34 }
 0x680   : > { %v1649_v35 = vmul.f32 %v1633_v0, %v4244_v26  ;;  %v1617_v36 = vpop.permute.xlu1 %1616  ;;  %v1949_v61 = vsel %vm1803_vm3, %v1802_v13, 0 }
 0x681   : > { %v1634_v25 = vsel %vm1626_vm2, %v1593_v32, %v1617_v36  ;;  %3479 = vmatpush3.bf16.xpose.msra.mxu1 %v1949_v61 }
 0x682   : > { %v1650_v38 = vmul.f32 %v1634_v25, %v4232_v21  ;;  %3490 = vmatprep.subr.bf16.mxu1 %v3828_v15  ;;  %v1657_v39 = vadd.f32 %v1649_v35, %v1641_v37 }
 0x684   : > { %v1658_v40 = vadd.f32 %v1650_v38, %v1642_v63  ;;  %3475 = vmatmul.mubr.msk.bf16.vlgmr.msra.gmra.mrb[24].mxu0 %vm1803_vm3, %v1797_v2 }
 0x685   : > { %3485 = vmatpush3.bf16.msra.mxu0 %v2092_v54  ;;  %3486 = vmatprep.mubr.msk.bf16.mxu0 %vm3829_vm1, %v3828_v15 }
 0x686   : > { %v1798_v26 = vpack.c.bf16 %v1658_v40, %v1657_v39  ;;  %3496 = vmatprep.subr.bf16.mxu0 %v3828_v15 }
 0x688   : > { %3481 = vmatmul.mubr.msk.bf16.vlgmr.msra.gmra.mrb[4].mxu1 %vm1803_vm3, %v1798_v26 }
 0x689   : > { %3492 = vmatprep.mubr.msk.bf16.mxu1 %vm3829_vm1, %v3828_v15 }
 0x6e6   : > { %v1844_v14 = vpop.f32.mrb[16].mxu0 }
 0x6e7   : > { %v1992_v16 = vmul.f32 0.25, %v1844_v14  ;;  %v3464_v21 = vpop.f32.mrb[17].mxu0 }
 0x6e8   : > { %v1847_v23 = vpop.f32.mrb[18].mxu0 }
 0x6e9   : > { %v1993_v24 = vmul.f32 0.25, %v1847_v23  ;;  %v3465_v41 = vpop.f32.mrb[19].mxu0  ;;  %v2000_v51 = vsel %vm1803_vm3, %v1992_v16, -inf }
 0x6ea   : > { %2001 = vmax.xlane.f32.xlu0 %v2000_v51 }
 0x6eb   : > { %v2003_v53 = vsel %vm1803_vm3, %v1993_v24, -inf }
 0x6ec   : > { %2004 = vmax.xlane.f32.xlu1 %v2003_v53 }
 0x74f   : > { %v1891_v54 = vpop.f32.mrb[20].mxu0 }
 0x750   : > { %v1994_v42 = vmul.f32 0.25, %v1891_v54  ;;  %v3470_v43 = vpop.f32.mrb[21].mxu0 }
 0x751   : > { %v1894_v44 = vpop.f32.mrb[22].mxu0 }
 0x752   : > { %v1995_v45 = vmul.f32 0.25, %v1894_v44  ;;  %v3471_v46 = vpop.f32.mrb[23].mxu0  ;;  %v2006_v48 = vsel %vm1803_vm3, %v1994_v42, -inf }
 0x753   : > { %2007 = vmax.xlane.f32.xlu0 %v2006_v48 }
 0x754   : > { %v2009_v50 = vsel %vm1803_vm3, %v1995_v45, -inf }
 0x757   : > { %2010 = vmax.xlane.f32.xlu0 %v2009_v50  ;;  %v1938_v3 = vpop.f32.mrb[24].mxu0 }
 0x758   : > { %v1996_v4 = vmul.f32 0.25, %v1938_v3  ;;  %v3476_v52 = vpop.f32.mrb[25].mxu0 }
 0x759   : > { %v1941_v55 = vpop.f32.mrb[26].mxu0 }
 0x75a   : > { %v4355_v57 = vmul.f32 0.25, %v1941_v55  ;;  %v3477_v58 = vpop.f32.mrb[27].mxu0  ;;  %v2012_v59 = vsel %vm1803_vm3, %v1996_v4, -inf }
 0x75b   : > { %v1985_v47 = vpop.f32.mrb[4].mxu1  ;;  %2013 = vmax.xlane.f32.xlu0 %v2012_v59 }
 0x75c   : > { %v1998_v49 = vmul.f32 0.25, %v1985_v47  ;;  %v3482_v60 = vpop.f32.mrb[5].mxu1  ;;  %v2015_v62 = vsel %vm1803_vm3, %v4355_v57, -inf }
 0x75d   : > { %v1988_v5 = vpop.f32.mrb[6].mxu1  ;;  %2016 = vmax.xlane.f32.xlu1 %v2015_v62 }
 0x75e   : > { %v1999_v9 = vmul.f32 0.25, %v1988_v5  ;;  %v3483_v2 = vpop.f32.mrb[7].mxu1  ;;  %v2018_v7 = vsel %vm1803_vm3, %v1998_v49, -inf }
 0x75f   : > { %2019 = vmax.xlane.f32.xlu0 %v2018_v7 }
 0x760   : > { %v2021_v10 = vsel %vm1803_vm3, %v1999_v9, -inf }
 0x761   : > { %2022 = vmax.xlane.f32.xlu1 %v2021_v10 }
 0x777   : > { %v2002_v1 = vpop.xlane.xlu0 %2001 }
 0x778   : > { %v2024_v17 = vsub.f32 %v1992_v16, %v2002_v1 }
 0x779   : > { %v2005_v18 = vpop.xlane.xlu1 %2004 }
 0x77a   : > { %v2032_v19 = vmul.f32 1.442695, %v2024_v17  ;;  %v2025_v20 = vsub.f32 %v1993_v24, %v2005_v18 }
 0x77c   : > { %3713 = vpow2.f32 %v2032_v19  ;;  %v2034_v22 = vmul.f32 1.442695, %v2025_v20 }
 0x77e   : > { %3715 = vpow2.f32 %v2034_v22 }
 0x786   : > { %v3714_v11 = vpop.eup %3713 }
 0x787   : > { %v2048_v12 = vsel %vm1803_vm3, %v3714_v11, 0.0 }
 0x788   : > { %v3716_v27 = vpop.eup %3715  ;;  %2049 = vadd.xlane.f32.xlu0 %v2048_v12 }
 0x789   : > { %v2051_v28 = vsel %vm1803_vm3, %v3716_v27, 0.0 }
 0x78a   : > { %2052 = vadd.xlane.f32.xlu1 %v2051_v28 }
 0x7e0   : > { %v2008_v29 = vpop.xlane.xlu0 %2007 }
 0x7e1   : > { %v2026_v30 = vsub.f32 %v1994_v42, %v2008_v29 }
 0x7e3   : > { %v2036_v31 = vmul.f32 1.442695, %v2026_v30 }
 0x7e4   : > { %v2011_v32 = vpop.xlane.xlu0 %2010 }
 0x7e5   : > { %3717 = vpow2.f32 %v2036_v31  ;;  %v2027_v33 = vsub.f32 %v1995_v45, %v2011_v32 }
 0x7e7   : > { %v2038_v34 = vmul.f32 1.442695, %v2027_v33 }
 0x7e8   : > { %v2014_v13 = vpop.xlane.xlu0 %2013 }
 0x7e9   : > { %3719 = vpow2.f32 %v2038_v34  ;;  %v2028_v0 = vsub.f32 %v1996_v4, %v2014_v13 }
 0x7ea   : > { %v2017_v35 = vpop.xlane.xlu1 %2016 }
 0x7eb   : > { %v2040_v25 = vmul.f32 1.442695, %v2028_v0  ;;  %v2029_v43 = vsub.f32 %v4355_v57, %v2017_v35 }
 0x7ec   : > { %v2020_v36 = vpop.xlane.xlu0 %2019 }
 0x7ed   : > { %v2030_v61 = vsub.f32 %v1998_v49, %v2020_v36  ;;  %v2042_v46 = vmul.f32 1.442695, %v2029_v43 }
 0x7ee   : > { %v2023_v37 = vpop.xlane.xlu1 %2022 }
 0x7ef   : > { %v3718_v63 = vpop.eup %3717  ;;  %v2044_v38 = vmul.f32 1.442695, %v2030_v61  ;;  %v2031_v39 = vsub.f32 %v1999_v9, %v2023_v37 }
 0x7f0   : > { %v2054_v40 = vsel %vm1803_vm3, %v3718_v63, 0.0 }
 0x7f1   : > { %3721 = vpow2.f32 %v2044_v38  ;;  %v2046_v26 = vmul.f32 1.442695, %v2031_v39  ;;  %2055 = vadd.xlane.f32.xlu0 %v2054_v40 }
 0x7f2   : > { %3723 = vpow2.f32 %v2040_v25 }
 0x7f3   : > { %v3720_v14 = vpop.eup %3719  ;;  %3725 = vpow2.f32 %v2046_v26 }
 0x7f4   : > { %v2057_v16 = vsel %vm1803_vm3, %v3720_v14, 0.0 }
 0x7f5   : > { %2058 = vadd.xlane.f32.xlu1 %v2057_v16  ;;  %v3676_v16 = vld [vmem:[%s4610_s11 + $0x8] sm:$0xff]  }
 0x7fb   : > { %v4366_v21 = vpop.eup %3721 }
 0x7fc   : > { %v4368_v23 = vpop.eup %3723  ;;  %v2066_v24 = vsel %vm1803_vm3, %v4366_v21, 0.0 }
 0x7fd   : > { %v3726_v41 = vpop.eup %3725  ;;  %2067 = vadd.xlane.f32.xlu0 %v2066_v24  ;;  %v2060_v53 = vsel %vm1803_vm3, %v4368_v23, 0.0 }
 0x7fe   : > { %v2069_v51 = vsel %vm1803_vm3, %v3726_v41, 0.0 }
 0x7ff   : > { %2070 = vadd.xlane.f32.xlu1 %v2069_v51 }
 0x801   : > { %2061 = vadd.xlane.f32.xlu0 %v2060_v53 }
 0x810   : > { %3635 = vrot.lane.b32.xlu1 %v4153_v56, %s3831_s1  ;;  %s4613_s1 = sld [smem:[#allocation4_spill]] }
 0x815   : > { %v2050_v54 = vpop.xlane.xlu0 %2049 }
 0x816   : > { %3727 = vrcp.f32 %v2050_v54 }
 0x817   : > { %3630 = vrot.lane.b32.xlu0 %v4153_v56, %s3830_s28  ;;  %v2053_v42 = vpop.xlane.xlu1 %2052  ;;  %s4612_s28 = sld [smem:[#allocation6_spill]] }
 0x818   : > { %3729 = vrcp.f32 %v2053_v42 }
 0x819   : > { %3731 = vpow2.f32 %v2042_v46 }
 0x820   : > { %v3728_v44 = vpop.eup %3727 }
 0x821   : > { %v2080_v48 = vmul.f32 %v3728_v44, %v3714_v11 }
 0x822   : > { %v3730_v45 = vpop.eup %3729 }
 0x823   : > { %v2081_v50 = vmul.f32 %v3730_v45, %v3716_v27  ;;  %v3732_v4 = vpop.eup %3731 }
 0x824   : > { %v2063_v52 = vsel %vm1803_vm3, %v3732_v4, 0.0 }
 0x825   : > { %v2088_v3 = vpack.c.bf16 %v2081_v50, %v2080_v48 }
 0x827   : > { %3487 = vmatmul.mubr.msk.bf16.vlgmr.msra.gmra.mrb[28].mxu0 %vm1803_vm3, %v2088_v3 }
 0x828   : > { %3498 = vmatprep.mubr.msk.bf16.mxu0 %vm3829_vm1, %v3828_v15 }
 0x834   : > { %2064 = vadd.xlane.f32.xlu1 %v2063_v52 }
 0x845   : > { %3640 = vrot.lane.b32.xlu1 %v4153_v56, %s3832_s2  ;;  %s4614_s2 = sld [smem:[#allocation5_spill]] }
 0x87e   : > { %v2056_v57 = vpop.xlane.xlu0 %2055 }
 0x882   : > { %v2059_v55 = vpop.xlane.xlu1 %2058 }
 0x883   : > { %3733 = vrcp.f32 %v2059_v55 }
 0x884   : > { %3735 = vrcp.f32 %v2056_v57 }
 0x88a   : > { %v2068_v58 = vpop.xlane.xlu0 %2067 }
 0x88c   : > { %v2071_v59 = vpop.xlane.xlu1 %2070 }
 0x88d   : > { %v3734_v60 = vpop.eup %3733  ;;  %3737 = vrcp.f32 %v2071_v59 }
 0x88e   : > { %v2062_v47 = vpop.xlane.xlu0 %2061  ;;  %v3736_v2 = vpop.eup %3735  ;;  %v2083_v17 = vmul.f32 %v3734_v60, %v3720_v14  ;;  %3739 = vrcp.f32 %v2068_v58 }
 0x88f   : > { %v2082_v56 = vmul.f32 %v3736_v2, %v3718_v63  ;;  %3741 = vrcp.f32 %v2062_v47  ;;  %v3675_v63 = vld [vmem:[%s4610_s11] sm:$0xff]  }
 0x890   : > { %v3636_v49 = vpop.permute.xlu1 %3635 }
 0x891   : > { %v3638_v62 = vunpack.i.h.bf16 %v3636_v49  ;;  %v3637_v5 = vunpack.i.l.bf16 %v3636_v49  ;;  %v2089_v19 = vpack.c.bf16 %v2083_v17, %v2082_v56 }
 0x892   : > { %v3631_v9 = vpop.permute.xlu0 %3630 }
 0x893   : > { %v2094_v7 = vpack.c.bf16 %v3638_v62, %v3637_v5  ;;  %v3633_v10 = vunpack.i.h.bf16 %v3631_v9  ;;  %v3632_v1 = vunpack.i.l.bf16 %v3631_v9 }
 0x895   : > { %v2093_v18 = vpack.c.bf16 %v3633_v10, %v3632_v1  ;;  %3497 = vmatpush3.bf16.msra.mxu0 %v2094_v7  ;;  %v3290_v10 = vld [vmem:[%s4611_s26] ss:$0 sm:$0xff]  ;;  %s4620_s26 = sld [smem:[#allocation13_spill]] }
 0x896   : > { %3508 = vmatprep.subr.bf16.mxu0 %v3828_v15 }
 0x897   : > { %3491 = vmatpush3.bf16.msra.mxu1 %v2093_v18  ;;  %v3738_v22 = vpop.eup %3737 }
 0x898   : > { %3502 = vmatprep.subr.bf16.mxu1 %v3828_v15  ;;  %v3740_v12 = vpop.eup %3739  ;;  %v2087_v29 = vmul.f32 %v3738_v22, %v3726_v41 }
 0x899   : > { %v2086_v31 = vmul.f32 %v3740_v12, %v4366_v21  ;;  %v3742_v32 = vpop.eup %3741  ;;  %v3677_v21 = vld [vmem:[%s4610_s11 + $0x10] sm:$0xff]  }
 0x89a   : > { %3493 = vmatmul.mubr.msk.bf16.vlgmr.msra.gmra.mrb[8].mxu1 %vm1803_vm3, %v2089_v19  ;;  %v2084_v13 = vmul.f32 %v3742_v32, %v4368_v23  ;;  %v3678_v23 = vld [vmem:[%s4610_s11 + $0x18] sm:$0xff]  }
 0x89b   : > { %3504 = vmatprep.mubr.msk.bf16.mxu1 %vm3829_vm1, %v3828_v15  ;;  %v2091_v33 = vpack.c.bf16 %v2087_v29, %v2086_v31 }
 0x8c1   : > { %v2065_v20 = vpop.xlane.xlu1 %2064 }
 0x8c2   : > { %3743 = vrcp.f32 %v2065_v20 }
 0x8c5   : > { %v3641_v11 = vpop.permute.xlu1 %3640 }
 0x8c6   : > { %v3643_v27 = vunpack.i.h.bf16 %v3641_v11  ;;  %v3642_v28 = vunpack.i.l.bf16 %v3641_v11 }
 0x8c8   : > { %v2095_v30 = vpack.c.bf16 %v3643_v27, %v3642_v28 }
 0x8ca   : > { %3503 = vmatpush3.bf16.msra.mxu1 %v2095_v30 }
 0x8cb   : > { %3520 = vmatprep.subr.bf16.mxu1 %v3828_v15 }
 0x8cc   : > { %v3744_v34 = vpop.eup %3743 }
 0x8cd   : > { %v2085_v0 = vmul.f32 %v3744_v34, %v3732_v4  ;;  %3505 = vmatmul.mubr.msk.bf16.vlgmr.msra.gmra.mrb[12].mxu1 %vm1803_vm3, %v2091_v33 }
 0x8ce   : > { %3524 = vmatprep.mubr.msk.bf16.mxu1 %vm3829_vm1, %v3828_v15 }
 0x8cf   : > { %v2090_v35 = vpack.c.bf16 %v2085_v0, %v2084_v13  ;;  %v3679_v13 = vld [vmem:[%s4612_s28] sm:$0xff]   ;;  %v3680_v0 = vld [vmem:[%s4612_s28 + $0x8] sm:$0xff]  }
 0x8d0   : > { %3521 = vmatpush3.bf16.msra.mxu1 %v3679_v13 }
 0x8d1   : > { %3499 = vmatmul.mubr.msk.bf16.vlgmr.msra.gmra.mrb[32].mxu0 %vm1803_vm3, %v2090_v35  ;;  %3522 = vmatprep.subr.bf16.mxu1 %v3828_v15 }
 0x8d2   : > { %3516 = vmatprep.mubr.msk.bf16.mxu0 %vm3829_vm1, %v3828_v15  ;;  %3509 = vmatpush3.bf16.msra.mxu0 %v3675_v63 }
 0x8d3   : > { %3510 = vmatprep.subr.bf16.mxu0 %v3828_v15 }
 0x8d4   : > { %3523 = vmatpush3.bf16.msra.mxu1 %v3680_v0 }
 0x8d5   : > { %3528 = vmatprep.subr.bf16.mxu1 %v3828_v15 }
 0x8d6   : > { %3511 = vmatpush3.bf16.msra.mxu0 %v3676_v16 }
 0x8d7   : > { %3512 = vmatprep.subr.bf16.mxu0 %v3828_v15 }
 0x8da   : > { %3513 = vmatpush3.bf16.msra.mxu0 %v3677_v21  ;;  %v3292_v21 = vld [vmem:[%s4614_s2] ss:$0 sm:$0xff]  ;;  %s4622_s2 = sld [smem:[#allocation14_spill]] }
 0x8db   : > { %3514 = vmatprep.subr.bf16.mxu0 %v3828_v15 }
 0x8de   : > { %3515 = vmatpush3.bf16.msra.mxu0 %v3678_v23 }
 0x8df   : > { %3536 = vmatprep.subr.bf16.mxu0 %v3828_v15 }
 0x8fa   : > { %v2133_v36 = vpop.f32.mrb[28].mxu0 }
 0x8fb   : > { %v3488_v61 = vpop.f32.mrb[29].mxu0 }
 0x8fc   : > { %v2136_v25 = vpop.f32.mrb[30].mxu0 }
 0x8fd   : > { %v3489_v37 = vpop.f32.mrb[31].mxu0 }
 0x96d   : > { %v2177_v38 = vpop.f32.mrb[8].mxu1 }
 0x96e   : > { %v3494_v39 = vpop.f32.mrb[9].mxu1 }
 0x96f   : > { %v2180_v40 = vpop.f32.mrb[10].mxu1 }
 0x970   : > { %v3644_v26 = vpack.i.bf16 %v2180_v40, %v2177_v38  ;;  %v3495_v14 = vpop.f32.mrb[11].mxu1  ;;  %v3291_v40 = vld [vmem:[%s4613_s1] ss:$0 sm:$0xff]  ;;  %s4621_s1 = sld [smem:[#allocation12_spill]] }
 0x972   : > { %3645 = vrot.lane.b32.xlu1 %v3644_v26, %s3835_s15  ;;  %s4617_s15 = sld [smem:[#allocation7_spill]] }
 0x9a0   : > { %v2265_v24 = vpop.f32.mrb[12].mxu1 }
 0x9a1   : > { %v3506_v41 = vpop.f32.mrb[13].mxu1 }
 0x9a2   : > { %v2268_v51 = vpop.f32.mrb[14].mxu1 }
 0x9a3   : > { %v3654_v53 = vpack.i.bf16 %v2268_v51, %v2265_v24  ;;  %v3507_v54 = vpop.f32.mrb[15].mxu1  ;;  %v3681_v51 = vld [vmem:[%s4615_s7] sm:$0xff]  }
 0x9a4   : > { %v2221_v42 = vpop.f32.mrb[32].mxu0  ;;  %v3682_v54 = vld [vmem:[%s4615_s7 + $0x8] sm:$0xff]  }
 0x9a5   : > { %3655 = vrot.lane.b32.xlu1 %v3654_v53, %s3836_s16  ;;  %v3500_v43 = vpop.f32.mrb[33].mxu0  ;;  %s4618_s16 = sld [smem:[#allocation10_spill]] }
 0x9a6   : > { %v2224_v44 = vpop.f32.mrb[34].mxu0 }
 0x9a7   : > { %v3649_v45 = vpack.i.bf16 %v2224_v44, %v2221_v42  ;;  %v3501_v46 = vpop.f32.mrb[35].mxu0 }
 0x9a8   : > { %v3297_v46 = vld [vmem:[%s4616_s10] ss:$0 sm:$0xff]  ;;  %s4623_s10 = sld [smem:[#allocation17_spill]] }
 0x9a9   : > { %3650 = vrot.lane.b32.xlu0 %v3649_v45, %s3837_s18  ;;  %s4619_s18 = sld [smem:[#allocation11_spill]] }
 0x9ab   : > { %v3305_v13 = vld [vmem:[%s4618_s16 + $0x1] ss:$0 sm:$0xff] }
 0x9af   : > { %v3303_v0 = vld [vmem:[%s4619_s18] ss:$0 sm:$0xff]  ;;  %s4625_s18 = sld [smem:[#allocation16_spill]] }
 0x9e4   : > { %v3646_v48 = vpop.permute.xlu1 %3645 }
 0x9e5   : > { %v3648_v50 = vunpack.i.h.bf16 %v3646_v48  ;;  %v3647_v3 = vunpack.i.l.bf16 %v3646_v48 }
 0x9e7   : > { %v2296_v58 = vsel %vm1803_vm3, %v2133_v36, %v3647_v3  ;;  %v2297_v59 = vsel %vm1803_vm3, %v2136_v25, %v3648_v50 }
 0xa17   : > { %v3656_v4 = vpop.permute.xlu1 %3655 }
 0xa18   : > { %v3658_v47 = vunpack.i.h.bf16 %v3656_v4  ;;  %v3657_v49 = vunpack.i.l.bf16 %v3656_v4 }
 0xa1b   : > { %v3651_v52 = vpop.permute.xlu0 %3650 }
 0xa1c   : > { %v3653_v55 = vunpack.i.h.bf16 %v3651_v52  ;;  %v3652_v57 = vunpack.i.l.bf16 %v3651_v52 }
 0xa1e   : > { %v2299_v60 = vsel %vm1076_vm0, %v2297_v59, %v3653_v55  ;;  %v2298_v62 = vsel %vm1076_vm0, %v2296_v58, %v3652_v57 }
 0xa1f   : > { %v2302_v5 = vsel %vm2300_vm4, %v2299_v60, %v3658_v47  ;;  %v2301_v9 = vsel %vm2300_vm4, %v2298_v62, %v3657_v49  ;;  %v2589_v62 = vlaneseq }
 0xa20   : > { %v2311_v2 = vpack.c.bf16 %v2302_v5, %v2301_v9  ;;  %v3293_v5 = vld [vmem:[%s4617_s15] ss:$0 sm:$0xff]  ;;  %s4624_s15 = sld [smem:[#allocation15_spill]] }
 0xa21   : > { %v4448_v9 = vshrl.u32 %v2589_v62, 7 }
 0xa22   : > { %3517 = vmatmul.mubr.msk.bf16.vlgmr.msra.gmra.mrb[36].mxu0 %vm2336_vm5, %v2311_v2 }
 0xa23   : > { %3544 = vmatprep.mubr.msk.bf16.mxu0 %vm3829_vm1, %v3828_v15  ;;  %vm2601_vm6 = vcmp.lt.s32.totalorder %v4448_v9, 3  ;;  %vm2620_vm7 = vcmp.lt.s32.totalorder %v4448_v9, 2  ;;  %vm2639_vm8 = vcmp.lt.s32.totalorder %v4448_v9, 1  ;;  %vm2668_vm9 = vcmp.lt.s32.totalorder %v4448_v9, 7 }
 0xa24   : > { %vm2687_vm10 = vcmp.lt.s32.totalorder %v4448_v9, 6  ;;  %vm2706_vm11 = vcmp.lt.s32.totalorder %v4448_v9, 5  ;;  %vm2604_vm12 = vcmp.ge.s32.totalorder %v4448_v9, 3  ;;  %vm2623_vm14 = vcmp.ge.s32.totalorder %v4448_v9, 2 }
 0xa25   : > { %vm2642_vm2 = vcmp.ge.s32.totalorder %v4448_v9, 1 }
 0xaf5   : > { %v2374_v7 = vpop.f32.mrb[36].mxu0 }
 0xaf6   : > { %v2381_v1 = vadd.f32 %v2374_v7, %v4085_v6  ;;  %v3518_v17 = vpop.f32.mrb[37].mxu0 }
 0xaf7   : > { %v2377_v18 = vpop.f32.mrb[38].mxu0  ;;  %v4453_v17 = vadd.s32 8, %v4448_v9 }
 0xaf8   : > { %v4417_v56 = vadd.f32 %v3290_v10, %v2381_v1  ;;  %v2382_v19 = vadd.f32 %v2377_v18, %v4088_v8  ;;  %v3519_v20 = vpop.f32.mrb[39].mxu0 }
 0xaf9   : > { %vm2672_vm13 = vcmp.lt.s32.totalorder %v4453_v17, 15  ;;  %vm2691_vm15 = vcmp.lt.s32.totalorder %v4453_v17, 14  ;;  %vm2710_vm3 = vcmp.lt.s32.totalorder %v4453_v17, 13 }
 0xafa   : > { %v4420_v22 = vadd.f32 %v3290_v10, %v2382_v19  ;;  %v2394_v11 = vsel %vm1076_vm0, %v4417_v56, 0.0 }
 0xafb   : > { %2395 = vadd.xlane.f32.xlu0 %v2394_v11 }
 0xafc   : > { %v2397_v12 = vsel %vm1076_vm0, %v4420_v22, 0.0 }
 0xafd   : > { %2398 = vadd.xlane.f32.xlu1 %v2397_v12 }
 0xb88   : > { %v2396_v6 = vpop.xlane.xlu0 %2395 }
 0xb89   : > { %v2400_v27 = vmul.f32 0.03125, %v2396_v6 }
 0xb8a   : > { %v2399_v28 = vpop.xlane.xlu1 %2398 }
 0xb8b   : > { %v2402_v29 = vsub.f32 %v4417_v56, %v2400_v27  ;;  %v2401_v30 = vmul.f32 0.03125, %v2399_v28  ;;  %v3304_v27 = vld [vmem:[%s4618_s16] ss:$0 sm:$0xff] }
 0xb8d   : > { %v2403_v8 = vsub.f32 %v4420_v22, %v2401_v30  ;;  %v2404_v31 = vmul.f32 %v2402_v29, %v2402_v29 }
 0xb8f   : > { %v2406_v32 = vsel %vm1076_vm0, %v2404_v31, 0.0  ;;  %v2405_v33 = vmul.f32 %v2403_v8, %v2403_v8 }
 0xb90   : > { %2407 = vadd.xlane.f32.xlu0 %v2406_v32 }
 0xb91   : > { %v2409_v34 = vsel %vm1076_vm0, %v2405_v33, 0.0 }
 0xb94   : > { %2410 = vadd.xlane.f32.xlu0 %v2409_v34 }
 0xc1d   : > { %v2408_v35 = vpop.xlane.xlu0 %2407 }
 0xc1e   : > { %v2412_v36 = vmul.f32 0.03125, %v2408_v35 }
 0xc20   : > { %v2414_v61 = vadd.f32 1e-05, %v2412_v36 }
 0xc21   : > { %v2411_v25 = vpop.xlane.xlu0 %2410 }
 0xc22   : > { %3745 = vrsqrt.f32 %v2414_v61  ;;  %v2413_v37 = vmul.f32 0.03125, %v2411_v25 }
 0xc24   : > { %v2415_v63 = vadd.f32 1e-05, %v2413_v37  ;;  %v3306_v37 = vld [vmem:[%s4618_s16 + $0x2] ss:$0 sm:$0xff] }
 0xc26   : > { %3747 = vrsqrt.f32 %v2415_v63 }
 0xc2c   : > { %v3746_v38 = vpop.eup %3745 }
 0xc2d   : > { %v2418_v39 = vmul.f32 %v3746_v38, %v2402_v29 }
 0xc2f   : > { %v2426_v14 = vmul.f32 %v3291_v40, %v2418_v39 }
 0xc30   : > { %v3748_v26 = vpop.eup %3747 }
 0xc31   : > { %v2419_v16 = vmul.f32 %v3748_v26, %v2403_v8  ;;  %v2434_v24 = vadd.f32 %v3292_v21, %v2426_v14 }
 0xc33   : > { %v2427_v23 = vmul.f32 %v3291_v40, %v2419_v16 }
 0xc35   : > { %v2435_v41 = vadd.f32 %v3292_v21, %v2427_v23 }
 0xc37   : > { %v2440_v53 = vpack.c.bf16 %v2435_v41, %v2434_v24 }
 0xc39   : > { %3525 = vmatmul.mubr.msk.bf16.vlgmr.msra.gmra.mrb[16].mxu1 %vm1076_vm0, %v2440_v53 }
 0xc3a   : > { %3529 = vmatpush3.bf16.msra.mxu1 %v3681_v51  ;;  %3532 = vmatprep.mubr.msk.bf16.mxu1 %vm3829_vm1, %v3828_v15 }
 0xc3b   : > { %3530 = vmatprep.subr.bf16.mxu1 %v3828_v15 }
 0xc3e   : > { %3531 = vmatpush3.bf16.msra.mxu1 %v3682_v54 }
 0xc3f   : > { %3548 = vmatprep.subr.bf16.mxu1 %v3828_v15 }
 0xc41   : > { %3533 = vmatmul.mubr.msk.bf16.vlgmr.msra.gmra.mrb[20].mxu1 %vm1076_vm0, %v2440_v53 }
 0xc42   : > { %3552 = vmatprep.mubr.msk.bf16.mxu1 %vm3829_vm1, %v3828_v15 }
 0xd0c   : > { %v2497_v42 = vpop.f32.mrb[16].mxu1 }
 0xd0d   : > { %v3526_v43 = vpop.f32.mrb[17].mxu1  ;;  %v2498_v2 = vadd.f32 %v3293_v5, %v2497_v42  ;;  %v3307_v42 = vld [vmem:[%s4618_s16 + $0x3] ss:$0 sm:$0xff] }
 0xd0e   : > { %v2500_v44 = vpop.f32.mrb[18].mxu1  ;;  %v3308_v43 = vld [vmem:[%s4618_s16 + $0x4] ss:$0 sm:$0xff] }
 0xd0f   : > { %v3527_v45 = vpop.f32.mrb[19].mxu1  ;;  %v2501_v10 = vadd.f32 %v3293_v5, %v2500_v44 }
 0xd14   : > { %v2561_v48 = vpop.f32.mrb[20].mxu1 }
 0xd15   : > { %v2562_v50 = vadd.f32 %v3297_v46, %v2561_v48  ;;  %v3534_v3 = vpop.f32.mrb[21].mxu1 }
 0xd16   : > { %v2564_v4 = vpop.f32.mrb[22].mxu1 }
 0xd17   : > { %v3301_v52 = vmul.f32 -1.442695, %v2562_v50  ;;  %v2565_v55 = vadd.f32 %v3297_v46, %v2564_v4  ;;  %v3535_v57 = vpop.f32.mrb[23].mxu1 }
 0xd19   : > { %3749 = vpow2.f32 %v3301_v52  ;;  %v3302_v58 = vmul.f32 -1.442695, %v2565_v55  ;;  %v3309_v55 = vld [vmem:[%s4618_s16 + $0x5] ss:$0 sm:$0xff] }
 0xd1b   : > { %3751 = vpow2.f32 %v3302_v58 }
 0xd23   : > { %v3750_v59 = vpop.eup %3749 }
 0xd24   : > { %v2574_v47 = vadd.f32 1.0, %v3750_v59 }
 0xd25   : > { %v3752_v49 = vpop.eup %3751 }
 0xd26   : > { %3753 = vrcp.f32 %v2574_v47  ;;  %v2575_v60 = vadd.f32 1.0, %v3752_v49 }
 0xd28   : > { %3755 = vrcp.f32 %v2575_v60  ;;  %v3310_v60 = vld [vmem:[%s4618_s16 + $0x6] ss:$0 sm:$0xff] }
 0xd30   : > { %v3754_v7 = vpop.eup %3753 }
 0xd31   : > { %v4450_v1 = vmul.f32 %v3754_v7, %v2498_v2 }
 0xd32   : > { %v3756_v18 = vpop.eup %3755 }
 0xd33   : > { %v2581_v19 = vmul.f32 %v3756_v18, %v2501_v10  ;;  %v2599_v20 = vrot.slane %v4450_v1, 5  ;;  %v2618_v11 = vrot.slane %v4450_v1, 6  ;;  %v2637_v12 = vrot.slane %v4450_v1, 7 }
 0xd34   : > { %v2666_v6 = vrot.slane %v4450_v1, 1  ;;  %v2685_v8 = vrot.slane %v4450_v1, 2  ;;  %v2704_v33 = vrot.slane %v4450_v1, 3  ;;  %v2662_v2 = vmul.f32 %v3307_v42, %v4450_v1 }
 0xd35   : > { %v2600_v28 = vrot.slane %v2581_v19, 5  ;;  %v2619_v29 = vrot.slane %v2581_v19, 6  ;;  %v2638_v30 = vrot.slane %v2581_v19, 7  ;;  %v2667_v31 = vrot.slane %v2581_v19, 1 }
 0xd36   : > { %v2686_v32 = vrot.slane %v2581_v19, 2  ;;  %v2705_v34 = vrot.slane %v2581_v19, 3  ;;  %v2663_v3 = vmul.f32 %v3307_v42, %v2581_v19 }
 0xd37   : > { %v2602_v35 = vsel %vm2601_vm6, %v2599_v20, %v2600_v28  ;;  %v2621_v36 = vsel %vm2620_vm7, %v2618_v11, %v2619_v29  ;;  %v2640_v61 = vsel %vm2639_vm8, %v2637_v12, %v2638_v30  ;;  %v2603_v25 = vsel %vm2601_vm6, %v2600_v28, %v2599_v20 }
 0xd38   : > { %v2615_v63 = vmul.f32 %v3304_v27, %v2602_v35  ;;  %v2670_v38 = vsel %vm2668_vm9, %v2667_v31, %v2666_v6  ;;  %v2689_v39 = vsel %vm2687_vm10, %v2686_v32, %v2685_v8  ;;  %v2708_v40 = vsel %vm2706_vm11, %v2705_v34, %v2704_v33 }
 0xd39   : > { %v2606_v26 = vsel %vm2604_vm12, %v2603_v25, 0.0  ;;  %v2634_v16 = vmul.f32 %v3305_v13, %v2621_v36  ;;  %v2653_v21 = vmul.f32 %v3306_v37, %v2640_v61  ;;  %v2622_v24 = vsel %vm2620_vm7, %v2619_v29, %v2618_v11 }
 0xd3a   : > { %v2617_v14 = vadd.f32 %v3303_v0, %v2615_v63  ;;  %v2614_v23 = vmul.f32 %v3304_v27, %v2606_v26  ;;  %v2625_v51 = vsel %vm2623_vm14, %v2622_v24, 0.0  ;;  %v2641_v53 = vsel %vm2639_vm8, %v2638_v30, %v2637_v12  ;;  %v3685_v24 = vld [vmem:[%s4620_s26 + $0x10] sm:$0xff]  }
 0xd3b   : > { %v2669_v54 = vsel %vm2668_vm9, %v2666_v6, %v2667_v31  ;;  %v2674_v44 = vsel %vm2672_vm13, %v2670_v38, 0.0  ;;  %v2633_v46 = vmul.f32 %v3305_v13, %v2625_v51  ;;  %v2644_v48 = vsel %vm2642_vm2, %v2641_v53, 0.0 }
 0xd3c   : > { %v2636_v41 = vadd.f32 %v2634_v16, %v2617_v14  ;;  %v2616_v45 = vadd.f32 %v3303_v0, %v2614_v23  ;;  %v2688_v4 = vsel %vm2687_vm10, %v2685_v8, %v2686_v32  ;;  %v2707_v52 = vsel %vm2706_vm11, %v2704_v33, %v2705_v34  ;;  %v3684_v23 = vld [vmem:[%s4620_s26 + $0x8] sm:$0xff]  }
 0xd3d   : > { %v2693_v57 = vsel %vm2691_vm15, %v2689_v39, 0.0  ;;  %v2652_v59 = vmul.f32 %v3306_v37, %v2644_v48  ;;  %v2682_v49 = vmul.f32 %v3308_v43, %v2674_v44  ;;  %v2712_v62 = vsel %vm2710_vm3, %v2708_v40, 0.0  ;;  %v3313_v48 = vld [vmem:[%s4621_s1] ss:$0 sm:$0xff]  ;;  %s4626_s1 = sld [smem:[#allocation19_spill]] }
 0xd3e   : > { %v2655_v50 = vadd.f32 %v2653_v21, %v2636_v41  ;;  %v2635_v58 = vadd.f32 %v2633_v46, %v2616_v45  ;;  %v2701_v10 = vmul.f32 %v3309_v55, %v2693_v57  ;;  %v2681_v9 = vmul.f32 %v3308_v43, %v2669_v54  ;;  %v3683_v21 = vld [vmem:[%s4620_s26] sm:$0xff]   ;;  %v3686_v41 = vld [vmem:[%s4620_s26 + $0x18] sm:$0xff]  }
 0xd3f   : > { %v2720_v20 = vmul.f32 %v3310_v60, %v2712_v62  ;;  %v2700_v12 = vmul.f32 %v3309_v55, %v2688_v4  ;;  %v2719_v28 = vmul.f32 %v3310_v60, %v2707_v52  ;;  %3537 = vmatpush3.bf16.msra.mxu0 %v3683_v21 }
 0xd40   : > { %v2665_v47 = vadd.f32 %v2663_v3, %v2655_v50  ;;  %v2654_v5 = vadd.f32 %v2652_v59, %v2635_v58  ;;  %3538 = vmatprep.subr.bf16.mxu0 %v3828_v15  ;;  %v3319_v58 = vld [vmem:[%s4622_s2] ss:$0 sm:$0xff]  ;;  %s4627_s2 = sld [smem:[#allocation18_spill]] }
 0xd42   : > { %v2684_v7 = vadd.f32 %v2682_v49, %v2665_v47  ;;  %v2664_v18 = vadd.f32 %v2662_v2, %v2654_v5 }
 0xd43   : > { %3539 = vmatpush3.bf16.msra.mxu0 %v3684_v23  ;;  %v3694_v21 = vld [vmem:[%s4626_s1 + $0x28] sm:$0xff]   ;;  %v3695_v23 = vld [vmem:[%s4626_s1 + $0x30] sm:$0xff]  }
 0xd44   : > { %v2703_v19 = vadd.f32 %v2701_v10, %v2684_v7  ;;  %v2683_v11 = vadd.f32 %v2681_v9, %v2664_v18  ;;  %3540 = vmatprep.subr.bf16.mxu0 %v3828_v15 }
 0xd46   : > { %v2722_v6 = vadd.f32 %v2720_v20, %v2703_v19  ;;  %v2702_v27 = vadd.f32 %v2700_v12, %v2683_v11 }
 0xd47   : > { %3541 = vmatpush3.bf16.msra.mxu0 %v3685_v24  ;;  %v3696_v24 = vld [vmem:[%s4626_s1 + $0x38] sm:$0xff]  }
 0xd48   : > { %v3312_v29 = vmul.f32 -1.442695, %v2722_v6  ;;  %v2721_v30 = vadd.f32 %v2719_v28, %v2702_v27  ;;  %3542 = vmatprep.subr.bf16.mxu0 %v3828_v15  ;;  %v3687_v28 = vld [vmem:[%s4623_s10] sm:$0xff]  }
 0xd49   : > { %3549 = vmatpush3.bf16.msra.mxu1 %v3687_v28 }
 0xd4a   : > { %3757 = vpow2.f32 %v3312_v29  ;;  %v3311_v8 = vmul.f32 -1.442695, %v2721_v30  ;;  %v3688_v29 = vld [vmem:[%s4623_s10 + $0x8] sm:$0xff]   ;;  %3550 = vmatprep.subr.bf16.mxu1 %v3828_v15 }
 0xd4b   : > { %3543 = vmatpush3.bf16.msra.mxu0 %v3686_v41  ;;  %v3322_v41 = vld [vmem:[%s4627_s2] ss:$0 sm:$0xff] }
 0xd4c   : > { %3759 = vpow2.f32 %v3311_v8 }
 0xd4d   : > { %3551 = vmatpush3.bf16.msra.mxu1 %v3688_v29 }
 0xd4e   : > { %3556 = vmatprep.subr.bf16.mxu1 %v3828_v15 }
 0xd54   : > { %v3758_v17 = vpop.eup %3757 }
 0xd55   : > { %v2730_v31 = vadd.f32 1.0, %v3758_v17 }
 0xd56   : > { %v3760_v32 = vpop.eup %3759 }
 0xd57   : > { %3761 = vrcp.f32 %v2730_v31  ;;  %v2729_v1 = vadd.f32 1.0, %v3760_v32 }
 0xd59   : > { %3763 = vrcp.f32 %v2729_v1 }
 0xd61   : > { %v3762_v33 = vpop.eup %3761 }
 0xd62   : > { %v2736_v34 = vmul.f32 %v3762_v33, %v2722_v6 }
 0xd63   : > { %v3764_v13 = vpop.eup %3763 }
 0xd64   : > { %v2740_v0 = vsel %vm2336_vm5, %v2736_v34, 0.0  ;;  %v2735_v35 = vmul.f32 %v3764_v13, %v2721_v30 }
 0xd65   : > { %2741 = vadd.xlane.f32.xlu1 %v2740_v0 }
 0xd66   : > { %v2737_v36 = vsel %vm2336_vm5, %v2735_v35, 0.0 }
 0xd67   : > { %2738 = vadd.xlane.f32.xlu0 %v2737_v36 }
 0xdf2   : > { %v2742_v61 = vpop.xlane.xlu1 %2741 }
 0xdf3   : > { %v2745_v25 = vmul.f32 0.015625, %v2742_v61  ;;  %v3321_v61 = vld [vmem:[%s4625_s18] ss:$0 sm:$0xff] }
 0xdf4   : > { %v2739_v63 = vpop.xlane.xlu0 %2738 }
 0xdf5   : > { %v2747_v37 = vsub.f32 %v2736_v34, %v2745_v25  ;;  %v2744_v38 = vmul.f32 0.015625, %v2739_v63  ;;  %v3320_v34 = vld [vmem:[%s4624_s15] ss:$0 sm:$0xff]  ;;  %s1070_s15 = scalar_lea.vmem %s4021_s30, %s3341_s0 }
 0xdf7   : > { %v2749_v39 = vmul.f32 %v2747_v37, %v2747_v37  ;;  %v2746_v40 = vsub.f32 %v2735_v35, %v2744_v38 }
 0xdf9   : > { %v2753_v26 = vsel %vm2336_vm5, %v2749_v39, 0.0  ;;  %v2748_v14 = vmul.f32 %v2746_v40, %v2746_v40  ;;  %v3689_v39 = vld [vmem:[%s4626_s1] sm:$0xff]  }
 0xdfa   : > { %2754 = vadd.xlane.f32.xlu1 %v2753_v26  ;;  %v3691_v26 = vld [vmem:[%s4626_s1 + $0x10] sm:$0xff]  }
 0xdfb   : > { %v2750_v16 = vsel %vm2336_vm5, %v2748_v14, 0.0  ;;  %v3692_v14 = vld [vmem:[%s4626_s1 + $0x18] sm:$0xff]  }
 0xdfc   : > { %2751 = vadd.xlane.f32.xlu0 %v2750_v16  ;;  %v3693_v16 = vld [vmem:[%s4626_s1 + $0x20] sm:$0xff]  }
 0xe87   : > { %v2755_v51 = vpop.xlane.xlu1 %2754 }
 0xe88   : > { %v2757_v53 = vmul.f32 0.015625, %v2755_v51 }
 0xe89   : > { %v2752_v42 = vpop.xlane.xlu0 %2751 }
 0xe8a   : > { %v2759_v54 = vmax.f32 %v2757_v53, 1e-06  ;;  %v2756_v43 = vmul.f32 0.015625, %v2752_v42 }
 0xe8c   : > { %3765 = vrsqrt.f32 %v2759_v54  ;;  %v2758_v44 = vmax.f32 %v2756_v43, 1e-06 }
 0xe8e   : > { %3767 = vrsqrt.f32 %v2758_v44 }
 0xe96   : > { %v3766_v45 = vpop.eup %3765 }
 0xe97   : > { %v2763_v46 = vmul.f32 %v3766_v45, %v2747_v37 }
 0xe98   : > { %v3768_v50 = vpop.eup %3767 }
 0xe99   : > { %v2762_v3 = vmul.f32 %v3768_v50, %v2746_v40  ;;  %v2772_v4 = vmul.f32 %v3313_v48, %v2763_v46  ;;  %v3690_v40 = vld [vmem:[%s4626_s1 + $0x8] sm:$0xff]  }
 0xe9b   : > { %v2771_v52 = vmul.f32 %v3313_v48, %v2762_v3 }
 0xe9d   : > { %v2781_v55 = vpack.c.bf16 %v2772_v4, %v2771_v52 }
 0xe9f   : > { %3545 = vmatmul.mubr.msk.bf16.vlgmr.msra.gmra.mrb[40].mxu0 %vm2336_vm5, %v2781_v55 }
 0xf72   : > { %v2843_v57 = vpop.f32.mrb[40].mxu0 }
 0xf73   : > { %v2850_v59 = vadd.f32 %v2843_v57, %v4417_v56  ;;  %v3546_v47 = vpop.f32.mrb[41].mxu0 }
 0xf74   : > { %v2846_v49 = vpop.f32.mrb[42].mxu0 }
 0xf75   : > { %v4529_v60 = vadd.f32 %v3319_v58, %v2850_v59  ;;  %v2851_v62 = vadd.f32 %v2846_v49, %v4420_v22  ;;  %v3547_v5 = vpop.f32.mrb[43].mxu0  ;;  %v3328_v59 = vld [vmem:[%s4006_s27] ss:$0 sm:$0xff] }
 0xf77   : > { %v4532_v2 = vadd.f32 %v3319_v58, %v2851_v62  ;;  %v2863_v7 = vsel %vm1076_vm0, %v4529_v60, 0.0 }
 0xf78   : > { %2864 = vadd.xlane.f32.xlu0 %v2863_v7 }
 0xf79   : > { %v2866_v10 = vsel %vm1076_vm0, %v4532_v2, 0.0 }
 0xf7a   : > { %2867 = vadd.xlane.f32.xlu1 %v2866_v10 }
0x1005   : > { %v2865_v56 = vpop.xlane.xlu0 %2864 }
0x1006   : > { %v2869_v18 = vmul.f32 0.03125, %v2865_v56 }
0x1007   : > { %v2868_v9 = vpop.xlane.xlu1 %2867 }
0x1008   : > { %v2871_v19 = vsub.f32 %v4529_v60, %v2869_v18  ;;  %v2870_v20 = vmul.f32 0.03125, %v2868_v9 }
0x100a   : > { %v2872_v22 = vsub.f32 %v4532_v2, %v2870_v20  ;;  %v2873_v11 = vmul.f32 %v2871_v19, %v2871_v19 }
0x100c   : > { %v2875_v12 = vsel %vm1076_vm0, %v2873_v11, 0.0  ;;  %v2874_v6 = vmul.f32 %v2872_v22, %v2872_v22 }
0x100d   : > { %2876 = vadd.xlane.f32.xlu0 %v2875_v12 }
0x100e   : > { %v2878_v27 = vsel %vm1076_vm0, %v2874_v6, 0.0 }
0x100f   : > { %2879 = vadd.xlane.f32.xlu1 %v2878_v27 }
0x109a   : > { %v2877_v30 = vpop.xlane.xlu0 %2876 }
0x109b   : > { %v2881_v8 = vmul.f32 0.03125, %v2877_v30 }
0x109c   : > { %v2880_v17 = vpop.xlane.xlu1 %2879 }
0x109d   : > { %v2883_v31 = vadd.f32 1e-05, %v2881_v8  ;;  %v2882_v32 = vmul.f32 0.03125, %v2880_v17 }
0x109f   : > { %3769 = vrsqrt.f32 %v2883_v31  ;;  %v2884_v1 = vadd.f32 1e-05, %v2882_v32 }
0x10a1   : > { %3771 = vrsqrt.f32 %v2884_v1 }
0x10a9   : > { %v3770_v33 = vpop.eup %3769 }
0x10aa   : > { %v2887_v13 = vmul.f32 %v3770_v33, %v2871_v19 }
0x10ab   : > { %v3772_v0 = vpop.eup %3771 }
0x10ac   : > { %v2895_v35 = vmul.f32 %v3320_v34, %v2887_v13  ;;  %v2888_v36 = vmul.f32 %v3772_v0, %v2872_v22  ;;  %v3337_v0 = vld [vmem:[%s4011_s4] ss:$0 sm:$0xff] }
0x10ae   : > { %v2896_v25 = vmul.f32 %v3320_v34, %v2888_v36  ;;  %v2903_v37 = vadd.f32 %v3321_v61, %v2895_v35 }
0x10b0   : > { %v2904_v63 = vadd.f32 %v3321_v61, %v2896_v25  ;;  %v3338_v61 = vld [vmem:[%s4016_s6] ss:$0 sm:$0xff] }
0x10b2   : > { %v2909_v38 = vpack.c.bf16 %v2904_v63, %v2903_v37 }
0x10b4   : > { %3553 = vmatmul.mubr.msk.bf16.vlgmr.msra.gmra.mrb[24].mxu1 %vm1076_vm0, %v2909_v38 }
0x10b5   : > { %3572 = vmatprep.mubr.msk.bf16.mxu1 %vm3829_vm1, %v3828_v15  ;;  %3557 = vmatpush3.bf16.msra.mxu1 %v3689_v39 }
0x10b6   : > { %3558 = vmatprep.subr.bf16.mxu1 %v3828_v15 }
0x10b9   : > { %3559 = vmatpush3.bf16.msra.mxu1 %v3690_v40 }
0x10ba   : > { %3560 = vmatprep.subr.bf16.mxu1 %v3828_v15 }
0x10bd   : > { %3561 = vmatpush3.bf16.msra.mxu1 %v3691_v26 }
0x10be   : > { %3562 = vmatprep.subr.bf16.mxu1 %v3828_v15 }
0x10c1   : > { %3563 = vmatpush3.bf16.msra.mxu1 %v3692_v14 }
0x10c2   : > { %3564 = vmatprep.subr.bf16.mxu1 %v3828_v15 }
0x10c5   : > { %3565 = vmatpush3.bf16.msra.mxu1 %v3693_v16 }
0x10c6   : > { %3566 = vmatprep.subr.bf16.mxu1 %v3828_v15 }
0x10c9   : > { %3567 = vmatpush3.bf16.msra.mxu1 %v3694_v21 }
0x10ca   : > { %3568 = vmatprep.subr.bf16.mxu1 %v3828_v15 }
0x10cd   : > { %3569 = vmatpush3.bf16.msra.mxu1 %v3695_v23 }
0x10ce   : > { %3570 = vmatprep.subr.bf16.mxu1 %v3828_v15 }
0x10d1   : > { %3571 = vmatpush3.bf16.msra.mxu1 %v3696_v24 }
0x1187   : > { %v2966_v51 = vpop.f32.mrb[24].mxu1 }
0x1188   : > { %v2967_v53 = vadd.f32 %v3322_v41, %v2966_v51  ;;  %v3554_v54 = vpop.f32.mrb[25].mxu1 }
0x1189   : > { %v2969_v42 = vpop.f32.mrb[26].mxu1 }
0x118a   : > { %v3326_v43 = vmul.f32 -1.442695, %v2967_v53  ;;  %v2970_v44 = vadd.f32 %v3322_v41, %v2969_v42  ;;  %v3555_v45 = vpop.f32.mrb[27].mxu1 }
0x118c   : > { %3773 = vpow2.f32 %v3326_v43  ;;  %v3327_v46 = vmul.f32 -1.442695, %v2970_v44 }
0x118e   : > { %3775 = vpow2.f32 %v3327_v46 }
0x1196   : > { %v3774_v48 = vpop.eup %3773 }
0x1197   : > { %v2979_v50 = vadd.f32 1.0, %v3774_v48 }
0x1198   : > { %v3776_v3 = vpop.eup %3775 }
0x1199   : > { %3777 = vrcp.f32 %v2979_v50  ;;  %v2980_v4 = vadd.f32 1.0, %v3776_v3 }
0x119b   : > { %3779 = vrcp.f32 %v2980_v4 }
0x11a3   : > { %v3778_v15 = vpop.eup %3777 }
0x11a4   : > { %v2985_v55 = vmul.f32 %v3778_v15, %v2967_v53 }
0x11a5   : > { %v3780_v52 = vpop.eup %3779 }
0x11a6   : > { %v2986_v57 = vmul.f32 %v3780_v52, %v2970_v44 }
0x11a8   : > { %v3003_v58 = vpack.c.bf16 %v2986_v57, %v2985_v55 }
0x11aa   : > { %3573 = vmatmul.mubr.bf16.vlgmr.msra.gmra.mrb[28].mxu1 %v3003_v58 }
0x127d   : > { %v3093_v47 = vpop.f32.mrb[28].mxu1 }
0x127e   : > { %v3094_v49 = vadd.f32 %v3328_v59, %v3093_v47  ;;  %v3574_v62 = vpop.f32.mrb[29].mxu1 }
0x127f   : > { %v3096_v5 = vpop.f32.mrb[30].mxu1 }
0x1280   : > { %v3100_v7 = vmul.f32 0.5, %v3094_v49  ;;  %v3097_v10 = vadd.f32 %v3328_v59, %v3096_v5  ;;  %v3575_v56 = vpop.f32.mrb[31].mxu1 }
0x1282   : > { %v3101_v18 = vmul.f32 0.5, %v3097_v10  ;;  %v3102_v9 = vadd.f32 %v3100_v7, %v4529_v60 }
0x1284   : > { %v3106_v19 = vsel %vm1076_vm0, %v3102_v9, 0.0  ;;  %v3103_v20 = vadd.f32 %v3101_v18, %v4532_v2 }
0x1285   : > { %3107 = vadd.xlane.f32.xlu0 %v3106_v19 }
0x1286   : > { %v3109_v22 = vsel %vm1076_vm0, %v3103_v20, 0.0 }
0x1287   : > { %3110 = vadd.xlane.f32.xlu1 %v3109_v22 }
0x1312   : > { %v3108_v11 = vpop.xlane.xlu0 %3107 }
0x1313   : > { %v3112_v12 = vmul.f32 0.03125, %v3108_v11 }
0x1314   : > { %v3111_v6 = vpop.xlane.xlu1 %3110 }
0x1315   : > { %v3114_v27 = vsub.f32 %v3102_v9, %v3112_v12  ;;  %v3113_v28 = vmul.f32 0.03125, %v3111_v6 }
0x1317   : > { %v3115_v29 = vsub.f32 %v3103_v20, %v3113_v28  ;;  %v3116_v30 = vmul.f32 %v3114_v27, %v3114_v27 }
0x1319   : > { %v3118_v8 = vsel %vm1076_vm0, %v3116_v30, 0.0  ;;  %v3117_v17 = vmul.f32 %v3115_v29, %v3115_v29 }
0x131a   : > { %3119 = vadd.xlane.f32.xlu0 %v3118_v8 }
0x131b   : > { %v3121_v60 = vsel %vm1076_vm0, %v3117_v17, 0.0 }
0x131c   : > { %3122 = vadd.xlane.f32.xlu1 %v3121_v60 }
0x13a7   : > { %v3120_v2 = vpop.xlane.xlu0 %3119 }
0x13a8   : > { %v3124_v31 = vmul.f32 0.03125, %v3120_v2 }
0x13a9   : > { %v3123_v32 = vpop.xlane.xlu1 %3122 }
0x13aa   : > { %v3126_v1 = vadd.f32 1e-05, %v3124_v31  ;;  %v3125_v33 = vmul.f32 0.03125, %v3123_v32 }
0x13ac   : > { %3781 = vrsqrt.f32 %v3126_v1  ;;  %v3127_v34 = vadd.f32 1e-05, %v3125_v33 }
0x13ae   : > { %3783 = vrsqrt.f32 %v3127_v34 }
0x13b6   : > { %v3782_v13 = vpop.eup %3781 }
0x13b7   : > { %v3130_v35 = vmul.f32 %v3782_v13, %v3114_v27 }
0x13b8   : > { %v3784_v36 = vpop.eup %3783 }
0x13b9   : > { %v3138_v25 = vmul.f32 %v3337_v0, %v3130_v35  ;;  %v3131_v37 = vmul.f32 %v3784_v36, %v3115_v29 }
0x13bb   : > { %v3146_v63 = vadd.f32 %v3338_v61, %v3138_v25  ;;  %v3139_v38 = vmul.f32 %v3337_v0, %v3131_v37 }
0x13bd   : > { %3148 = vst.msk [vmem:[%s1070_s15] sm:$0xff] %vm1076_vm0, %v3146_v63  ;;  %v3147_v39 = vadd.f32 %v3338_v61, %v3139_v38 }
0x13bf   : > { %3149 = vst.msk [vmem:[%s1070_s15 + $0x8] sm:$0xff] %vm1076_vm0, %v3147_v39 }
0x13c0 PF: > { %s81_s22 = sadd.s32 1, %s3791_s22  }
0x13c1   : > { %p78_p4 = scmp.ge.s32.totalorder %s81_s22, 4  }
0x13c3   :  { %80 = sbr.rel (!%p78_p4) target bundleno = 55 (0x37), region = 225 }

// kernel: conformer_forward.3
= control target key start
LH: loop header
LB: loop body
LE: loop exit
PB: predicated region body
PF: predicated region fallthrough
CT: control target
= control target key end

     0   :  { %s3901_s6 = smov 1   ;;  %s3902_s10 = smov 2   ;;  %s4770_s0 = inlined_call_operand.smem [shape: u32[36], index: -1, kind: input, shape index: {}] }
   0x1   :  { %s3956_s5 = sld [smem:[%s4770_s0]]   ;;  %s3903_s14 = smov 3  }
   0x2   :  { %s3961_s9 = sld [smem:[%s4770_s0 + %s3901_s6]]   ;;  %s3904_s18 = smov 4  }
   0x3   :  { %s3966_s13 = sld [smem:[%s4770_s0 + %s3902_s10]]   ;;  %s3905_s22 = smov 5  }
   0x4   :  { %s3971_s17 = sld [smem:[%s4770_s0 + %s3903_s14]]   ;;  %s3906_s26 = smov 6  }
   0x5   :  { %s3976_s21 = sld [smem:[%s4770_s0 + %s3904_s18]]   ;;  %s3907_s30 = smov 7  }
   0x6   :  { %s3981_s25 = sld [smem:[%s4770_s0 + %s3905_s22]]   ;;  %s3908_s4 = smov 8  }
   0x7   :  { %4785 = sst [smem:[#allocation5_spill]] %s3956_s5  ;;  %s3909_s10 = smov 9  }
   0x8   :  { %4786 = sst [smem:[#allocation6_spill]] %s3961_s9  ;;  %s3910_s15 = smov 10  }
   0x9   :  { %s3986_s29 = sld [smem:[%s4770_s0 + %s3906_s26]]   ;;  %s3911_s20 = smov 11  }
   0xa   :  { %s3991_s3 = sld [smem:[%s4770_s0 + %s3907_s30]]   ;;  %s3912_s26 = smov 12  }
   0xb   :  { %s3996_s8 = sld [smem:[%s4770_s0 + %s3908_s4]]   ;;  %s3913_s1 = smov 13  }
   0xc   :  { %s4001_s14 = sld [smem:[%s4770_s0 + %s3909_s10]]   ;;  %s3914_s7 = smov 14  }
   0xd   :  { %s4006_s19 = sld [smem:[%s4770_s0 + %s3910_s15]]   ;;  %s3915_s15 = smov 15  }
   0xe   :  { %s4011_s24 = sld [smem:[%s4770_s0 + %s3911_s20]]   ;;  %s3916_s22 = smov 16  }
   0xf   :  { %s4016_s30 = sld [smem:[%s4770_s0 + %s3912_s26]]   ;;  %s3917_s28 = smov 17  }
  0x10   :  { %4787 = sst [smem:[#allocation7_spill]] %s3991_s3 }
  0x11   :  { %4788 = sst [smem:[#allocation8_spill]] %s3996_s8 }
  0x12   :  { %s4021_s6 = sld [smem:[%s4770_s0 + %s3913_s1]]  }
  0x13   :  { %s4026_s12 = sld [smem:[%s4770_s0 + %s3914_s7]]   ;;  %s3918_s7 = smov 18  }
  0x14   :  { %s4031_s20 = sld [smem:[%s4770_s0 + %s3915_s15]]   ;;  %s3919_s15 = smov 19  }
  0x15   :  { %4789 = sst [smem:[#allocation9_spill]] %s4016_s30 }
  0x16   :  { %s4036_s27 = sld [smem:[%s4770_s0 + %s3916_s22]]   ;;  %s3920_s22 = smov 20  }
  0x17   :  { %s4041_s4 = sld [smem:[%s4770_s0 + %s3917_s28]]   ;;  %s3921_s28 = smov 21  }
  0x18   :  { %4790 = sst [smem:[#allocation10_spill]] %s4021_s6 }
  0x19   :  { %s4046_s6 = sld [smem:[%s4770_s0 + %s3918_s7]]   ;;  %s3922_s7 = smov 22  }
  0x1a   :  { %s4051_s30 = sld [smem:[%s4770_s0 + %s3919_s15]]   ;;  %s3923_s15 = smov 23  }
  0x1c   :  { %4791 = sst [smem:[#allocation11_spill]] %s4036_s27 }
  0x1d   :  { %4792 = sst [smem:[#allocation12_spill]] %s4041_s4 }
  0x1e   :  { %s4056_s27 = sld [smem:[%s4770_s0 + %s3920_s22]]   ;;  %s3924_s22 = smov 24  }
  0x1f   :  { %4793 = sst [smem:[#allocation13_spill]] %s4046_s6 }
  0x20   :  { %4794 = sst [smem:[#allocation14_spill]] %s4051_s30 }
  0x21   :  { %s4061_s4 = sld [smem:[%s4770_s0 + %s3921_s28]]   ;;  %s3925_s28 = smov 25  }
  0x22   :  { %s4066_s6 = sld [smem:[%s4770_s0 + %s3922_s7]]   ;;  %s3926_s7 = smov 26  }
  0x23   :  { %s4071_s30 = sld [smem:[%s4770_s0 + %s3923_s15]]   ;;  %s3927_s15 = smov 27  }
  0x24   :  { %4795 = sst [smem:[#allocation15_spill]] %s4056_s27 }
  0x25   :  { %s4076_s27 = sld [smem:[%s4770_s0 + %s3924_s22]]   ;;  %s3928_s22 = smov 28  }
  0x27   :  { %4796 = sst [smem:[#allocation16_spill]] %s4061_s4 }
  0x28   :  { %4797 = sst [smem:[#allocation17_spill]] %s4066_s6 }
  0x29   :  { %4798 = sst [smem:[#allocation18_spill]] %s4071_s30 }
  0x2a   :  { %s4081_s4 = sld [smem:[%s4770_s0 + %s3925_s28]]   ;;  %s3929_s28 = smov 29  }
  0x2b   :  { %4799 = sst [smem:[#allocation19_spill]] %s4076_s27 }
  0x2c   :  { %s4086_s6 = sld [smem:[%s4770_s0 + %s3926_s7]]   ;;  %s3930_s7 = smov 30  }
  0x2d   :  { %s4091_s30 = sld [smem:[%s4770_s0 + %s3927_s15]]   ;;  %s3931_s15 = smov 31  }
  0x2e   :  { %s4096_s27 = sld [smem:[%s4770_s0 + %s3928_s22]]   ;;  %s3932_s22 = smov 32  }
  0x30   :  { %4800 = sst [smem:[#allocation20_spill]] %s4081_s4 }
  0x31   :  { %s4101_s4 = sld [smem:[%s4770_s0 + %s3929_s28]]   ;;  %s3933_s28 = smov 33  }
  0x32   :  { %4801 = sst [smem:[#allocation21_spill]] %s4086_s6 }
  0x33   :  { %4802 = sst [smem:[#allocation22_spill]] %s4091_s30 }
  0x34   :  { %4803 = sst [smem:[#allocation23_spill]] %s4096_s27 }
  0x35   :  { %s4106_s6 = sld [smem:[%s4770_s0 + %s3930_s7]]   ;;  %s3934_s7 = smov 34  }
  0x36   :  { %s4111_s30 = sld [smem:[%s4770_s0 + %s3931_s15]]   ;;  %s3935_s15 = smov 35  }
  0x37   :  { %4804 = sst [smem:[#allocation24_spill]] %s4101_s4 }
  0x38   :  { %s4116_s27 = sld [smem:[%s4770_s0 + %s3932_s22]]  }
  0x39   :  { %s4121_s4 = sld [smem:[%s4770_s0 + %s3933_s28]]  }
  0x3b   :  { %4805 = sst [smem:[#allocation25_spill]] %s4106_s6 }
  0x3c   :  { %4806 = sst [smem:[#allocation26_spill]] %s4111_s30 }
  0x3d   :  { %s4126_s6 = sld [smem:[%s4770_s0 + %s3934_s7]]  }
  0x3e   :  { %s4131_s30 = sld [smem:[%s4770_s0 + %s3935_s15]]  }
  0x3f   :  { %4807 = sst [smem:[#allocation27_spill]] %s4121_s4 }
  0x43   :  { %4808 = sst [smem:[#allocation28_spill]] %s4126_s6 }
  0x44   :  { %76 = vsyncpa [#allocation3], 0 }
  0x45   :  { %78 = vsyncpa [#allocation3 + $0x1], 0  ;;  %s4133_s22 = smov 0   ;;  %s4135_s23 = smov 0  }
  0x46   :  { %s4137_s26 = smov 0   ;;  %s4139_s28 = smov 0  }
  0x47 LB: > { %s4154_s0 = sadd.s32 4294967295, %s3899_s28   ;;  %s3259_s1 = sadd.s32 4294967294, %s3899_s28   ;;  %s3899_s28 = sphi %s4139_s28, %s4840_s28   ;;  %s3895_s26 = sphi %s4137_s26, %s4839_s26   ;;  %s3891_s23 = sphi %s4135_s23, %s4838_s23   ;;  %s3887_s22 = sphi %s4133_s22, %s4837_s22  }
  0x48   : > { %s4158_s2 = sadd.s32 1, %s3899_s28   ;;  %s831_s7 = sadd.s32 1, %s3895_s26 }
  0x49   : > { %s828_s10 = ssub.s32 %s3899_s28, %s4158_s2  ;;  %p841_p0 = scmp.ne.s32.totalorder %s3895_s26, %s3891_s23 }
  0x4a   : > { %p829_p1 = scmp.eq.s32.totalorder %s828_s10, 0  ;;  %p842_p2 = scmp.eq.s32.totalorder %s4154_s0, 1 }
  0x4b   : > { %p847_p3 = scmp.ne.s32.totalorder %s3891_s23, %s3887_s22  ;;  %p848_p4 = scmp.eq.s32.totalorder %s3259_s1, 1 }
  0x4c   : > { %s4169_s11 = scalar_select %p829_p1, %s3895_s26, %s831_s7  }
  0x4d   : > { %p4171_p5 = por %p842_p2, %p841_p0  ;;  %p4175_p6 = por %p848_p4, %p847_p3 }
  0x4e   : > { %p3262_p7 = scmp.ge.s32.totalorder %s3899_s28, 1  ;;  %p976_p8 = scmp.lt.s32.totalorder %s3899_s28, 3 }
  0x50   : > { %p977_p9 = pnand %p3262_p7, %p976_p8 }
  0x51   : > { %s4811_s5 = sld [smem:[#allocation5_spill]] (!%p977_p9)  ;;  %p1064_p10 = scmp.lt.s32.totalorder (!%p977_p9), %s4154_s0, 1  ;;  %vm1074_vm0 = vcmask (!%p977_p9), 261120   ;;  %v3711_v14 = vld [vmem:[%s3971_s17] sm:$0xff] (!%p977_p9)   ;;  %v3936_v15 = vmov (!%p977_p9), 0.0   ;;  %v3712_v16 = vld [vmem:[%s3971_s17 + $0x8] sm:$0xff] (!%p977_p9)  }
  0x52   : > { %980 = sbr.rel (%p977_p9) target bundleno = 5093 (0x13e5), region = 160  ;;  %3428 = vmatprep.subr.bf16.mxu0 (!%p977_p9), %v3936_v15  ;;  %3436 = vmatprep.subr.bf16.mxu1 (!%p977_p9), %v3936_v15  ;;  %vm3937_vm1 = vmmov (!%p977_p9), 0   ;;  %s4812_s9 = sld [smem:[#allocation6_spill]] (!%p977_p9)  ;;  %v3267_v29 = vld [vmem:[%s3966_s13] ss:$0 sm:$0xff] (!%p977_p9)  ;;  %v3714_v35 = vld [vmem:[%s3981_s25 + $0x8] sm:$0xff] (!%p977_p9)  }
  0x53   : > { %3429 = vmatpush3.bf16.msra.mxu0 (!%p977_p9), %v3711_v14  ;;  %3432 = vmatprep.mubr.msk.bf16.mxu0 (!%p977_p9), %vm3937_vm1, %v3936_v15  ;;  %v3713_v34 = vld [vmem:[%s3981_s25] sm:$0xff] (!%p977_p9)   ;;  %v3715_v36 = vld [vmem:[%s3981_s25 + $0x10] sm:$0xff] (!%p977_p9)   ;;  %v3716_v37 = vld [vmem:[%s3981_s25 + $0x18] sm:$0xff] (!%p977_p9)   ;;  %s4813_s3 = sld [smem:[#allocation7_spill]] (!%p977_p9)  ;;  %s4814_s8 = sld [smem:[#allocation8_spill]] (!%p977_p9)  ;;  %vm1624_vm2 = vcmask (!%p977_p9), 64512  }
  0x54   : > { %3430 = vmatprep.subr.bf16.mxu0 (!%p977_p9), %v3936_v15  ;;  %3452 = vmatprep.mubr.msk.bf16.mxu1 (!%p977_p9), %vm3937_vm1, %v3936_v15  ;;  %v3717_v38 = vld [vmem:[%s3981_s25 + $0x20] sm:$0xff] (!%p977_p9)   ;;  %v3718_v39 = vld [vmem:[%s3981_s25 + $0x28] sm:$0xff] (!%p977_p9)   ;;  %v3719_v40 = vld [vmem:[%s3981_s25 + $0x30] sm:$0xff] (!%p977_p9)   ;;  %s4778_s10 = smov (!%p977_p9), 112   ;;  %vm1801_vm3 = vcmask (!%p977_p9), 130048   ;;  %vm2298_vm4 = vcmask (!%p977_p9), 392192  }
  0x55   : > { %3437 = vmatpush3.bf16.msra.mxu1 (!%p977_p9), %v3713_v34  ;;  %v3720_v41 = vld [vmem:[%s3981_s25 + $0x38] sm:$0xff] (!%p977_p9)   ;;  %v3268_v42 = vld [vmem:[%s3976_s21] ss:$0 sm:$0xff] (!%p977_p9)  ;;  %vm2334_vm5 = vcmask (!%p977_p9), 523264   ;;  %s4834_s4 = sld [smem:[#allocation27_spill]] (!%p977_p9)  ;;  %s4835_s6 = sld [smem:[#allocation28_spill]] (!%p977_p9) }
  0x56   : > { %3438 = vmatprep.subr.bf16.mxu1 (!%p977_p9), %v3936_v15  ;;  %v3274_v60 = vld [vmem:[%s3986_s29] ss:$0 sm:$0xff] (!%p977_p9) }
  0x57   : > { %3431 = vmatpush3.bf16.msra.mxu0 (!%p977_p9), %v3712_v16 }
  0x58   : > { %3456 = vmatprep.subr.bf16.mxu0 (!%p977_p9), %v3936_v15  ;;  %v3266_v25 = vld [vmem:[%s4812_s9] ss:$0 sm:$0xff] (!%p977_p9) }
  0x59   : > { %s1065_s18 = scalar_select %p1064_p10, %s4154_s0, 1  ;;  %3439 = vmatpush3.bf16.msra.mxu1 %v3714_v35  ;;  %v3284_v34 = vld [vmem:[%s4814_s8] ss:$0 sm:$0xff] }
  0x5a   : > { %3440 = vmatprep.subr.bf16.mxu1 %v3936_v15 }
  0x5b   : > { %s3361_s1 = sshll.u32 %s1065_s18, 4  ;;  %s3939_s18 = smov 96  }
  0x5c   : > { %s1068_s7 = scalar_lea.vmem %s4811_s5, %s3361_s1  ;;  %s3940_s1 = smov 80  }
  0x5d   : > { %v4184_v0 = vld [vmem:[%s1068_s7] sm:$0xff]  ;;  %v4186_v1 = vld [vmem:[%s1068_s7 + $0x8] sm:$0xff]  ;;  %3441 = vmatpush3.bf16.msra.mxu1 %v3715_v36  ;;  %s4779_s7 = smov 8   ;;  %s4822_s5 = sld [smem:[#allocation16_spill]] }
  0x5e   : > { %v1075_v2 = vsel %vm1074_vm0, %v4184_v0, 0.0  ;;  %v1078_v3 = vsel %vm1074_vm0, %v4186_v1, 0.0  ;;  %3442 = vmatprep.subr.bf16.mxu1 %v3936_v15 }
  0x5f   : > { %1076 = vadd.xlane.f32.xlu0 %v1075_v2 }
  0x61   : > { %3443 = vmatpush3.bf16.msra.mxu1 %v3716_v37 }
  0x62   : > { %3444 = vmatprep.subr.bf16.mxu1 %v3936_v15 }
  0x63   : > { %1079 = vadd.xlane.f32.xlu0 %v1078_v3 }
  0x65   : > { %3445 = vmatpush3.bf16.msra.mxu1 %v3717_v38  ;;  %v3723_v38 = vld [vmem:[%s4006_s19] sm:$0xff]  }
  0x66   : > { %3446 = vmatprep.subr.bf16.mxu1 %v3936_v15 }
  0x69   : > { %3447 = vmatpush3.bf16.msra.mxu1 %v3718_v39 }
  0x6a   : > { %3448 = vmatprep.subr.bf16.mxu1 %v3936_v15 }
  0x6d   : > { %3449 = vmatpush3.bf16.msra.mxu1 %v3719_v40  ;;  %v3724_v40 = vld [vmem:[%s4006_s19 + $0x8] sm:$0xff]  }
  0x6e   : > { %3450 = vmatprep.subr.bf16.mxu1 %v3936_v15 }
  0x71   : > { %3451 = vmatpush3.bf16.msra.mxu1 %v3720_v41  ;;  %v3725_v41 = vld [vmem:[%s4011_s24] sm:$0xff]  }
  0x72   : > { %3498 = vmatprep.subr.bf16.mxu1 %v3936_v15 }
  0xec   : > { %v1077_v4 = vpop.xlane.xlu0 %1076 }
  0xed   : > { %v1082_v5 = vmul.f32 0.03125, %v1077_v4 }
  0xef   : > { %v1084_v6 = vsub.f32 %v4184_v0, %v1082_v5 }
  0xf0   : > { %v1080_v7 = vpop.xlane.xlu0 %1079 }
  0xf1   : > { %v1083_v8 = vmul.f32 0.03125, %v1080_v7  ;;  %v1086_v9 = vmul.f32 %v1084_v6, %v1084_v6 }
  0xf3   : > { %v1085_v10 = vsub.f32 %v4186_v1, %v1083_v8  ;;  %v1088_v11 = vsel %vm1074_vm0, %v1086_v9, 0.0 }
  0xf4   : > { %1089 = vadd.xlane.f32.xlu1 %v1088_v11 }
  0xf5   : > { %v1087_v12 = vmul.f32 %v1085_v10, %v1085_v10 }
  0xf7   : > { %v1091_v13 = vsel %vm1074_vm0, %v1087_v12, 0.0 }
  0xf8   : > { %1092 = vadd.xlane.f32.xlu1 %v1091_v13 }
 0x181   : > { %v1090_v17 = vpop.xlane.xlu1 %1089 }
 0x182   : > { %v1094_v18 = vmul.f32 0.03125, %v1090_v17 }
 0x184   : > { %v1096_v19 = vadd.f32 1e-05, %v1094_v18 }
 0x185   : > { %v1093_v20 = vpop.xlane.xlu1 %1092 }
 0x186   : > { %3749 = vrsqrt.f32 %v1096_v19  ;;  %v1095_v21 = vmul.f32 0.03125, %v1093_v20  ;;  %v3721_v20 = vld [vmem:[%s4001_s14] sm:$0xff]  }
 0x188   : > { %v1097_v22 = vadd.f32 1e-05, %v1095_v21  ;;  %v3722_v21 = vld [vmem:[%s4001_s14 + $0x8] sm:$0xff]  }
 0x18a   : > { %3751 = vrsqrt.f32 %v1097_v22 }
 0x190   : > { %v3750_v23 = vpop.eup %3749 }
 0x191   : > { %v1100_v24 = vmul.f32 %v3750_v23, %v1084_v6 }
 0x193   : > { %v1108_v28 = vmul.f32 %v3266_v25, %v1100_v24 }
 0x194   : > { %v3752_v26 = vpop.eup %3751 }
 0x195   : > { %v1101_v27 = vmul.f32 %v3752_v26, %v1085_v10  ;;  %v1116_v31 = vadd.f32 %v3267_v29, %v1108_v28 }
 0x197   : > { %v1109_v30 = vmul.f32 %v3266_v25, %v1101_v27 }
 0x199   : > { %v1117_v32 = vadd.f32 %v3267_v29, %v1109_v30  ;;  %v3283_v29 = vld [vmem:[%s4813_s3] ss:$0 sm:$0xff]  ;;  %s4821_s3 = sld [smem:[#allocation15_spill]] }
 0x19b   : > { %v1122_v33 = vpack.c.bf16 %v1117_v32, %v1116_v31 }
 0x19d   : > { %3433 = vmatmul.mubr.msk.bf16.vlgmr.msra.gmra.mrb[0].mxu0 %vm1074_vm0, %v1122_v33 }
 0x19e   : > { %3460 = vmatprep.mubr.msk.bf16.mxu0 %vm3937_vm1, %v3936_v15  ;;  %3457 = vmatpush3.bf16.msra.mxu0 %v3721_v20 }
 0x19f   : > { %3458 = vmatprep.subr.bf16.mxu0 %v3936_v15 }
 0x1a2   : > { %3459 = vmatpush3.bf16.msra.mxu0 %v3722_v21  ;;  %v4379_v21 = vld [vmem:[%s4031_s20 + $0x8] sm:$0xff] }
 0x1a3   : > { %3464 = vmatprep.subr.bf16.mxu0 %v3936_v15 }
 0x270   : > { %v1179_v43 = vpop.f32.mrb[0].mxu0 }
 0x271   : > { %v1180_v44 = vadd.f32 %v3268_v42, %v1179_v43  ;;  %v3434_v45 = vpop.f32.mrb[1].mxu0 }
 0x272   : > { %v1182_v46 = vpop.f32.mrb[2].mxu0 }
 0x273   : > { %v3272_v47 = vmul.f32 -1.442695, %v1180_v44  ;;  %v1183_v48 = vadd.f32 %v3268_v42, %v1182_v46  ;;  %v3435_v49 = vpop.f32.mrb[3].mxu0  ;;  %v3726_v42 = vld [vmem:[%s4011_s24 + $0x8] sm:$0xff]  }
 0x275   : > { %3753 = vpow2.f32 %v3272_v47  ;;  %v3273_v50 = vmul.f32 -1.442695, %v1183_v48 }
 0x277   : > { %3755 = vpow2.f32 %v3273_v50 }
 0x27f   : > { %v3754_v51 = vpop.eup %3753 }
 0x280   : > { %v1192_v52 = vadd.f32 1.0, %v3754_v51 }
 0x281   : > { %v3756_v53 = vpop.eup %3755 }
 0x282   : > { %3757 = vrcp.f32 %v1192_v52  ;;  %v1193_v54 = vadd.f32 1.0, %v3756_v53 }
 0x284   : > { %3759 = vrcp.f32 %v1193_v54 }
 0x28c   : > { %v3758_v55 = vpop.eup %3757 }
 0x28d   : > { %v1198_v57 = vmul.f32 %v3758_v55, %v1180_v44 }
 0x28e   : > { %v3760_v56 = vpop.eup %3759 }
 0x28f   : > { %v1199_v58 = vmul.f32 %v3760_v56, %v1183_v48 }
 0x291   : > { %v1216_v59 = vpack.c.bf16 %v1199_v58, %v1198_v57 }
 0x293   : > { %3453 = vmatmul.mubr.bf16.vlgmr.msra.gmra.mrb[0].mxu1 %v1216_v59 }
 0x294   : > { %3500 = vmatprep.mubr.msk.bf16.mxu1 %vm3937_vm1, %v3936_v15 }
 0x366   : > { %v1306_v61 = vpop.f32.mrb[0].mxu1 }
 0x367   : > { %v1307_v62 = vadd.f32 %v3274_v60, %v1306_v61  ;;  %v3454_v63 = vpop.f32.mrb[1].mxu1 }
 0x368   : > { %v1309_v2 = vpop.f32.mrb[2].mxu1 }
 0x369   : > { %v1313_v3 = vmul.f32 0.5, %v1307_v62  ;;  %v1310_v4 = vadd.f32 %v3274_v60, %v1309_v2  ;;  %v3455_v5 = vpop.f32.mrb[3].mxu1 }
 0x36b   : > { %v4232_v6 = vadd.f32 %v1313_v3, %v4184_v0  ;;  %v1314_v7 = vmul.f32 0.5, %v1310_v4 }
 0x36d   : > { %v4235_v8 = vadd.f32 %v1314_v7, %v4186_v1  ;;  %v1319_v9 = vsel %vm1074_vm0, %v4232_v6, 0.0 }
 0x36e   : > { %1320 = vadd.xlane.f32.xlu0 %v1319_v9 }
 0x36f   : > { %v1322_v10 = vsel %vm1074_vm0, %v4235_v8, 0.0 }
 0x370   : > { %1323 = vadd.xlane.f32.xlu1 %v1322_v10 }
 0x3fb   : > { %v1321_v11 = vpop.xlane.xlu0 %1320 }
 0x3fc   : > { %v1325_v12 = vmul.f32 0.03125, %v1321_v11 }
 0x3fd   : > { %v1324_v13 = vpop.xlane.xlu1 %1323 }
 0x3fe   : > { %v1327_v0 = vsub.f32 %v4232_v6, %v1325_v12  ;;  %v1326_v14 = vmul.f32 0.03125, %v1324_v13 }
 0x400   : > { %v1328_v16 = vsub.f32 %v4235_v8, %v1326_v14  ;;  %v1329_v1 = vmul.f32 %v1327_v0, %v1327_v0 }
 0x402   : > { %v1331_v17 = vsel %vm1074_vm0, %v1329_v1, 0.0  ;;  %v1330_v18 = vmul.f32 %v1328_v16, %v1328_v16 }
 0x403   : > { %1332 = vadd.xlane.f32.xlu0 %v1331_v17 }
 0x404   : > { %v1334_v19 = vsel %vm1074_vm0, %v1330_v18, 0.0 }
 0x405   : > { %1335 = vadd.xlane.f32.xlu1 %v1334_v19 }
 0x490   : > { %v1333_v22 = vpop.xlane.xlu0 %1332 }
 0x491   : > { %v1337_v23 = vmul.f32 0.03125, %v1333_v22 }
 0x492   : > { %v1336_v24 = vpop.xlane.xlu1 %1335 }
 0x493   : > { %v1339_v25 = vadd.f32 1e-05, %v1337_v23  ;;  %v1338_v26 = vmul.f32 0.03125, %v1336_v24  ;;  %v4382_v23 = vld [vmem:[%s4026_s12] sm:$0xff]  ;;  %v4385_v24 = vld [vmem:[%s4026_s12 + $0x8] sm:$0xff] }
 0x495   : > { %3761 = vrsqrt.f32 %v1339_v25  ;;  %v1340_v27 = vadd.f32 1e-05, %v1338_v26  ;;  %v4391_v26 = vld [vmem:[%s4031_s20] sm:$0xff] }
 0x497   : > { %3763 = vrsqrt.f32 %v1340_v27 }
 0x49f   : > { %v3762_v28 = vpop.eup %3761 }
 0x4a0   : > { %v1343_v30 = vmul.f32 %v3762_v28, %v1327_v0 }
 0x4a1   : > { %v3764_v31 = vpop.eup %3763 }
 0x4a2   : > { %v1351_v32 = vmul.f32 %v3283_v29, %v1343_v30  ;;  %v1344_v33 = vmul.f32 %v3764_v31, %v1328_v16 }
 0x4a4   : > { %v1352_v35 = vmul.f32 %v3283_v29, %v1344_v33  ;;  %v1359_v36 = vadd.f32 %v3284_v34, %v1351_v32 }
 0x4a6   : > { %v1360_v37 = vadd.f32 %v3284_v34, %v1352_v35 }
 0x4a8   : > { %v1365_v39 = vpack.c.bf16 %v1360_v37, %v1359_v36 }
 0x4aa   : > { %3461 = vmatmul.mubr.msk.bf16.vlgmr.msra.gmra.mrb[4].mxu0 %vm1074_vm0, %v1365_v39 }
 0x4ab   : > { %3465 = vmatpush3.bf16.msra.mxu0 %v3723_v38  ;;  %3468 = vmatprep.mubr.msk.bf16.mxu0 %vm3937_vm1, %v3936_v15 }
 0x4ac   : > { %3466 = vmatprep.subr.bf16.mxu0 %v3936_v15 }
 0x4af   : > { %3467 = vmatpush3.bf16.msra.mxu0 %v3724_v40 }
 0x4b0   : > { %3472 = vmatprep.subr.bf16.mxu0 %v3936_v15 }
 0x4b2   : > { %3469 = vmatmul.mubr.msk.bf16.vlgmr.msra.gmra.mrb[8].mxu0 %vm1074_vm0, %v1365_v39 }
 0x4b3   : > { %3473 = vmatpush3.bf16.msra.mxu0 %v3725_v41  ;;  %3476 = vmatprep.mubr.msk.bf16.mxu0 %vm3937_vm1, %v3936_v15 }
 0x4b4   : > { %3474 = vmatprep.subr.bf16.mxu0 %v3936_v15 }
 0x4b7   : > { %3475 = vmatpush3.bf16.msra.mxu0 %v3726_v42 }
 0x4b8   : > { %3480 = vmatprep.subr.bf16.mxu0 %v3936_v15 }
 0x4ba   : > { %3477 = vmatmul.mubr.msk.bf16.vlgmr.msra.gmra.mrb[12].mxu0 %vm1074_vm0, %v1365_v39 }
 0x4bb   : > { %3482 = vmatprep.mubr.msk.bf16.mxu0 %vm3937_vm1, %v3936_v15 }
 0x57d   : > { %v4268_v43 = vpop.f32.mrb[4].mxu0 }
 0x57e   : > { %1542 = vrot.lane.b32.xlu1 %v4268_v43, %s4778_s10  ;;  %v3462_v44 = vpop.f32.mrb[5].mxu0  ;;  %v1560_v58 = vsub.f32 0.0, %v4268_v43  ;;  %v1633_v32 = vmul.f32 %v4382_v23, %v4268_v43 }
 0x57f   : > { %v4272_v45 = vpop.f32.mrb[6].mxu0 }
 0x580   : > { %v3463_v46 = vpop.f32.mrb[7].mxu0  ;;  %v1561_v57 = vsub.f32 0.0, %v4272_v45  ;;  %v1634_v31 = vmul.f32 %v4385_v24, %v4272_v45 }
 0x582   : > { %1544 = vrot.lane.b32.xlu1 %v4272_v45, %s4778_s10 }
 0x585   : > { %v4276_v47 = vpop.f32.mrb[8].mxu0 }
 0x586   : > { %1659 = vrot.lane.b32.xlu0 %v4276_v47, %s4778_s10  ;;  %v3470_v48 = vpop.f32.mrb[9].mxu0  ;;  %v1677_v59 = vsub.f32 0.0, %v4276_v47  ;;  %v1749_v46 = vmul.f32 %v4382_v23, %v4276_v47 }
 0x587   : > { %v4280_v49 = vpop.f32.mrb[10].mxu0 }
 0x588   : > { %1661 = vrot.lane.b32.xlu1 %v4280_v49, %s4778_s10  ;;  %v3471_v50 = vpop.f32.mrb[11].mxu0  ;;  %s3942_s10 = smov 120   ;;  %v1678_v60 = vsub.f32 0.0, %v4280_v49  ;;  %v1750_v48 = vmul.f32 %v4385_v24, %v4280_v49 }
 0x58a   : > { %1548 = vrot.lane.b32.xlu0 %v4268_v43, %s3939_s18 }
 0x58c   : > { %1550 = vrot.lane.b32.xlu1 %v4272_v45, %s3939_s18 }
 0x58d   : > { %v4288_v51 = vpop.f32.mrb[12].mxu0 }
 0x58e   : > { %1665 = vrot.lane.b32.xlu0 %v4276_v47, %s3939_s18  ;;  %v3478_v52 = vpop.f32.mrb[13].mxu0 }
 0x58f   : > { %v4292_v53 = vpop.f32.mrb[14].mxu0 }
 0x590   : > { %v2090_v54 = vpack.c.bf16 %v4292_v53, %v4288_v51  ;;  %1667 = vrot.lane.b32.xlu1 %v4280_v49, %s3939_s18  ;;  %v3479_v55 = vpop.f32.mrb[15].mxu0  ;;  %v4300_v56 = vpack.i.bf16 %v4292_v53, %v4288_v51 }
 0x592   : > { %1671 = vrot.lane.b32.xlu0 %v4276_v47, %s3940_s1 }
 0x594   : > { %1673 = vrot.lane.b32.xlu1 %v4280_v49, %s3940_s1 }
 0x596   : > { %1554 = vrot.lane.b32.xlu0 %v4268_v43, %s3940_s1 }
 0x598   : > { %1556 = vrot.lane.b32.xlu1 %v4272_v45, %s3940_s1 }
 0x59a   : > { %1717 = vrot.lane.b32.xlu0 %v4276_v47, %s4779_s7 }
 0x59c   : > { %1578 = vrot.lane.b32.xlu1 %v1561_v57, %s3942_s10 }
 0x59e   : > { %1576 = vrot.lane.b32.xlu0 %v1560_v58, %s3942_s10 }
 0x5a0   : > { %1602 = vrot.lane.b32.xlu1 %v4272_v45, %s4779_s7 }
 0x5a2   : > { %1600 = vrot.lane.b32.xlu0 %v4268_v43, %s4779_s7 }
 0x5a4   : > { %1719 = vrot.lane.b32.xlu1 %v4280_v49, %s4779_s7 }
 0x5a6   : > { %1693 = vrot.lane.b32.xlu0 %v1677_v59, %s3942_s10 }
 0x5a8   : > { %1695 = vrot.lane.b32.xlu1 %v1678_v60, %s3942_s10 }
 0x5f0   : > { %v4326_v61 = vpop.permute.xlu1 %1542 }
 0x5f1   : > { %1604 = vrot.lane.b32.xlu0 %v4326_v61, %s4779_s7  ;;  %v1562_v62 = vsub.f32 0.0, %v4326_v61 }
 0x5f4   : > { %v4331_v63 = vpop.permute.xlu1 %1544 }
 0x5f5   : > { %1580 = vrot.lane.b32.xlu0 %v1562_v62, %s3942_s10  ;;  %1606 = vrot.lane.b32.xlu1 %v4331_v63, %s4779_s7  ;;  %v1563_v2 = vsub.f32 0.0, %v4331_v63 }
 0x5f8   : > { %v4337_v3 = vpop.permute.xlu0 %1659 }
 0x5f9   : > { %1582 = vrot.lane.b32.xlu1 %v1563_v2, %s3942_s10  ;;  %v1679_v17 = vsub.f32 0.0, %v4337_v3 }
 0x5fa   : > { %v4340_v4 = vpop.permute.xlu1 %1661 }
 0x5fb   : > { %v1680_v19 = vsub.f32 0.0, %v4340_v4 }
 0x5fc   : > { %v4342_v5 = vpop.permute.xlu0 %1548 }
 0x5fd   : > { %v1564_v7 = vsub.f32 0.0, %v4342_v5 }
 0x5fe   : > { %v4345_v9 = vpop.permute.xlu1 %1550 }
 0x5ff   : > { %v1565_v10 = vsub.f32 0.0, %v4345_v9  ;;  %1584 = vrot.lane.b32.xlu0 %v1564_v7, %s3942_s10 }
 0x600   : > { %v4349_v11 = vpop.permute.xlu0 %1665 }
 0x601   : > { %1586 = vrot.lane.b32.xlu1 %v1565_v10, %s3942_s10  ;;  %v1681_v29 = vsub.f32 0.0, %v4349_v11 }
 0x602   : > { %v4352_v12 = vpop.permute.xlu1 %1667 }
 0x603   : > { %1721 = vrot.lane.b32.xlu0 %v4337_v3, %s4779_s7  ;;  %v1682_v35 = vsub.f32 0.0, %v4352_v12 }
 0x604   : > { %v4356_v13 = vpop.permute.xlu0 %1671 }
 0x605   : > { %1723 = vrot.lane.b32.xlu1 %v4340_v4, %s4779_s7  ;;  %v1683_v39 = vsub.f32 0.0, %v4356_v13 }
 0x606   : > { %v4360_v0 = vpop.permute.xlu1 %1673 }
 0x607   : > { %1725 = vrot.lane.b32.xlu0 %v4349_v11, %s4779_s7  ;;  %v1684_v44 = vsub.f32 0.0, %v4360_v0 }
 0x608   : > { %v4364_v14 = vpop.permute.xlu0 %1554 }
 0x609   : > { %1727 = vrot.lane.b32.xlu1 %v4352_v12, %s4779_s7  ;;  %v1566_v52 = vsub.f32 0.0, %v4364_v14 }
 0x60a   : > { %v4368_v16 = vpop.permute.xlu1 %1556 }
 0x60b   : > { %1729 = vrot.lane.b32.xlu0 %v4356_v13, %s4779_s7  ;;  %v1567_v58 = vsub.f32 0.0, %v4368_v16 }
 0x60c   : > { %v1718_v1 = vpop.permute.xlu0 %1717 }
 0x60d   : > { %1731 = vrot.lane.b32.xlu1 %v4360_v0, %s4779_s7 }
 0x60e   : > { %v1579_v18 = vpop.permute.xlu1 %1578 }
 0x60f   : > { %1697 = vrot.lane.b32.xlu0 %v1679_v17, %s3942_s10  ;;  %v1635_v17 = vmul.f32 %v4326_v61, %v4382_v23 }
 0x610   : > { %v1577_v20 = vpop.permute.xlu0 %1576 }
 0x611   : > { %1699 = vrot.lane.b32.xlu1 %v1680_v19, %s3942_s10 }
 0x612   : > { %v1603_v22 = vpop.permute.xlu1 %1602 }
 0x613   : > { %v1626_v25 = vsel %vm1624_vm2, %v1579_v18, %v1603_v22  ;;  %1608 = vrot.lane.b32.xlu0 %v4342_v5, %s4779_s7  ;;  %v1636_v18 = vmul.f32 %v4331_v63, %v4385_v24 }
 0x614   : > { %v1642_v27 = vmul.f32 %v1626_v25, %v4379_v21  ;;  %v1601_v28 = vpop.permute.xlu0 %1600 }
 0x615   : > { %v1625_v30 = vsel %vm1624_vm2, %v1577_v20, %v1601_v28  ;;  %1610 = vrot.lane.b32.xlu1 %v4345_v9, %s4779_s7 }
 0x616   : > { %v1641_v33 = vmul.f32 %v1625_v30, %v4391_v26  ;;  %v1720_v34 = vpop.permute.xlu1 %1719  ;;  %v1650_v36 = vadd.f32 %v1642_v27, %v1634_v31 }
 0x617   : > { %1701 = vrot.lane.b32.xlu0 %v1681_v29, %s3942_s10 }
 0x618   : > { %v1649_v37 = vadd.f32 %v1641_v33, %v1633_v32  ;;  %v1694_v38 = vpop.permute.xlu0 %1693 }
 0x619   : > { %v1741_v40 = vsel %vm1624_vm2, %v1694_v38, %v1718_v1  ;;  %1703 = vrot.lane.b32.xlu1 %v1682_v35, %s3942_s10  ;;  %v1751_v38 = vmul.f32 %v4337_v3, %v4382_v23  ;;  %v1638_v3 = vmul.f32 %v4345_v9, %v4385_v24  ;;  %v1754_v9 = vmul.f32 %v4352_v12, %v4385_v24 }
 0x61a   : > { %v1793_v41 = vpack.c.bf16 %v1650_v36, %v1649_v37  ;;  %v1757_v42 = vmul.f32 %v1741_v40, %v4391_v26  ;;  %v1696_v43 = vpop.permute.xlu1 %1695  ;;  %v1756_v12 = vmul.f32 %v4360_v0, %v4385_v24 }
 0x61b   : > { %v1742_v45 = vsel %vm1624_vm2, %v1696_v43, %v1720_v34  ;;  %1705 = vrot.lane.b32.xlu0 %v1683_v39, %s3942_s10  ;;  %v1752_v39 = vmul.f32 %v4340_v4, %v4385_v24 }
 0x61c   : > { %v1758_v50 = vmul.f32 %v1742_v45, %v4379_v21  ;;  %v1765_v55 = vadd.f32 %v1757_v42, %v1749_v46 }
 0x61d   : > { %1707 = vrot.lane.b32.xlu1 %v1684_v44, %s3942_s10 }
 0x61e   : > { %v1766_v57 = vadd.f32 %v1758_v50, %v1750_v48  ;;  %v1637_v50 = vmul.f32 %v4342_v5, %v4382_v23  ;;  %v1753_v5 = vmul.f32 %v4349_v11, %v4382_v23  ;;  %v1755_v11 = vmul.f32 %v4356_v13, %v4382_v23 }
 0x61f   : > { %1588 = vrot.lane.b32.xlu0 %v1566_v52, %s3942_s10 }
 0x620   : > { %v1797_v59 = vpack.c.bf16 %v1766_v57, %v1765_v55 }
 0x621   : > { %1590 = vrot.lane.b32.xlu1 %v1567_v58, %s3942_s10  ;;  %s4815_s10 = smov 112  }
 0x622   : > { %v1806_v47 = vsel %vm1801_vm3, %v1797_v59, 0 }
 0x623   : > { %1612 = vrot.lane.b32.xlu0 %v4364_v14, %s4779_s7  ;;  %3481 = vmatpush3.bf16.xpose.msra.mxu0 %v1806_v47 }
 0x624   : > { %3486 = vmatprep.subr.bf16.mxu0 %v3936_v15 }
 0x625   : > { %1614 = vrot.lane.b32.xlu1 %v4368_v16, %s4779_s7  ;;  %s4817_s7 = sld [smem:[#allocation10_spill]] }
 0x62a   : > { %3483 = vmatmul.mubr.msk.bf16.vlgmr.msra.gmra.mrb[16].mxu0 %vm1801_vm3, %v1793_v41 }
 0x62b   : > { %3488 = vmatprep.mubr.msk.bf16.mxu0 %vm3937_vm1, %v3936_v15 }
 0x663   : > { %v1605_v49 = vpop.permute.xlu0 %1604 }
 0x667   : > { %v1581_v60 = vpop.permute.xlu0 %1580  ;;  %v1607_v62 = vpop.permute.xlu1 %1606 }
 0x668   : > { %v1627_v2 = vsel %vm1624_vm2, %v1581_v60, %v1605_v49 }
 0x669   : > { %v1643_v7 = vmul.f32 %v1627_v2, %v4391_v26 }
 0x66b   : > { %v1583_v10 = vpop.permute.xlu1 %1582  ;;  %v1651_v20 = vadd.f32 %v1643_v7, %v1635_v17 }
 0x66c   : > { %v1628_v1 = vsel %vm1624_vm2, %v1583_v10, %v1607_v62 }
 0x66d   : > { %v1644_v19 = vmul.f32 %v1628_v1, %v4379_v21 }
 0x66f   : > { %v1652_v22 = vadd.f32 %v1644_v19, %v1636_v18 }
 0x671   : > { %v1794_v25 = vpack.c.bf16 %v1652_v22, %v1651_v20  ;;  %v1585_v27 = vpop.permute.xlu0 %1584 }
 0x673   : > { %v1587_v28 = vpop.permute.xlu1 %1586 }
 0x675   : > { %v1722_v29 = vpop.permute.xlu0 %1721 }
 0x677   : > { %v1724_v30 = vpop.permute.xlu1 %1723 }
 0x679   : > { %v1726_v31 = vpop.permute.xlu0 %1725 }
 0x67b   : > { %v1728_v32 = vpop.permute.xlu1 %1727 }
 0x67d   : > { %v1730_v33 = vpop.permute.xlu0 %1729 }
 0x67f   : > { %v1732_v34 = vpop.permute.xlu1 %1731 }
 0x681   : > { %v1698_v35 = vpop.permute.xlu0 %1697 }
 0x682   : > { %v1743_v36 = vsel %vm1624_vm2, %v1698_v35, %v1722_v29 }
 0x683   : > { %v1759_v61 = vmul.f32 %v1743_v36, %v4391_v26  ;;  %v1700_v37 = vpop.permute.xlu1 %1699 }
 0x684   : > { %v1744_v63 = vsel %vm1624_vm2, %v1700_v37, %v1724_v30  ;;  %v1639_v37 = vmul.f32 %v4364_v14, %v4382_v23 }
 0x685   : > { %v1760_v40 = vmul.f32 %v1744_v63, %v4379_v21  ;;  %v1609_v41 = vpop.permute.xlu0 %1608  ;;  %v1767_v43 = vadd.f32 %v1759_v61, %v1751_v38  ;;  %v1640_v63 = vmul.f32 %v4368_v16, %v4385_v24 }
 0x686   : > { %v1629_v42 = vsel %vm1624_vm2, %v1585_v27, %v1609_v41 }
 0x687   : > { %v1768_v44 = vadd.f32 %v1760_v40, %v1752_v39  ;;  %v1645_v45 = vmul.f32 %v1629_v42, %v4391_v26  ;;  %v1611_v46 = vpop.permute.xlu1 %1610 }
 0x688   : > { %v1630_v48 = vsel %vm1624_vm2, %v1587_v28, %v1611_v46 }
 0x689   : > { %v1646_v4 = vmul.f32 %v1630_v48, %v4379_v21  ;;  %v1702_v52 = vpop.permute.xlu0 %1701  ;;  %v1798_v55 = vpack.c.bf16 %v1768_v44, %v1767_v43  ;;  %v1653_v58 = vadd.f32 %v1645_v45, %v1637_v50 }
 0x68a   : > { %v1745_v57 = vsel %vm1624_vm2, %v1702_v52, %v1726_v31 }
 0x68b   : > { %v1654_v59 = vadd.f32 %v1646_v4, %v1638_v3  ;;  %v1761_v47 = vmul.f32 %v1745_v57, %v4391_v26  ;;  %v1704_v49 = vpop.permute.xlu1 %1703  ;;  %v1853_v60 = vsel %vm1801_vm3, %v1798_v55, 0 }
 0x68c   : > { %v1746_v62 = vsel %vm1624_vm2, %v1704_v49, %v1728_v32  ;;  %3487 = vmatpush3.bf16.xpose.msra.mxu0 %v1853_v60 }
 0x68d   : > { %v1795_v2 = vpack.c.bf16 %v1654_v59, %v1653_v58  ;;  %v1762_v7 = vmul.f32 %v1746_v62, %v4379_v21  ;;  %v1706_v10 = vpop.permute.xlu0 %1705  ;;  %3492 = vmatprep.subr.bf16.mxu0 %v3936_v15  ;;  %v1769_v17 = vadd.f32 %v1761_v47, %v1753_v5 }
 0x68e   : > { %v1747_v1 = vsel %vm1624_vm2, %v1706_v10, %v1730_v33 }
 0x68f   : > { %v1770_v18 = vadd.f32 %v1762_v7, %v1754_v9  ;;  %v1763_v19 = vmul.f32 %v1747_v1, %v4391_v26  ;;  %v1708_v20 = vpop.permute.xlu1 %1707 }
 0x690   : > { %v1748_v22 = vsel %vm1624_vm2, %v1708_v20, %v1732_v34 }
 0x691   : > { %v1764_v27 = vmul.f32 %v1748_v22, %v4379_v21  ;;  %v1589_v28 = vpop.permute.xlu0 %1588  ;;  %v1799_v29 = vpack.c.bf16 %v1770_v18, %v1769_v17  ;;  %v1771_v30 = vadd.f32 %v1763_v19, %v1755_v11 }
 0x693   : > { %v1772_v31 = vadd.f32 %v1764_v27, %v1756_v12  ;;  %3489 = vmatmul.mubr.msk.bf16.vlgmr.msra.gmra.mrb[20].mxu0 %vm1801_vm3, %v1794_v25  ;;  %v1591_v32 = vpop.permute.xlu1 %1590  ;;  %v1900_v33 = vsel %vm1801_vm3, %v1799_v29, 0 }
 0x694   : > { %3493 = vmatpush3.bf16.xpose.msra.mxu0 %v1900_v33  ;;  %3494 = vmatprep.mubr.msk.bf16.mxu0 %vm3937_vm1, %v3936_v15 }
 0x695   : > { %v1613_v34 = vpop.permute.xlu0 %1612  ;;  %v1800_v13 = vpack.c.bf16 %v1772_v31, %v1771_v30  ;;  %3504 = vmatprep.subr.bf16.mxu0 %v3936_v15 }
 0x696   : > { %v1631_v0 = vsel %vm1624_vm2, %v1589_v28, %v1613_v34 }
 0x697   : > { %v1647_v35 = vmul.f32 %v1631_v0, %v4391_v26  ;;  %v1615_v36 = vpop.permute.xlu1 %1614  ;;  %v1947_v61 = vsel %vm1801_vm3, %v1800_v13, 0 }
 0x698   : > { %v1632_v25 = vsel %vm1624_vm2, %v1591_v32, %v1615_v36  ;;  %3499 = vmatpush3.bf16.xpose.msra.mxu1 %v1947_v61 }
 0x699   : > { %v1648_v38 = vmul.f32 %v1632_v25, %v4379_v21  ;;  %3510 = vmatprep.subr.bf16.mxu1 %v3936_v15  ;;  %v1655_v39 = vadd.f32 %v1647_v35, %v1639_v37 }
 0x69b   : > { %v1656_v40 = vadd.f32 %v1648_v38, %v1640_v63  ;;  %3495 = vmatmul.mubr.msk.bf16.vlgmr.msra.gmra.mrb[24].mxu0 %vm1801_vm3, %v1795_v2 }
 0x69c   : > { %3505 = vmatpush3.bf16.msra.mxu0 %v2090_v54  ;;  %3506 = vmatprep.mubr.msk.bf16.mxu0 %vm3937_vm1, %v3936_v15 }
 0x69d   : > { %v1796_v26 = vpack.c.bf16 %v1656_v40, %v1655_v39  ;;  %3516 = vmatprep.subr.bf16.mxu0 %v3936_v15 }
 0x69f   : > { %3501 = vmatmul.mubr.msk.bf16.vlgmr.msra.gmra.mrb[4].mxu1 %vm1801_vm3, %v1796_v26 }
 0x6a0   : > { %3512 = vmatprep.mubr.msk.bf16.mxu1 %vm3937_vm1, %v3936_v15 }
 0x6fd   : > { %v1842_v14 = vpop.f32.mrb[16].mxu0 }
 0x6fe   : > { %v1990_v16 = vmul.f32 0.25, %v1842_v14  ;;  %v3484_v21 = vpop.f32.mrb[17].mxu0 }
 0x6ff   : > { %v1845_v23 = vpop.f32.mrb[18].mxu0 }
 0x700   : > { %v1991_v24 = vmul.f32 0.25, %v1845_v23  ;;  %v3485_v41 = vpop.f32.mrb[19].mxu0  ;;  %v1998_v51 = vsel %vm1801_vm3, %v1990_v16, -inf }
 0x701   : > { %1999 = vmax.xlane.f32.xlu0 %v1998_v51 }
 0x702   : > { %v2001_v53 = vsel %vm1801_vm3, %v1991_v24, -inf }
 0x703   : > { %2002 = vmax.xlane.f32.xlu1 %v2001_v53 }
 0x766   : > { %v1889_v54 = vpop.f32.mrb[20].mxu0 }
 0x767   : > { %v1992_v42 = vmul.f32 0.25, %v1889_v54  ;;  %v3490_v43 = vpop.f32.mrb[21].mxu0 }
 0x768   : > { %v1892_v44 = vpop.f32.mrb[22].mxu0 }
 0x769   : > { %v1993_v45 = vmul.f32 0.25, %v1892_v44  ;;  %v3491_v46 = vpop.f32.mrb[23].mxu0  ;;  %v2004_v48 = vsel %vm1801_vm3, %v1992_v42, -inf }
 0x76a   : > { %2005 = vmax.xlane.f32.xlu0 %v2004_v48 }
 0x76b   : > { %v2007_v50 = vsel %vm1801_vm3, %v1993_v45, -inf }
 0x76e   : > { %2008 = vmax.xlane.f32.xlu0 %v2007_v50  ;;  %v1936_v3 = vpop.f32.mrb[24].mxu0 }
 0x76f   : > { %v1994_v4 = vmul.f32 0.25, %v1936_v3  ;;  %v3496_v52 = vpop.f32.mrb[25].mxu0 }
 0x770   : > { %v1939_v55 = vpop.f32.mrb[26].mxu0 }
 0x771   : > { %v4502_v57 = vmul.f32 0.25, %v1939_v55  ;;  %v3497_v58 = vpop.f32.mrb[27].mxu0  ;;  %v2010_v59 = vsel %vm1801_vm3, %v1994_v4, -inf }
 0x772   : > { %v1983_v47 = vpop.f32.mrb[4].mxu1  ;;  %2011 = vmax.xlane.f32.xlu0 %v2010_v59 }
 0x773   : > { %v1996_v49 = vmul.f32 0.25, %v1983_v47  ;;  %v3502_v60 = vpop.f32.mrb[5].mxu1  ;;  %v2013_v62 = vsel %vm1801_vm3, %v4502_v57, -inf }
 0x774   : > { %v1986_v5 = vpop.f32.mrb[6].mxu1  ;;  %2014 = vmax.xlane.f32.xlu1 %v2013_v62 }
 0x775   : > { %v1997_v9 = vmul.f32 0.25, %v1986_v5  ;;  %v3503_v2 = vpop.f32.mrb[7].mxu1  ;;  %v2016_v7 = vsel %vm1801_vm3, %v1996_v49, -inf }
 0x776   : > { %2017 = vmax.xlane.f32.xlu0 %v2016_v7 }
 0x777   : > { %v2019_v10 = vsel %vm1801_vm3, %v1997_v9, -inf }
 0x778   : > { %2020 = vmax.xlane.f32.xlu1 %v2019_v10 }
 0x78e   : > { %v2000_v1 = vpop.xlane.xlu0 %1999 }
 0x78f   : > { %v2022_v17 = vsub.f32 %v1990_v16, %v2000_v1 }
 0x790   : > { %v2003_v18 = vpop.xlane.xlu1 %2002 }
 0x791   : > { %v2030_v19 = vmul.f32 1.442695, %v2022_v17  ;;  %v2023_v20 = vsub.f32 %v1991_v24, %v2003_v18 }
 0x793   : > { %3765 = vpow2.f32 %v2030_v19  ;;  %v2032_v22 = vmul.f32 1.442695, %v2023_v20 }
 0x795   : > { %3767 = vpow2.f32 %v2032_v22 }
 0x79d   : > { %v3766_v11 = vpop.eup %3765 }
 0x79e   : > { %v2046_v12 = vsel %vm1801_vm3, %v3766_v11, 0.0 }
 0x79f   : > { %v3768_v27 = vpop.eup %3767  ;;  %2047 = vadd.xlane.f32.xlu0 %v2046_v12 }
 0x7a0   : > { %v2049_v28 = vsel %vm1801_vm3, %v3768_v27, 0.0 }
 0x7a1   : > { %2050 = vadd.xlane.f32.xlu1 %v2049_v28 }
 0x7f7   : > { %v2006_v29 = vpop.xlane.xlu0 %2005 }
 0x7f8   : > { %v2024_v30 = vsub.f32 %v1992_v42, %v2006_v29 }
 0x7fa   : > { %v2034_v31 = vmul.f32 1.442695, %v2024_v30 }
 0x7fb   : > { %v2009_v32 = vpop.xlane.xlu0 %2008 }
 0x7fc   : > { %3769 = vpow2.f32 %v2034_v31  ;;  %v2025_v33 = vsub.f32 %v1993_v45, %v2009_v32 }
 0x7fe   : > { %v2036_v34 = vmul.f32 1.442695, %v2025_v33 }
 0x7ff   : > { %v2012_v13 = vpop.xlane.xlu0 %2011 }
 0x800   : > { %3771 = vpow2.f32 %v2036_v34  ;;  %v2026_v0 = vsub.f32 %v1994_v4, %v2012_v13 }
 0x801   : > { %v2015_v35 = vpop.xlane.xlu1 %2014 }
 0x802   : > { %v2038_v25 = vmul.f32 1.442695, %v2026_v0  ;;  %v2027_v43 = vsub.f32 %v4502_v57, %v2015_v35 }
 0x803   : > { %v2018_v36 = vpop.xlane.xlu0 %2017 }
 0x804   : > { %v2028_v61 = vsub.f32 %v1996_v49, %v2018_v36  ;;  %v2040_v46 = vmul.f32 1.442695, %v2027_v43 }
 0x805   : > { %v2021_v37 = vpop.xlane.xlu1 %2020 }
 0x806   : > { %v3770_v63 = vpop.eup %3769  ;;  %v2042_v38 = vmul.f32 1.442695, %v2028_v61  ;;  %v2029_v39 = vsub.f32 %v1997_v9, %v2021_v37 }
 0x807   : > { %v2052_v40 = vsel %vm1801_vm3, %v3770_v63, 0.0 }
 0x808   : > { %3773 = vpow2.f32 %v2042_v38  ;;  %v2044_v26 = vmul.f32 1.442695, %v2029_v39  ;;  %2053 = vadd.xlane.f32.xlu0 %v2052_v40 }
 0x809   : > { %3775 = vpow2.f32 %v2038_v25 }
 0x80a   : > { %v3772_v14 = vpop.eup %3771  ;;  %3777 = vpow2.f32 %v2044_v26 }
 0x80b   : > { %v2055_v16 = vsel %vm1801_vm3, %v3772_v14, 0.0 }
 0x80c   : > { %2056 = vadd.xlane.f32.xlu1 %v2055_v16 }
 0x812   : > { %v4513_v21 = vpop.eup %3773 }
 0x813   : > { %v4515_v23 = vpop.eup %3775  ;;  %v2064_v24 = vsel %vm1801_vm3, %v4513_v21, 0.0 }
 0x814   : > { %v3778_v41 = vpop.eup %3777  ;;  %2065 = vadd.xlane.f32.xlu0 %v2064_v24  ;;  %v2058_v53 = vsel %vm1801_vm3, %v4515_v23, 0.0 }
 0x815   : > { %v2067_v51 = vsel %vm1801_vm3, %v3778_v41, 0.0 }
 0x816   : > { %2068 = vadd.xlane.f32.xlu1 %v2067_v51 }
 0x818   : > { %2059 = vadd.xlane.f32.xlu0 %v2058_v53 }
 0x827   : > { %3687 = vrot.lane.b32.xlu1 %v4300_v56, %s3939_s18  ;;  %s4816_s18 = sld [smem:[#allocation9_spill]] }
 0x82c   : > { %v2048_v54 = vpop.xlane.xlu0 %2047 }
 0x82d   : > { %3779 = vrcp.f32 %v2048_v54  ;;  %v3728_v16 = vld [vmem:[%s4816_s18 + $0x8] sm:$0xff]  }
 0x82e   : > { %3682 = vrot.lane.b32.xlu0 %v4300_v56, %s4815_s10  ;;  %v2051_v42 = vpop.xlane.xlu1 %2050  ;;  %s3944_s10 = smov 48  }
 0x82f   : > { %3781 = vrcp.f32 %v2051_v42 }
 0x830   : > { %3783 = vpow2.f32 %v2040_v46 }
 0x837   : > { %v3780_v44 = vpop.eup %3779 }
 0x838   : > { %v2078_v48 = vmul.f32 %v3780_v44, %v3766_v11 }
 0x839   : > { %v3782_v45 = vpop.eup %3781 }
 0x83a   : > { %v2079_v50 = vmul.f32 %v3782_v45, %v3768_v27  ;;  %v3784_v4 = vpop.eup %3783 }
 0x83b   : > { %v2061_v52 = vsel %vm1801_vm3, %v3784_v4, 0.0 }
 0x83c   : > { %v2086_v3 = vpack.c.bf16 %v2079_v50, %v2078_v48 }
 0x83e   : > { %3507 = vmatmul.mubr.msk.bf16.vlgmr.msra.gmra.mrb[28].mxu0 %vm1801_vm3, %v2086_v3 }
 0x83f   : > { %3518 = vmatprep.mubr.msk.bf16.mxu0 %vm3937_vm1, %v3936_v15 }
 0x84b   : > { %2062 = vadd.xlane.f32.xlu1 %v2061_v52 }
 0x85c   : > { %3692 = vrot.lane.b32.xlu1 %v4300_v56, %s3940_s1  ;;  %s3943_s1 = smov 16  }
 0x895   : > { %v2054_v57 = vpop.xlane.xlu0 %2053 }
 0x899   : > { %v2057_v55 = vpop.xlane.xlu1 %2056 }
 0x89a   : > { %3785 = vrcp.f32 %v2057_v55 }
 0x89b   : > { %3787 = vrcp.f32 %v2054_v57 }
 0x8a1   : > { %v2066_v58 = vpop.xlane.xlu0 %2065 }
 0x8a3   : > { %v2069_v59 = vpop.xlane.xlu1 %2068 }
 0x8a4   : > { %v3786_v60 = vpop.eup %3785  ;;  %3789 = vrcp.f32 %v2069_v59 }
 0x8a5   : > { %v2060_v47 = vpop.xlane.xlu0 %2059  ;;  %v3788_v2 = vpop.eup %3787  ;;  %v2081_v17 = vmul.f32 %v3786_v60, %v3772_v14  ;;  %3791 = vrcp.f32 %v2066_v58 }
 0x8a6   : > { %v2080_v56 = vmul.f32 %v3788_v2, %v3770_v63  ;;  %3793 = vrcp.f32 %v2060_v47  ;;  %v3727_v63 = vld [vmem:[%s4816_s18] sm:$0xff]  }
 0x8a7   : > { %v3688_v49 = vpop.permute.xlu1 %3687 }
 0x8a8   : > { %v3690_v62 = vunpack.i.h.bf16 %v3688_v49  ;;  %v3689_v5 = vunpack.i.l.bf16 %v3688_v49  ;;  %v2087_v19 = vpack.c.bf16 %v2081_v17, %v2080_v56 }
 0x8a9   : > { %v3683_v9 = vpop.permute.xlu0 %3682 }
 0x8aa   : > { %v2092_v7 = vpack.c.bf16 %v3690_v62, %v3689_v5  ;;  %v3685_v10 = vunpack.i.h.bf16 %v3683_v9  ;;  %v3684_v1 = vunpack.i.l.bf16 %v3683_v9 }
 0x8ac   : > { %v2091_v18 = vpack.c.bf16 %v3685_v10, %v3684_v1  ;;  %3517 = vmatpush3.bf16.msra.mxu0 %v2092_v7  ;;  %v3307_v10 = vld [vmem:[%s4817_s7] ss:$0 sm:$0xff]  ;;  %s4819_s7 = sld [smem:[#allocation11_spill]] }
 0x8ad   : > { %3528 = vmatprep.subr.bf16.mxu0 %v3936_v15 }
 0x8ae   : > { %3511 = vmatpush3.bf16.msra.mxu1 %v2091_v18  ;;  %v3790_v22 = vpop.eup %3789 }
 0x8af   : > { %3522 = vmatprep.subr.bf16.mxu1 %v3936_v15  ;;  %v3792_v12 = vpop.eup %3791  ;;  %v2085_v29 = vmul.f32 %v3790_v22, %v3778_v41 }
 0x8b0   : > { %v2084_v31 = vmul.f32 %v3792_v12, %v4513_v21  ;;  %v3794_v32 = vpop.eup %3793  ;;  %v3729_v21 = vld [vmem:[%s4816_s18 + $0x10] sm:$0xff]  }
 0x8b1   : > { %3513 = vmatmul.mubr.msk.bf16.vlgmr.msra.gmra.mrb[8].mxu1 %vm1801_vm3, %v2087_v19  ;;  %v2082_v13 = vmul.f32 %v3794_v32, %v4515_v23  ;;  %v3730_v23 = vld [vmem:[%s4816_s18 + $0x18] sm:$0xff]  }
 0x8b2   : > { %3524 = vmatprep.mubr.msk.bf16.mxu1 %vm3937_vm1, %v3936_v15  ;;  %v2089_v33 = vpack.c.bf16 %v2085_v29, %v2084_v31 }
 0x8d8   : > { %v2063_v20 = vpop.xlane.xlu1 %2062 }
 0x8d9   : > { %3795 = vrcp.f32 %v2063_v20 }
 0x8dc   : > { %v3693_v11 = vpop.permute.xlu1 %3692 }
 0x8dd   : > { %v3695_v27 = vunpack.i.h.bf16 %v3693_v11  ;;  %v3694_v28 = vunpack.i.l.bf16 %v3693_v11 }
 0x8df   : > { %v2093_v30 = vpack.c.bf16 %v3695_v27, %v3694_v28 }
 0x8e1   : > { %3523 = vmatpush3.bf16.msra.mxu1 %v2093_v30 }
 0x8e2   : > { %3540 = vmatprep.subr.bf16.mxu1 %v3936_v15 }
 0x8e3   : > { %v3796_v34 = vpop.eup %3795 }
 0x8e4   : > { %v2083_v0 = vmul.f32 %v3796_v34, %v3784_v4  ;;  %3525 = vmatmul.mubr.msk.bf16.vlgmr.msra.gmra.mrb[12].mxu1 %vm1801_vm3, %v2089_v33 }
 0x8e5   : > { %3544 = vmatprep.mubr.msk.bf16.mxu1 %vm3937_vm1, %v3936_v15 }
 0x8e6   : > { %v2088_v35 = vpack.c.bf16 %v2083_v0, %v2082_v13 }
 0x8e8   : > { %3519 = vmatmul.mubr.msk.bf16.vlgmr.msra.gmra.mrb[32].mxu0 %vm1801_vm3, %v2088_v35 }
 0x8e9   : > { %3536 = vmatprep.mubr.msk.bf16.mxu0 %vm3937_vm1, %v3936_v15  ;;  %3529 = vmatpush3.bf16.msra.mxu0 %v3727_v63 }
 0x8ea   : > { %3530 = vmatprep.subr.bf16.mxu0 %v3936_v15 }
 0x8ed   : > { %3531 = vmatpush3.bf16.msra.mxu0 %v3728_v16 }
 0x8ee   : > { %3532 = vmatprep.subr.bf16.mxu0 %v3936_v15 }
 0x8f1   : > { %3533 = vmatpush3.bf16.msra.mxu0 %v3729_v21 }
 0x8f2   : > { %3534 = vmatprep.subr.bf16.mxu0 %v3936_v15 }
 0x8f5   : > { %3535 = vmatpush3.bf16.msra.mxu0 %v3730_v23 }
 0x8f6   : > { %3556 = vmatprep.subr.bf16.mxu0 %v3936_v15 }
 0x911   : > { %v2131_v36 = vpop.f32.mrb[28].mxu0 }
 0x912   : > { %v3508_v61 = vpop.f32.mrb[29].mxu0 }
 0x913   : > { %v2134_v25 = vpop.f32.mrb[30].mxu0 }
 0x914   : > { %v3509_v37 = vpop.f32.mrb[31].mxu0 }
 0x984   : > { %v2175_v38 = vpop.f32.mrb[8].mxu1 }
 0x985   : > { %v3514_v39 = vpop.f32.mrb[9].mxu1 }
 0x986   : > { %v2178_v40 = vpop.f32.mrb[10].mxu1 }
 0x987   : > { %v3696_v26 = vpack.i.bf16 %v2178_v40, %v2175_v38  ;;  %v3515_v14 = vpop.f32.mrb[11].mxu1  ;;  %v3308_v40 = vld [vmem:[%s4819_s7] ss:$0 sm:$0xff]  ;;  %s4823_s7 = sld [smem:[#allocation14_spill]] }
 0x989   : > { %3697 = vrot.lane.b32.xlu1 %v3696_v26, %s3943_s1  ;;  %s3945_s1 = smov 32  }
 0x9b7   : > { %v2263_v24 = vpop.f32.mrb[12].mxu1 }
 0x9b8   : > { %v3526_v41 = vpop.f32.mrb[13].mxu1 }
 0x9b9   : > { %v2266_v51 = vpop.f32.mrb[14].mxu1 }
 0x9ba   : > { %v3706_v53 = vpack.i.bf16 %v2266_v51, %v2263_v24  ;;  %v3527_v54 = vpop.f32.mrb[15].mxu1  ;;  %v3733_v51 = vld [vmem:[%s4821_s3] sm:$0xff]  }
 0x9bb   : > { %v2219_v42 = vpop.f32.mrb[32].mxu0  ;;  %v3734_v54 = vld [vmem:[%s4821_s3 + $0x8] sm:$0xff]   ;;  %s4828_s3 = sld [smem:[#allocation21_spill]] }
 0x9bc   : > { %3707 = vrot.lane.b32.xlu1 %v3706_v53, %s3944_s10  ;;  %v3520_v43 = vpop.f32.mrb[33].mxu0  ;;  %s4818_s10 = sld [smem:[#allocation13_spill]] }
 0x9bd   : > { %v2222_v44 = vpop.f32.mrb[34].mxu0 }
 0x9be   : > { %v3701_v45 = vpack.i.bf16 %v2222_v44, %v2219_v42  ;;  %v3521_v46 = vpop.f32.mrb[35].mxu0 }
 0x9bf   : > { %v3314_v46 = vld [vmem:[%s4822_s5] ss:$0 sm:$0xff]  ;;  %s4824_s5 = sld [smem:[#allocation17_spill]] }
 0x9c0   : > { %3702 = vrot.lane.b32.xlu0 %v3701_v45, %s3945_s1  ;;  %s4820_s1 = sld [smem:[#allocation12_spill]] }
 0x9c2   : > { %v3731_v13 = vld [vmem:[%s4818_s10] sm:$0xff]   ;;  %v3732_v0 = vld [vmem:[%s4818_s10 + $0x8] sm:$0xff]  }
 0x9c3   : > { %3541 = vmatpush3.bf16.msra.mxu1 %v3731_v13 }
 0x9c4   : > { %3542 = vmatprep.subr.bf16.mxu1 %v3936_v15 }
 0x9c5   : > { %v3322_v13 = vld [vmem:[%s4824_s5 + $0x1] ss:$0 sm:$0xff] }
 0x9c6   : > { %v3309_v21 = vld [vmem:[%s4820_s1] ss:$0 sm:$0xff]  ;;  %s4825_s1 = sld [smem:[#allocation18_spill]] }
 0x9c7   : > { %3543 = vmatpush3.bf16.msra.mxu1 %v3732_v0 }
 0x9c8   : > { %3548 = vmatprep.subr.bf16.mxu1 %v3936_v15 }
 0x9cc   : > { %v3320_v0 = vld [vmem:[%s4825_s1] ss:$0 sm:$0xff]  ;;  %s4827_s1 = sld [smem:[#allocation19_spill]] }
 0x9fb   : > { %v3698_v48 = vpop.permute.xlu1 %3697 }
 0x9fc   : > { %v3700_v50 = vunpack.i.h.bf16 %v3698_v48  ;;  %v3699_v3 = vunpack.i.l.bf16 %v3698_v48 }
 0x9fe   : > { %v2294_v58 = vsel %vm1801_vm3, %v2131_v36, %v3699_v3  ;;  %v2295_v59 = vsel %vm1801_vm3, %v2134_v25, %v3700_v50 }
 0xa2e   : > { %v3708_v4 = vpop.permute.xlu1 %3707 }
 0xa2f   : > { %v3710_v47 = vunpack.i.h.bf16 %v3708_v4  ;;  %v3709_v49 = vunpack.i.l.bf16 %v3708_v4 }
 0xa32   : > { %v3703_v52 = vpop.permute.xlu0 %3702 }
 0xa33   : > { %v3705_v55 = vunpack.i.h.bf16 %v3703_v52  ;;  %v3704_v57 = vunpack.i.l.bf16 %v3703_v52 }
 0xa35   : > { %v2297_v60 = vsel %vm1074_vm0, %v2295_v59, %v3705_v55  ;;  %v2296_v62 = vsel %vm1074_vm0, %v2294_v58, %v3704_v57 }
 0xa36   : > { %v2300_v5 = vsel %vm2298_vm4, %v2297_v60, %v3710_v47  ;;  %v2299_v9 = vsel %vm2298_vm4, %v2296_v62, %v3709_v49  ;;  %v2587_v62 = vlaneseq }
 0xa37   : > { %v2309_v2 = vpack.c.bf16 %v2300_v5, %v2299_v9  ;;  %v3310_v5 = vld [vmem:[%s4823_s7] ss:$0 sm:$0xff]  ;;  %s4826_s7 = sld [smem:[#allocation20_spill]] }
 0xa38   : > { %v4595_v9 = vshrl.u32 %v2587_v62, 7 }
 0xa39   : > { %3537 = vmatmul.mubr.msk.bf16.vlgmr.msra.gmra.mrb[36].mxu0 %vm2334_vm5, %v2309_v2 }
 0xa3a   : > { %3564 = vmatprep.mubr.msk.bf16.mxu0 %vm3937_vm1, %v3936_v15  ;;  %vm2599_vm6 = vcmp.lt.s32.totalorder %v4595_v9, 3  ;;  %vm2618_vm7 = vcmp.lt.s32.totalorder %v4595_v9, 2  ;;  %vm2637_vm8 = vcmp.lt.s32.totalorder %v4595_v9, 1  ;;  %vm2666_vm9 = vcmp.lt.s32.totalorder %v4595_v9, 7 }
 0xa3b   : > { %vm2685_vm10 = vcmp.lt.s32.totalorder %v4595_v9, 6  ;;  %vm2704_vm11 = vcmp.lt.s32.totalorder %v4595_v9, 5  ;;  %vm2602_vm12 = vcmp.ge.s32.totalorder %v4595_v9, 3  ;;  %vm2621_vm14 = vcmp.ge.s32.totalorder %v4595_v9, 2 }
 0xa3c   : > { %vm2640_vm2 = vcmp.ge.s32.totalorder %v4595_v9, 1 }
 0xb0c   : > { %v2372_v7 = vpop.f32.mrb[36].mxu0 }
 0xb0d   : > { %v2379_v1 = vadd.f32 %v2372_v7, %v4232_v6  ;;  %v3538_v17 = vpop.f32.mrb[37].mxu0 }
 0xb0e   : > { %v2375_v18 = vpop.f32.mrb[38].mxu0  ;;  %v4600_v17 = vadd.s32 8, %v4595_v9 }
 0xb0f   : > { %v4564_v56 = vadd.f32 %v3307_v10, %v2379_v1  ;;  %v2380_v19 = vadd.f32 %v2375_v18, %v4235_v8  ;;  %v3539_v20 = vpop.f32.mrb[39].mxu0 }
 0xb10   : > { %vm2670_vm13 = vcmp.lt.s32.totalorder %v4600_v17, 15  ;;  %vm2689_vm15 = vcmp.lt.s32.totalorder %v4600_v17, 14  ;;  %vm2708_vm3 = vcmp.lt.s32.totalorder %v4600_v17, 13 }
 0xb11   : > { %v4567_v22 = vadd.f32 %v3307_v10, %v2380_v19  ;;  %v2392_v11 = vsel %vm1074_vm0, %v4564_v56, 0.0 }
 0xb12   : > { %2393 = vadd.xlane.f32.xlu0 %v2392_v11 }
 0xb13   : > { %v2395_v12 = vsel %vm1074_vm0, %v4567_v22, 0.0 }
 0xb14   : > { %2396 = vadd.xlane.f32.xlu1 %v2395_v12 }
 0xb9f   : > { %v2394_v6 = vpop.xlane.xlu0 %2393 }
 0xba0   : > { %v2398_v27 = vmul.f32 0.03125, %v2394_v6 }
 0xba1   : > { %v2397_v28 = vpop.xlane.xlu1 %2396 }
 0xba2   : > { %v2400_v29 = vsub.f32 %v4564_v56, %v2398_v27  ;;  %v2399_v30 = vmul.f32 0.03125, %v2397_v28  ;;  %v3321_v27 = vld [vmem:[%s4824_s5] ss:$0 sm:$0xff] }
 0xba4   : > { %v2401_v8 = vsub.f32 %v4567_v22, %v2399_v30  ;;  %v2402_v31 = vmul.f32 %v2400_v29, %v2400_v29 }
 0xba6   : > { %v2404_v32 = vsel %vm1074_vm0, %v2402_v31, 0.0  ;;  %v2403_v33 = vmul.f32 %v2401_v8, %v2401_v8 }
 0xba7   : > { %2405 = vadd.xlane.f32.xlu0 %v2404_v32 }
 0xba8   : > { %v2407_v34 = vsel %vm1074_vm0, %v2403_v33, 0.0 }
 0xbab   : > { %2408 = vadd.xlane.f32.xlu0 %v2407_v34 }
 0xc34   : > { %v2406_v35 = vpop.xlane.xlu0 %2405 }
 0xc35   : > { %v2410_v36 = vmul.f32 0.03125, %v2406_v35 }
 0xc37   : > { %v2412_v61 = vadd.f32 1e-05, %v2410_v36 }
 0xc38   : > { %v2409_v25 = vpop.xlane.xlu0 %2408 }
 0xc39   : > { %3797 = vrsqrt.f32 %v2412_v61  ;;  %v2411_v37 = vmul.f32 0.03125, %v2409_v25 }
 0xc3b   : > { %v2413_v63 = vadd.f32 1e-05, %v2411_v37  ;;  %v3323_v37 = vld [vmem:[%s4824_s5 + $0x2] ss:$0 sm:$0xff] }
 0xc3d   : > { %3799 = vrsqrt.f32 %v2413_v63 }
 0xc43   : > { %v3798_v38 = vpop.eup %3797 }
 0xc44   : > { %v2416_v39 = vmul.f32 %v3798_v38, %v2400_v29 }
 0xc46   : > { %v2424_v14 = vmul.f32 %v3308_v40, %v2416_v39 }
 0xc47   : > { %v3800_v26 = vpop.eup %3799 }
 0xc48   : > { %v2417_v16 = vmul.f32 %v3800_v26, %v2401_v8  ;;  %v2432_v24 = vadd.f32 %v3309_v21, %v2424_v14 }
 0xc4a   : > { %v2425_v23 = vmul.f32 %v3308_v40, %v2417_v16 }
 0xc4c   : > { %v2433_v41 = vadd.f32 %v3309_v21, %v2425_v23 }
 0xc4e   : > { %v2438_v53 = vpack.c.bf16 %v2433_v41, %v2432_v24 }
 0xc50   : > { %3545 = vmatmul.mubr.msk.bf16.vlgmr.msra.gmra.mrb[16].mxu1 %vm1074_vm0, %v2438_v53 }
 0xc51   : > { %3549 = vmatpush3.bf16.msra.mxu1 %v3733_v51  ;;  %3552 = vmatprep.mubr.msk.bf16.mxu1 %vm3937_vm1, %v3936_v15 }
 0xc52   : > { %3550 = vmatprep.subr.bf16.mxu1 %v3936_v15 }
 0xc55   : > { %3551 = vmatpush3.bf16.msra.mxu1 %v3734_v54 }
 0xc56   : > { %3568 = vmatprep.subr.bf16.mxu1 %v3936_v15 }
 0xc58   : > { %3553 = vmatmul.mubr.msk.bf16.vlgmr.msra.gmra.mrb[20].mxu1 %vm1074_vm0, %v2438_v53 }
 0xc59   : > { %3572 = vmatprep.mubr.msk.bf16.mxu1 %vm3937_vm1, %v3936_v15 }
 0xd23   : > { %v2495_v42 = vpop.f32.mrb[16].mxu1 }
 0xd24   : > { %v3546_v43 = vpop.f32.mrb[17].mxu1  ;;  %v2496_v2 = vadd.f32 %v3310_v5, %v2495_v42  ;;  %v3324_v42 = vld [vmem:[%s4824_s5 + $0x3] ss:$0 sm:$0xff] }
 0xd25   : > { %v2498_v44 = vpop.f32.mrb[18].mxu1  ;;  %v3325_v43 = vld [vmem:[%s4824_s5 + $0x4] ss:$0 sm:$0xff] }
 0xd26   : > { %v3547_v45 = vpop.f32.mrb[19].mxu1  ;;  %v2499_v10 = vadd.f32 %v3310_v5, %v2498_v44 }
 0xd2b   : > { %v2559_v48 = vpop.f32.mrb[20].mxu1 }
 0xd2c   : > { %v2560_v50 = vadd.f32 %v3314_v46, %v2559_v48  ;;  %v3554_v3 = vpop.f32.mrb[21].mxu1 }
 0xd2d   : > { %v2562_v4 = vpop.f32.mrb[22].mxu1 }
 0xd2e   : > { %v3318_v52 = vmul.f32 -1.442695, %v2560_v50  ;;  %v2563_v55 = vadd.f32 %v3314_v46, %v2562_v4  ;;  %v3555_v57 = vpop.f32.mrb[23].mxu1 }
 0xd30   : > { %3801 = vpow2.f32 %v3318_v52  ;;  %v3319_v58 = vmul.f32 -1.442695, %v2563_v55  ;;  %v3326_v55 = vld [vmem:[%s4824_s5 + $0x5] ss:$0 sm:$0xff] }
 0xd32   : > { %3803 = vpow2.f32 %v3319_v58 }
 0xd3a   : > { %v3802_v59 = vpop.eup %3801 }
 0xd3b   : > { %v2572_v47 = vadd.f32 1.0, %v3802_v59 }
 0xd3c   : > { %v3804_v49 = vpop.eup %3803 }
 0xd3d   : > { %3805 = vrcp.f32 %v2572_v47  ;;  %v2573_v60 = vadd.f32 1.0, %v3804_v49 }
 0xd3f   : > { %3807 = vrcp.f32 %v2573_v60  ;;  %v3327_v60 = vld [vmem:[%s4824_s5 + $0x6] ss:$0 sm:$0xff]  ;;  %s4831_s5 = sld [smem:[#allocation23_spill]] }
 0xd47   : > { %v3806_v7 = vpop.eup %3805 }
 0xd48   : > { %v4597_v1 = vmul.f32 %v3806_v7, %v2496_v2 }
 0xd49   : > { %v3808_v18 = vpop.eup %3807 }
 0xd4a   : > { %v2579_v19 = vmul.f32 %v3808_v18, %v2499_v10  ;;  %v2597_v20 = vrot.slane %v4597_v1, 5  ;;  %v2616_v11 = vrot.slane %v4597_v1, 6  ;;  %v2635_v12 = vrot.slane %v4597_v1, 7 }
 0xd4b   : > { %v2664_v6 = vrot.slane %v4597_v1, 1  ;;  %v2683_v8 = vrot.slane %v4597_v1, 2  ;;  %v2702_v33 = vrot.slane %v4597_v1, 3  ;;  %v2660_v2 = vmul.f32 %v3324_v42, %v4597_v1 }
 0xd4c   : > { %v2598_v28 = vrot.slane %v2579_v19, 5  ;;  %v2617_v29 = vrot.slane %v2579_v19, 6  ;;  %v2636_v30 = vrot.slane %v2579_v19, 7  ;;  %v2665_v31 = vrot.slane %v2579_v19, 1 }
 0xd4d   : > { %v2684_v32 = vrot.slane %v2579_v19, 2  ;;  %v2703_v34 = vrot.slane %v2579_v19, 3  ;;  %v2661_v3 = vmul.f32 %v3324_v42, %v2579_v19 }
 0xd4e   : > { %v2600_v35 = vsel %vm2599_vm6, %v2597_v20, %v2598_v28  ;;  %v2619_v36 = vsel %vm2618_vm7, %v2616_v11, %v2617_v29  ;;  %v2638_v61 = vsel %vm2637_vm8, %v2635_v12, %v2636_v30  ;;  %v2601_v25 = vsel %vm2599_vm6, %v2598_v28, %v2597_v20 }
 0xd4f   : > { %v2613_v63 = vmul.f32 %v3321_v27, %v2600_v35  ;;  %v2668_v38 = vsel %vm2666_vm9, %v2665_v31, %v2664_v6  ;;  %v2687_v39 = vsel %vm2685_vm10, %v2684_v32, %v2683_v8  ;;  %v2706_v40 = vsel %vm2704_vm11, %v2703_v34, %v2702_v33 }
 0xd50   : > { %v2604_v26 = vsel %vm2602_vm12, %v2601_v25, 0.0  ;;  %v2632_v16 = vmul.f32 %v3322_v13, %v2619_v36  ;;  %v2651_v21 = vmul.f32 %v3323_v37, %v2638_v61  ;;  %v2620_v24 = vsel %vm2618_vm7, %v2617_v29, %v2616_v11 }
 0xd51   : > { %v2615_v14 = vadd.f32 %v3320_v0, %v2613_v63  ;;  %v2612_v23 = vmul.f32 %v3321_v27, %v2604_v26  ;;  %v2623_v51 = vsel %vm2621_vm14, %v2620_v24, 0.0  ;;  %v2639_v53 = vsel %vm2637_vm8, %v2636_v30, %v2635_v12  ;;  %v3737_v24 = vld [vmem:[%s4826_s7 + $0x10] sm:$0xff]  }
 0xd52   : > { %v2667_v54 = vsel %vm2666_vm9, %v2664_v6, %v2665_v31  ;;  %v2672_v44 = vsel %vm2670_vm13, %v2668_v38, 0.0  ;;  %v2631_v46 = vmul.f32 %v3322_v13, %v2623_v51  ;;  %v2642_v48 = vsel %vm2640_vm2, %v2639_v53, 0.0 }
 0xd53   : > { %v2634_v41 = vadd.f32 %v2632_v16, %v2615_v14  ;;  %v2614_v45 = vadd.f32 %v3320_v0, %v2612_v23  ;;  %v2686_v4 = vsel %vm2685_vm10, %v2683_v8, %v2684_v32  ;;  %v2705_v52 = vsel %vm2704_vm11, %v2702_v33, %v2703_v34  ;;  %v3736_v23 = vld [vmem:[%s4826_s7 + $0x8] sm:$0xff]  }
 0xd54   : > { %v2691_v57 = vsel %vm2689_vm15, %v2687_v39, 0.0  ;;  %v2650_v59 = vmul.f32 %v3323_v37, %v2642_v48  ;;  %v2680_v49 = vmul.f32 %v3325_v43, %v2672_v44  ;;  %v2710_v62 = vsel %vm2708_vm3, %v2706_v40, 0.0  ;;  %v3330_v48 = vld [vmem:[%s4827_s1] ss:$0 sm:$0xff]  ;;  %s4829_s1 = sld [smem:[#allocation24_spill]] }
 0xd55   : > { %v2653_v50 = vadd.f32 %v2651_v21, %v2634_v41  ;;  %v2633_v58 = vadd.f32 %v2631_v46, %v2614_v45  ;;  %v2699_v10 = vmul.f32 %v3326_v55, %v2691_v57  ;;  %v2679_v9 = vmul.f32 %v3325_v43, %v2667_v54  ;;  %v3735_v21 = vld [vmem:[%s4826_s7] sm:$0xff]   ;;  %v3738_v41 = vld [vmem:[%s4826_s7 + $0x18] sm:$0xff]   ;;  %s4832_s7 = sld [smem:[#allocation26_spill]] }
 0xd56   : > { %v2718_v20 = vmul.f32 %v3327_v60, %v2710_v62  ;;  %v2698_v12 = vmul.f32 %v3326_v55, %v2686_v4  ;;  %v2717_v28 = vmul.f32 %v3327_v60, %v2705_v52  ;;  %3557 = vmatpush3.bf16.msra.mxu0 %v3735_v21 }
 0xd57   : > { %v2663_v47 = vadd.f32 %v2661_v3, %v2653_v50  ;;  %v2652_v5 = vadd.f32 %v2650_v59, %v2633_v58  ;;  %3558 = vmatprep.subr.bf16.mxu0 %v3936_v15  ;;  %v3336_v58 = vld [vmem:[%s4828_s3] ss:$0 sm:$0xff]  ;;  %s4830_s3 = sld [smem:[#allocation22_spill]] }
 0xd59   : > { %v2682_v7 = vadd.f32 %v2680_v49, %v2663_v47  ;;  %v2662_v18 = vadd.f32 %v2660_v2, %v2652_v5 }
 0xd5a   : > { %3559 = vmatpush3.bf16.msra.mxu0 %v3736_v23 }
 0xd5b   : > { %v2701_v19 = vadd.f32 %v2699_v10, %v2682_v7  ;;  %v2681_v11 = vadd.f32 %v2679_v9, %v2662_v18  ;;  %3560 = vmatprep.subr.bf16.mxu0 %v3936_v15  ;;  %v3746_v21 = vld [vmem:[%s4832_s7 + $0x28] sm:$0xff]   ;;  %v3747_v23 = vld [vmem:[%s4832_s7 + $0x30] sm:$0xff]  }
 0xd5d   : > { %v2720_v6 = vadd.f32 %v2718_v20, %v2701_v19  ;;  %v2700_v27 = vadd.f32 %v2698_v12, %v2681_v11 }
 0xd5e   : > { %3561 = vmatpush3.bf16.msra.mxu0 %v3737_v24  ;;  %v3748_v24 = vld [vmem:[%s4832_s7 + $0x38] sm:$0xff]  }
 0xd5f   : > { %v3329_v29 = vmul.f32 -1.442695, %v2720_v6  ;;  %v2719_v30 = vadd.f32 %v2717_v28, %v2700_v27  ;;  %3562 = vmatprep.subr.bf16.mxu0 %v3936_v15  ;;  %v3739_v28 = vld [vmem:[%s4829_s1] sm:$0xff]  }
 0xd60   : > { %3569 = vmatpush3.bf16.msra.mxu1 %v3739_v28 }
 0xd61   : > { %3809 = vpow2.f32 %v3329_v29  ;;  %v3328_v8 = vmul.f32 -1.442695, %v2719_v30  ;;  %v3740_v29 = vld [vmem:[%s4829_s1 + $0x8] sm:$0xff]   ;;  %3570 = vmatprep.subr.bf16.mxu1 %v3936_v15  ;;  %s3362_s1 = sshll.u32 %s4154_s0, 8  ;;  %s3946_s0 = smov [#allocation2]  }
 0xd62   : > { %3563 = vmatpush3.bf16.msra.mxu0 %v3738_v41  ;;  %s4726_s9 = scalar_lea.hbm %s4131_s30, %s3362_s1  ;;  %s3841_s1 = sshll.u32 %s3946_s0, 4  ;;  %s3842_s1 = int_to_ptr.vmem [resolvable:$false] %s3841_s1 }
 0xd63   : > { %3811 = vpow2.f32 %v3328_v8 }
 0xd64   : > { %3571 = vmatpush3.bf16.msra.mxu1 %v3740_v29 }
 0xd65   : > { %3576 = vmatprep.subr.bf16.mxu1 %v3936_v15 }
 0xd6b   : > { %v3810_v17 = vpop.eup %3809 }
 0xd6c   : > { %v2728_v31 = vadd.f32 1.0, %v3810_v17 }
 0xd6d   : > { %v3812_v32 = vpop.eup %3811 }
 0xd6e   : > { %3813 = vrcp.f32 %v2728_v31  ;;  %v2727_v1 = vadd.f32 1.0, %v3812_v32 }
 0xd70   : > { %3815 = vrcp.f32 %v2727_v1 }
 0xd78   : > { %v3814_v33 = vpop.eup %3813 }
 0xd79   : > { %v2734_v34 = vmul.f32 %v3814_v33, %v2720_v6 }
 0xd7a   : > { %v3816_v13 = vpop.eup %3815 }
 0xd7b   : > { %v2738_v0 = vsel %vm2334_vm5, %v2734_v34, 0.0  ;;  %v2733_v35 = vmul.f32 %v3816_v13, %v2719_v30 }
 0xd7c   : > { %2739 = vadd.xlane.f32.xlu1 %v2738_v0 }
 0xd7d   : > { %v2735_v36 = vsel %vm2334_vm5, %v2733_v35, 0.0 }
 0xd7e   : > { %2736 = vadd.xlane.f32.xlu0 %v2735_v36 }
 0xe09   : > { %v2740_v61 = vpop.xlane.xlu1 %2739 }
 0xe0a   : > { %v2743_v25 = vmul.f32 0.015625, %v2740_v61  ;;  %v3338_v61 = vld [vmem:[%s4831_s5] ss:$0 sm:$0xff]  ;;  %s4833_s5 = sld [smem:[#allocation25_spill]] }
 0xe0b   : > { %v2737_v63 = vpop.xlane.xlu0 %2736 }
 0xe0c   : > { %v2745_v37 = vsub.f32 %v2734_v34, %v2743_v25  ;;  %v2742_v38 = vmul.f32 0.015625, %v2737_v63  ;;  %v3337_v34 = vld [vmem:[%s4830_s3] ss:$0 sm:$0xff]  ;;  %s1061_s3 = sand.u32 1, %s3891_s23  }
 0xe0e   : > { %v2747_v39 = vmul.f32 %v2745_v37, %v2745_v37  ;;  %v2744_v40 = vsub.f32 %v2733_v35, %v2742_v38 }
 0xe10   : > { %v2751_v26 = vsel %vm2334_vm5, %v2747_v39, 0.0  ;;  %v2746_v14 = vmul.f32 %v2744_v40, %v2744_v40  ;;  %v3741_v39 = vld [vmem:[%s4832_s7] sm:$0xff]  }
 0xe11   : > { %2752 = vadd.xlane.f32.xlu1 %v2751_v26  ;;  %v3743_v26 = vld [vmem:[%s4832_s7 + $0x10] sm:$0xff]   ;;  %v3339_v41 = vld [vmem:[%s4833_s5] ss:$0 sm:$0xff]  ;;  %s3263_s5 = sshll.u32 %s1061_s3, 4 }
 0xe12   : > { %v2748_v16 = vsel %vm2334_vm5, %v2746_v14, 0.0  ;;  %v3744_v14 = vld [vmem:[%s4832_s7 + $0x18] sm:$0xff]  }
 0xe13   : > { %2749 = vadd.xlane.f32.xlu0 %v2748_v16  ;;  %v3745_v16 = vld [vmem:[%s4832_s7 + $0x20] sm:$0xff]  }
 0xe9e   : > { %v2753_v51 = vpop.xlane.xlu1 %2752 }
 0xe9f   : > { %v2755_v53 = vmul.f32 0.015625, %v2753_v51 }
 0xea0   : > { %v2750_v42 = vpop.xlane.xlu0 %2749 }
 0xea1   : > { %v2757_v54 = vmax.f32 %v2755_v53, 1e-06  ;;  %v2754_v43 = vmul.f32 0.015625, %v2750_v42 }
 0xea3   : > { %3817 = vrsqrt.f32 %v2757_v54  ;;  %v2756_v44 = vmax.f32 %v2754_v43, 1e-06 }
 0xea5   : > { %3819 = vrsqrt.f32 %v2756_v44 }
 0xead   : > { %v3818_v45 = vpop.eup %3817 }
 0xeae   : > { %v2761_v46 = vmul.f32 %v3818_v45, %v2745_v37 }
 0xeaf   : > { %v3820_v50 = vpop.eup %3819 }
 0xeb0   : > { %v2760_v3 = vmul.f32 %v3820_v50, %v2744_v40  ;;  %v2770_v4 = vmul.f32 %v3330_v48, %v2761_v46  ;;  %v3742_v40 = vld [vmem:[%s4832_s7 + $0x8] sm:$0xff]   ;;  %s1063_s7 = scalar_lea.vmem [#allocation2], %s3263_s5  ;;  %s3843_s5 = scalar_lea.vmem %s3842_s1, 512 }
 0xeb1   : > { %s3162_s8 = sshll.u32 %s1063_s7, 4  ;;  %s4729_s8 = int_to_ptr.vmem [resolvable:$true] %s3162_s8 }
 0xeb2   : > { %v2769_v52 = vmul.f32 %v3330_v48, %v2760_v3  ;;  %p3844_p0 = scmp.lt.s32.totalorder %s4729_s8, %s3842_s1 }
 0xeb4   : > { %v2779_v55 = vpack.c.bf16 %v2770_v4, %v2769_v52 }
 0xeb6   : > { %3565 = vmatmul.mubr.msk.bf16.vlgmr.msra.gmra.mrb[40].mxu0 %vm2334_vm5, %v2779_v55 }
 0xf89   : > { %v2841_v57 = vpop.f32.mrb[40].mxu0 }
 0xf8a   : > { %v2848_v59 = vadd.f32 %v2841_v57, %v4564_v56  ;;  %v3566_v47 = vpop.f32.mrb[41].mxu0 }
 0xf8b   : > { %v2844_v49 = vpop.f32.mrb[42].mxu0 }
 0xf8c   : > { %v4676_v60 = vadd.f32 %v3336_v58, %v2848_v59  ;;  %v2849_v62 = vadd.f32 %v2844_v49, %v4567_v22  ;;  %v3567_v5 = vpop.f32.mrb[43].mxu0  ;;  %v3345_v59 = vld [vmem:[%s4116_s27] ss:$0 sm:$0xff] }
 0xf8e   : > { %v4679_v2 = vadd.f32 %v3336_v58, %v2849_v62  ;;  %v2861_v7 = vsel %vm1074_vm0, %v4676_v60, 0.0 }
 0xf8f   : > { %2862 = vadd.xlane.f32.xlu0 %v2861_v7 }
 0xf90   : > { %v2864_v10 = vsel %vm1074_vm0, %v4679_v2, 0.0 }
 0xf91   : > { %2865 = vadd.xlane.f32.xlu1 %v2864_v10 }
0x101c   : > { %v2863_v56 = vpop.xlane.xlu0 %2862 }
0x101d   : > { %v2867_v18 = vmul.f32 0.03125, %v2863_v56 }
0x101e   : > { %v2866_v9 = vpop.xlane.xlu1 %2865 }
0x101f   : > { %v2869_v19 = vsub.f32 %v4676_v60, %v2867_v18  ;;  %v2868_v20 = vmul.f32 0.03125, %v2866_v9 }
0x1021   : > { %v2870_v22 = vsub.f32 %v4679_v2, %v2868_v20  ;;  %v2871_v11 = vmul.f32 %v2869_v19, %v2869_v19 }
0x1023   : > { %v2873_v12 = vsel %vm1074_vm0, %v2871_v11, 0.0  ;;  %v2872_v6 = vmul.f32 %v2870_v22, %v2870_v22 }
0x1024   : > { %2874 = vadd.xlane.f32.xlu0 %v2873_v12 }
0x1025   : > { %v2876_v27 = vsel %vm1074_vm0, %v2872_v6, 0.0 }
0x1026   : > { %2877 = vadd.xlane.f32.xlu1 %v2876_v27 }
0x10b1   : > { %v2875_v30 = vpop.xlane.xlu0 %2874 }
0x10b2   : > { %v2879_v8 = vmul.f32 0.03125, %v2875_v30 }
0x10b3   : > { %v2878_v17 = vpop.xlane.xlu1 %2877 }
0x10b4   : > { %v2881_v31 = vadd.f32 1e-05, %v2879_v8  ;;  %v2880_v32 = vmul.f32 0.03125, %v2878_v17 }
0x10b6   : > { %3821 = vrsqrt.f32 %v2881_v31  ;;  %v2882_v1 = vadd.f32 1e-05, %v2880_v32 }
0x10b8   : > { %3823 = vrsqrt.f32 %v2882_v1 }
0x10c0   : > { %v3822_v33 = vpop.eup %3821 }
0x10c1   : > { %v2885_v13 = vmul.f32 %v3822_v33, %v2869_v19 }
0x10c2   : > { %v3824_v0 = vpop.eup %3823 }
0x10c3   : > { %v2893_v35 = vmul.f32 %v3337_v34, %v2885_v13  ;;  %v2886_v36 = vmul.f32 %v3824_v0, %v2870_v22  ;;  %v3354_v0 = vld [vmem:[%s4834_s4] ss:$0 sm:$0xff]  ;;  %s4732_s4 = scalar_lea.sflag [#allocation3], %s1061_s3 }
0x10c5   : > { %v2894_v25 = vmul.f32 %v3337_v34, %v2886_v36  ;;  %v2901_v37 = vadd.f32 %v3338_v61, %v2893_v35 }
0x10c7   : > { %v2902_v63 = vadd.f32 %v3338_v61, %v2894_v25  ;;  %v3355_v61 = vld [vmem:[%s4835_s6] ss:$0 sm:$0xff]  ;;  %s3837_s6 = scalar_lea.vmem %s4729_s8, 256 }
0x10c8   : > { %p3838_p11 = scmp.ne.s32.totalorder %s4729_s8, %s3837_s6  ;;  %p3845_p1 = scmp.lt.s32.totalorder %s3843_s5, %s3837_s6 }
0x10c9   : > { %v2907_v38 = vpack.c.bf16 %v2902_v63, %v2901_v37 }
0x10ca   : > { %p3839_p12 = pnand %p3838_p11, %p4171_p5  ;;  %p3846_p2 = por %p3845_p1, %p3844_p0 }
0x10cb   : > { %3573 = vmatmul.mubr.msk.bf16.vlgmr.msra.gmra.mrb[24].mxu1 %vm1074_vm0, %v2907_v38 }
0x10cc   : > { %3592 = vmatprep.mubr.msk.bf16.mxu1 %vm3937_vm1, %v3936_v15  ;;  %3577 = vmatpush3.bf16.msra.mxu1 %v3741_v39  ;;  %p3840_p13 = pneg %p3839_p12 }
0x10cd   : > { %3578 = vmatprep.subr.bf16.mxu1 %v3936_v15 }
0x10ce   : > { %p3847_p3 = pnand %p3846_p2, %p3840_p13 }
0x10d0   : > { %3579 = vmatpush3.bf16.msra.mxu1 %v3742_v40 }
0x10d1   : > { %3580 = vmatprep.subr.bf16.mxu1 %v3936_v15 }
0x10d4   : > { %3581 = vmatpush3.bf16.msra.mxu1 %v3743_v26 }
0x10d5   : > { %3582 = vmatprep.subr.bf16.mxu1 %v3936_v15 }
0x10d8   : > { %3583 = vmatpush3.bf16.msra.mxu1 %v3744_v14 }
0x10d9   : > { %3584 = vmatprep.subr.bf16.mxu1 %v3936_v15 }
0x10dc   : > { %3585 = vmatpush3.bf16.msra.mxu1 %v3745_v16 }
0x10dd   : > { %3586 = vmatprep.subr.bf16.mxu1 %v3936_v15 }
0x10e0   : > { %3587 = vmatpush3.bf16.msra.mxu1 %v3746_v21 }
0x10e1   : > { %3588 = vmatprep.subr.bf16.mxu1 %v3936_v15 }
0x10e4   : > { %3589 = vmatpush3.bf16.msra.mxu1 %v3747_v23 }
0x10e5   : > { %3590 = vmatprep.subr.bf16.mxu1 %v3936_v15 }
0x10e8   : > { %3591 = vmatpush3.bf16.msra.mxu1 %v3748_v24 }
0x119e   : > { %v2964_v51 = vpop.f32.mrb[24].mxu1 }
0x119f   : > { %v2965_v53 = vadd.f32 %v3339_v41, %v2964_v51  ;;  %v3574_v54 = vpop.f32.mrb[25].mxu1 }
0x11a0   : > { %v2967_v42 = vpop.f32.mrb[26].mxu1 }
0x11a1   : > { %v3343_v43 = vmul.f32 -1.442695, %v2965_v53  ;;  %v2968_v44 = vadd.f32 %v3339_v41, %v2967_v42  ;;  %v3575_v45 = vpop.f32.mrb[27].mxu1 }
0x11a3   : > { %3825 = vpow2.f32 %v3343_v43  ;;  %v3344_v46 = vmul.f32 -1.442695, %v2968_v44 }
0x11a5   : > { %3827 = vpow2.f32 %v3344_v46 }
0x11ad   : > { %v3826_v48 = vpop.eup %3825 }
0x11ae   : > { %v2977_v50 = vadd.f32 1.0, %v3826_v48 }
0x11af   : > { %v3828_v3 = vpop.eup %3827 }
0x11b0   : > { %3829 = vrcp.f32 %v2977_v50  ;;  %v2978_v4 = vadd.f32 1.0, %v3828_v3 }
0x11b2   : > { %3831 = vrcp.f32 %v2978_v4 }
0x11ba   : > { %v3830_v15 = vpop.eup %3829 }
0x11bb   : > { %v2983_v55 = vmul.f32 %v3830_v15, %v2965_v53 }
0x11bc   : > { %v3832_v52 = vpop.eup %3831 }
0x11bd   : > { %v2984_v57 = vmul.f32 %v3832_v52, %v2968_v44 }
0x11bf   : > { %v3001_v58 = vpack.c.bf16 %v2984_v57, %v2983_v55 }
0x11c1   : > { %3593 = vmatmul.mubr.bf16.vlgmr.msra.gmra.mrb[28].mxu1 %v3001_v58 }
0x1294   : > { %v3091_v47 = vpop.f32.mrb[28].mxu1 }
0x1295   : > { %v3092_v49 = vadd.f32 %v3345_v59, %v3091_v47  ;;  %v3594_v62 = vpop.f32.mrb[29].mxu1 }
0x1296   : > { %v3094_v5 = vpop.f32.mrb[30].mxu1 }
0x1297   : > { %v3098_v7 = vmul.f32 0.5, %v3092_v49  ;;  %v3095_v10 = vadd.f32 %v3345_v59, %v3094_v5  ;;  %v3595_v56 = vpop.f32.mrb[31].mxu1 }
0x1299   : > { %v3099_v18 = vmul.f32 0.5, %v3095_v10  ;;  %v3100_v9 = vadd.f32 %v3098_v7, %v4676_v60 }
0x129b   : > { %v3104_v19 = vsel %vm1074_vm0, %v3100_v9, 0.0  ;;  %v3101_v20 = vadd.f32 %v3099_v18, %v4679_v2 }
0x129c   : > { %3105 = vadd.xlane.f32.xlu0 %v3104_v19 }
0x129d   : > { %v3107_v22 = vsel %vm1074_vm0, %v3101_v20, 0.0 }
0x129e   : > { %3108 = vadd.xlane.f32.xlu1 %v3107_v22 }
0x1329   : > { %v3106_v11 = vpop.xlane.xlu0 %3105 }
0x132a   : > { %v3110_v12 = vmul.f32 0.03125, %v3106_v11 }
0x132b   : > { %v3109_v6 = vpop.xlane.xlu1 %3108 }
0x132c   : > { %v3112_v27 = vsub.f32 %v3100_v9, %v3110_v12  ;;  %v3111_v28 = vmul.f32 0.03125, %v3109_v6 }
0x132e   : > { %v3113_v29 = vsub.f32 %v3101_v20, %v3111_v28  ;;  %v3114_v30 = vmul.f32 %v3112_v27, %v3112_v27 }
0x1330   : > { %v3116_v8 = vsel %vm1074_vm0, %v3114_v30, 0.0  ;;  %v3115_v60 = vmul.f32 %v3113_v29, %v3113_v29 }
0x1331   : > { %3117 = vadd.xlane.f32.xlu0 %v3116_v8 }
0x1332   : > { %v3119_v17 = vsel %vm1074_vm0, %v3115_v60, 0.0 }
0x1333   : > { %3120 = vadd.xlane.f32.xlu1 %v3119_v17 }
0x13be   : > { %v3118_v2 = vpop.xlane.xlu0 %3117 }
0x13bf   : > { %v3122_v31 = vmul.f32 0.03125, %v3118_v2 }
0x13c0   : > { %v3121_v32 = vpop.xlane.xlu1 %3120 }
0x13c1   : > { %v3124_v1 = vadd.f32 1e-05, %v3122_v31  ;;  %v3123_v33 = vmul.f32 0.03125, %v3121_v32 }
0x13c3   : > { %3833 = vrsqrt.f32 %v3124_v1  ;;  %v3125_v34 = vadd.f32 1e-05, %v3123_v33 }
0x13c5   : > { %3835 = vrsqrt.f32 %v3125_v34 }
0x13cd   : > { %v3834_v13 = vpop.eup %3833 }
0x13ce   : > { %v3128_v35 = vmul.f32 %v3834_v13, %v3112_v27 }
0x13cf   : > { %v3836_v36 = vpop.eup %3835 }
0x13d0   : > { %v3136_v25 = vmul.f32 %v3354_v0, %v3128_v35  ;;  %v3129_v37 = vmul.f32 %v3836_v36, %v3113_v29 }
0x13d2   : > { %v3144_v63 = vadd.f32 %v3355_v61, %v3136_v25  ;;  %v3137_v38 = vmul.f32 %v3354_v0, %v3129_v37 }
0x13d4   : > { %v3145_v39 = vadd.f32 %v3355_v61, %v3137_v38  ;;  %3146 = vst.msk [vmem:[%s1063_s7] sm:$0xff] %vm1074_vm0, %v3144_v63 }
0x13d6   : > { %3147 = vst.msk [vmem:[%s1063_s7 + $0x8] sm:$0xff] %vm1074_vm0, %v3145_v39 }
0x13d7   : > { %3850 = shalt.err (!%p3847_p3)
}
0x13d8   : > { %s3851_s7 = scalar_lea.hbm %s4726_s9, 256  ;;  %s3855_s3 = scalar_lea.hbm %s4131_s30, 512 }
0x13d9   : > { %p3852_p4 = scmp.ne.s32.totalorder %s4726_s9, %s3851_s7  ;;  %p3856_p9 = scmp.lt.u32.totalorder %s4726_s9, %s4131_s30 }
0x13da   : > { %p3857_p10 = scmp.lt.u32.totalorder %s3855_s3, %s3851_s7  ;;  %p3859_p12 = scmp.lt.u32.totalorder %s3851_s7, %s4726_s9 }
0x13db   : > { %p3853_p7 = pnand %p3852_p4, %p4171_p5 }
0x13dc   : > { %p3858_p11 = por %p3857_p10, %p3856_p9 }
0x13dd   : > { %p3854_p8 = pneg %p3853_p7 }
0x13de   : > { %p3860_p0 = por %p3859_p12, %p3858_p11 }
0x13e0   : > { %p3861_p13 = pnand %p3860_p0, %p3854_p8 }
0x13e2   : > { %3864 = shalt.err (!%p3861_p13)
}
0x13e3   : > { %s3947_s6 = smov 128   ;;  %s4836_s0 = smov 8  }
0x13e4   : > { %3596 = dma.vmem_to_hbm [thread:$0]  (%p4171_p5), %s4729_s8, 256, %s4726_s9, %s4732_s4, %s3947_s6, %s3947_s6, %s4836_s0  }
0x13e5 PF: > { %p3602_p1 = scmp.ge.s32.totalorder %s3899_s28, 2  ;;  %s3177_s1 = sand.u32 1, %s3887_s22  }
0x13e6   : > { %s3178_s5 = scalar_lea.sflag [#allocation3], %s3177_s1 }
0x13e7   : > { %p3599_p2 = pnand %p3602_p1, %p4175_p6 }
0x13e9   : > { %3882 = dma.done.wait (!%p3599_p2), %s3178_s5, 256  }
0x13ea   : > { %3884 = vsyncadd (!%p3599_p2), %s3178_s5, 4294967040  ;;  %p81_p3 = scmp.ge.s32.totalorder %s4158_s2, 4   ;;  %s4837_s22 = smov %s3891_s23 }
0x13eb   : > { %s4838_s23 = smov %s3895_s26  ;;  %s4839_s26 = smov %s4169_s11 }
0x13ec   : > { %s4840_s28 = smov %s4158_s2  ;;  %83 = sbr.rel (!%p81_p3) target bundleno = 71 (0x47), region = 230 }
0x13f3   :  { %3183 = vsyncpa [#allocation3], 1 }
0x13f4   :  { %3185 = vsyncpa [#allocation3 + $0x1], 1 }

</bundles_post_ra>
